<compile_context>
chip_gen: v5e
topology: v5e:2x2
jax: 0.10.0
libtpu: 0.0.40
codegen_flags: <defaults>
</compile_context>

<pallas_src>
import functools

import jax
import jax.numpy as jnp
import numpy as np
from jax.experimental import pallas as pl
from jax.experimental.pallas import tpu as pltpu

_EPS = 1e-5
_LANES = 128


def _round_up(x, m):
    return (x + m - 1) // m * m


def _residual_block_kernel(x_ref, res_ref, w1_ref, s1_ref, b1_ref,
                           w2_ref, s2_ref, b2_ref, o_ref,
                           *, H, W, TH, WO, WE, Cp):
    # x_ref  : (H+4, WE+2, Cp) bf16  zero-padded input (2px top/left, >=2px
    #                                bottom/right, channels -> Cp lanes)
    # res_ref: (TH, WO, Cp)    f32   aligned identity-shortcut row tile
    # w*_ref : (9*Cp, Cp)      bf16  im2col-packed 3x3 conv weights
    # s*/b*  : (1, Cp)         f32   folded eval-mode BatchNorm scale / bias
    # o_ref  : (TH, WO, Cp)    bf16  output row tile
    t = pl.program_id(1)
    row0 = pl.multiple_of(t * TH, TH)          # first output row of this tile
    HE = TH + 2                                # extended conv1 rows (conv2 halo)

    # Receptive field of this tile: leading-dim slice = pure addressing.
    xt = x_ref[pl.ds(row0, TH + 4), :, :]      # (TH+4, WE+2, Cp) bf16

    # ---- conv1: one im2col matmul, K = 9*Cp --------------------------------
    # Column (kw) shifts hoisted: 3 shifted copies, reused by the 3 kh row
    # slices (row slices along the leading dim cost nothing).
    xcol = [xt[:, kw:kw + WE, :] for kw in range(3)]      # 3x (TH+4, WE, Cp)
    p1 = jnp.concatenate(
        [xcol[kw][kh:kh + HE] for kh in range(3) for kw in range(3)],
        axis=-1)                                          # (HE, WE, 9*Cp)
    p1 = p1.reshape(HE * WE, 9 * Cp)                      # view (WE % 8 == 0)
    acc1 = jnp.dot(p1, w1_ref[...], preferred_element_type=jnp.float32)

    # folded BatchNorm (eval) + ReLU on the lane-dense f32 accumulator
    h = jnp.maximum(acc1 * s1_ref[...] + b1_ref[...], 0.0)
    h = h.reshape(HE, WE, Cp)                             # view

    # conv2's implicit zero padding: zero every extended position that falls
    # outside the image (row -1 / row H at the batch edges, col -1 / col W,
    # and the width-alignment padding columns).
    gr = jax.lax.broadcasted_iota(jnp.int32, (HE, WE, 1), 0) + (row0 - 1)
    gc = jax.lax.broadcasted_iota(jnp.int32, (HE, WE, 1), 1) - 1
    valid = (gr >= 0) & (gr < H) & (gc >= 0) & (gc < W)
    hb = jnp.where(valid, h, 0.0).astype(x_ref.dtype)     # bf16 for the MXU

    # ---- conv2: one im2col matmul, K = 9*Cp --------------------------------
    hcol = [hb[:, kw:kw + WO, :] for kw in range(3)]      # 3x (HE, WO, Cp)
    p2 = jnp.concatenate(
        [hcol[kw][kh:kh + TH] for kh in range(3) for kw in range(3)],
        axis=-1).reshape(TH * WO, 9 * Cp)                 # view (WO % 8 == 0)
    acc2 = jnp.dot(p2, w2_ref[...], preferred_element_type=jnp.float32)
    out = (acc2 * s2_ref[...] + b2_ref[...]).reshape(TH, WO, Cp)

    # identity shortcut (f32, DMA'd aligned) + final ReLU, single bf16 cast.
    o_ref[...] = jnp.maximum(out + res_ref[...], 0.0).astype(o_ref.dtype)


def _fold_bn(conv_bias, gamma, beta, mean, var, cp, eps=_EPS):
    scale = gamma / jnp.sqrt(var + eps)
    bias = (conv_bias - mean) * scale + beta
    # NOTE: pad AFTER the fold so padded channels get scale = bias = 0.
    scale = jnp.pad(scale, (0, cp - scale.shape[0]))
    bias = jnp.pad(bias, (0, cp - bias.shape[0]))
    return (scale.reshape(1, cp).astype(jnp.float32),
            bias.reshape(1, cp).astype(jnp.float32))


def _pack_conv_weight(w_oihw, cp):
    # OIHW -> HWIO -> pad channels to cp -> (9*cp, cp) im2col layout, bf16.
    w = jnp.transpose(w_oihw, (2, 3, 1, 0))
    _, _, ci, co = w.shape
    w = jnp.pad(w, ((0, 0), (0, 0), (0, cp - ci), (0, cp - co)))
    return w.reshape(9 * cp, cp).astype(jnp.bfloat16)     # rows: (kh, kw, ci)


def _pick_row_tile(h):
    # Keep >=2 grid steps per batch (pipeline overlap; both v7x TensorCores)
    # while making each matmul's M = TH*W large enough to amortize per-step
    # overhead.  On v6e/v5e (128 MiB VMEM) larger TH is preferred; shrink TH
    # for very large C on v7x (64 MiB VMEM).
    for th in (64, 32, 16, 8):
        if h % th == 0 and h // th >= 2:
            return th
    return h


def residual_block(x_nchw, params):
    """NCHW boundary adapter around the NHWC Pallas kernel.

    In a full ResNet the NHWC, Cp-padded bf16 activation would be carried
    end-to-end between residual blocks; the transposes / pads / slices below
    only exist to match the PyTorch NCHW interface of this standalone test.
    """
    N, C, H, W = x_nchw.shape
    Cout = params["w1"].shape[0]
    assert Cout == C, "identity shortcut requires in_channels == out_channels"
    Cp = _round_up(max(C, _LANES), _LANES)
    TH = _pick_row_tile(H)
    nH = H // TH
    WO = _round_up(W, 8)       # sublane-aligned output width
    WE = WO + 8                # extended conv1 width (>= W+2, multiple of 8)
    WI = WE + 2                # padded input width

    x_nhwc = jnp.transpose(x_nchw, (0, 2, 3, 1))
    # conv input: bf16, 2px top/left zero pad, right/bottom pad, Cp lanes.
    x_pad = jnp.pad(x_nhwc.astype(jnp.bfloat16),
                    ((0, 0), (2, 2), (2, WE - W), (0, Cp - C)))
    # identity shortcut: f32, lane/sublane-aligned row tiles.
    x_res = jnp.pad(x_nhwc, ((0, 0), (0, 0), (0, WO - W), (0, Cp - C)))

    w1 = _pack_conv_weight(params["w1"], Cp)
    w2 = _pack_conv_weight(params["w2"], Cp)
    s1, b1 = _fold_bn(params["b1"], params["g1"], params["be1"],
                      params["m1"], params["v1"], Cp)
    s2, b2 = _fold_bn(params["b2"], params["g2"], params["be2"],
                      params["m2"], params["v2"], Cp)

    kernel = functools.partial(_residual_block_kernel, H=H, W=W, TH=TH,
                               WO=WO, WE=WE, Cp=Cp)

    out = pl.pallas_call(
        kernel,
        out_shape=jax.ShapeDtypeStruct((N, H, WO, Cp), jnp.bfloat16),
        grid_spec=pltpu.PrefetchScalarGridSpec(
            num_scalar_prefetch=0,
            grid=(N, nH),                       # row-tile axis innermost
            in_specs=[
                # full padded image per batch: block index constant across the
                # row-tile axis -> DMA'd once per batch, resident in VMEM.
                # TODO(synk): for v7x with >=112x112 maps switch this to a
                # per-row-tile halo window (manual DMA) to fit 64 MiB VMEM.
                pl.BlockSpec((None, H + 4, WI, Cp), lambda b, t: (b, 0, 0, 0)),
                pl.BlockSpec((None, TH, WO, Cp), lambda b, t: (b, t, 0, 0)),
                pl.BlockSpec((9 * Cp, Cp), lambda b, t: (0, 0)),
                pl.BlockSpec((1, Cp), lambda b, t: (0, 0)),
                pl.BlockSpec((1, Cp), lambda b, t: (0, 0)),
                pl.BlockSpec((9 * Cp, Cp), lambda b, t: (0, 0)),
                pl.BlockSpec((1, Cp), lambda b, t: (0, 0)),
                pl.BlockSpec((1, Cp), lambda b, t: (0, 0)),
            ],
            out_specs=pl.BlockSpec((None, TH, WO, Cp),
                                   lambda b, t: (b, t, 0, 0)),
        ),
        compiler_params=pltpu.CompilerParams(
            dimension_semantics=("parallel", "parallel"),
            # Raise the scoped-VMEM cap past the 16 MiB (v5e) / 32 MiB (v6e)
            # defaults so large-C / large-TH configs are not tile-limited;
            # 64 MiB also respects v7x's physical VMEM.
            vmem_limit_bytes=64 * 1024 * 1024),
    )(x_pad, x_res, w1, s1, b1, w2, s2, b2)

    # boundary adapter back to the PyTorch layout / dtype
    return jnp.transpose(out[:, :, :W, :C].astype(jnp.float32), (0, 3, 1, 2))


def _reference(x, params, eps=_EPS):
    """Pure-JAX NCHW f32 reference matching the PyTorch module (eval mode)."""
    def conv(x, w, b):
        y = jax.lax.conv_general_dilated(
            x, w, window_strides=(1, 1), padding=((1, 1), (1, 1)),
            dimension_numbers=("NCHW", "OIHW", "NCHW"),
            precision=jax.lax.Precision.HIGHEST)
        return y + b.reshape(1, -1, 1, 1)

    def bn(x, g, be, m, v):
        r = lambda t: t.reshape(1, -1, 1, 1)
        return (x - r(m)) / jnp.sqrt(r(v) + eps) * r(g) + r(be)

    out = conv(x, params["w1"], params["b1"])
    out = bn(out, params["g1"], params["be1"], params["m1"], params["v1"])
    out = jnp.maximum(out, 0.0)
    out = conv(out, params["w2"], params["b2"])
    out = bn(out, params["g2"], params["be2"], params["m2"], params["v2"])
    return jnp.maximum(out + x, 0.0)


if __name__ == "__main__":
    N, C, H, W = 2, 4, 16, 16
    key = jax.random.PRNGKey(0)
    ks = jax.random.split(key, 13)

    x = jax.random.normal(ks[0], (N, C, H, W), jnp.float32)
    params = {
        # conv1 + bn1
        "w1": jax.random.normal(ks[1], (C, C, 3, 3), jnp.float32) * 0.1,
        "b1": jax.random.normal(ks[2], (C,), jnp.float32) * 0.1,
        "g1": jax.random.uniform(ks[3], (C,), jnp.float32, 0.5, 1.5),
        "be1": jax.random.normal(ks[4], (C,), jnp.float32) * 0.1,
        "m1": jax.random.normal(ks[5], (C,), jnp.float32) * 0.1,
        "v1": jax.random.uniform(ks[6], (C,), jnp.float32, 0.5, 1.5),
        # conv2 + bn2
        "w2": jax.random.normal(ks[7], (C, C, 3, 3), jnp.float32) * 0.1,
        "b2": jax.random.normal(ks[8], (C,), jnp.float32) * 0.1,
        "g2": jax.random.uniform(ks[9], (C,), jnp.float32, 0.5, 1.5),
        "be2": jax.random.normal(ks[10], (C,), jnp.float32) * 0.1,
        "m2": jax.random.normal(ks[11], (C,), jnp.float32) * 0.1,
        "v2": jax.random.uniform(ks[12], (C,), jnp.float32, 0.5, 1.5),
    }

    out = jax.block_until_ready(residual_block(x, params))
    ref = jax.block_until_ready(_reference(x, params))

    # bf16 conv operands and bf16 output store (f32 accumulation throughout).
    np.testing.assert_allclose(np.asarray(out), np.asarray(ref),
                               rtol=3e-2, atol=3e-2)

    print("KERNEL_OK")
</pallas_src>

<mosaic_0001>
module attributes {stable_mosaic.version = 11 : i64} {
  func.func @_residual_block_kernel(%arg0: i32, %arg1: i32, %arg2: memref<1x20x26x128xbf16, #tpu.memory_space<vmem>>, %arg3: memref<1x8x16x128xf32, #tpu.memory_space<vmem>>, %arg4: memref<1152x128xbf16, #tpu.memory_space<vmem>>, %arg5: memref<1x128xf32, #tpu.memory_space<vmem>>, %arg6: memref<1x128xf32, #tpu.memory_space<vmem>>, %arg7: memref<1152x128xbf16, #tpu.memory_space<vmem>>, %arg8: memref<1x128xf32, #tpu.memory_space<vmem>>, %arg9: memref<1x128xf32, #tpu.memory_space<vmem>>, %arg10: memref<1x8x16x128xbf16, #tpu.memory_space<vmem>>) attributes {dimension_semantics = [#tpu.dimension_semantics<parallel>, #tpu.dimension_semantics<parallel>], iteration_bounds = array<i64: 2, 2>, scalar_prefetch = 0 : i64, scratch_operands = 0 : i64, tpu.core_type = #tpu.core_type<tc>, window_params = [{transform_indices = @transform_0, window_bounds = array<i64: 1, 20, 26, 128>}, {transform_indices = @transform_1, window_bounds = array<i64: 1, 8, 16, 128>}, {pipeline_mode = #tpu.pipeline_mode<synchronous>, transform_indices = @transform_2, window_bounds = array<i64: 1152, 128>}, {pipeline_mode = #tpu.pipeline_mode<synchronous>, transform_indices = @transform_3, window_bounds = array<i64: 1, 128>}, {pipeline_mode = #tpu.pipeline_mode<synchronous>, transform_indices = @transform_4, window_bounds = array<i64: 1, 128>}, {pipeline_mode = #tpu.pipeline_mode<synchronous>, transform_indices = @transform_5, window_bounds = array<i64: 1152, 128>}, {pipeline_mode = #tpu.pipeline_mode<synchronous>, transform_indices = @transform_6, window_bounds = array<i64: 1, 128>}, {pipeline_mode = #tpu.pipeline_mode<synchronous>, transform_indices = @transform_7, window_bounds = array<i64: 1, 128>}, {transform_indices = @transform_8, window_bounds = array<i64: 1, 8, 16, 128>}]} {
    %c8_i32 = arith.constant 8 : i32
    %0 = arith.muli %arg1, %c8_i32 : i32
    %1 = tpu.assume_multiple %0, 8 : i32
    %c0 = arith.constant 0 : index
    %2 = arith.index_cast %1 : i32 to index
    %c0_0 = arith.constant 0 : index
    %c0_1 = arith.constant 0 : index
    %3 = vector.load %arg2[%c0, %2, %c0_0, %c0_1] : memref<1x20x26x128xbf16, #tpu.memory_space<vmem>>, vector<1x12x26x128xbf16>
    %4 = vector.shape_cast %3 : vector<1x12x26x128xbf16> to vector<12x26x128xbf16>
    %5 = vector.extract_strided_slice %4 {offsets = [0, 0, 0], sizes = [12, 24, 128], strides = [1, 1, 1]} : vector<12x26x128xbf16> to vector<12x24x128xbf16>
    %6 = vector.extract_strided_slice %4 {offsets = [0, 1, 0], sizes = [12, 24, 128], strides = [1, 1, 1]} : vector<12x26x128xbf16> to vector<12x24x128xbf16>
    %7 = vector.extract_strided_slice %4 {offsets = [0, 2, 0], sizes = [12, 24, 128], strides = [1, 1, 1]} : vector<12x26x128xbf16> to vector<12x24x128xbf16>
    %8 = vector.extract_strided_slice %5 {offsets = [0, 0, 0], sizes = [10, 24, 128], strides = [1, 1, 1]} : vector<12x24x128xbf16> to vector<10x24x128xbf16>
    %9 = vector.extract_strided_slice %6 {offsets = [0, 0, 0], sizes = [10, 24, 128], strides = [1, 1, 1]} : vector<12x24x128xbf16> to vector<10x24x128xbf16>
    %10 = vector.extract_strided_slice %7 {offsets = [0, 0, 0], sizes = [10, 24, 128], strides = [1, 1, 1]} : vector<12x24x128xbf16> to vector<10x24x128xbf16>
    %11 = vector.extract_strided_slice %5 {offsets = [1, 0, 0], sizes = [10, 24, 128], strides = [1, 1, 1]} : vector<12x24x128xbf16> to vector<10x24x128xbf16>
    %12 = vector.extract_strided_slice %6 {offsets = [1, 0, 0], sizes = [10, 24, 128], strides = [1, 1, 1]} : vector<12x24x128xbf16> to vector<10x24x128xbf16>
    %13 = vector.extract_strided_slice %7 {offsets = [1, 0, 0], sizes = [10, 24, 128], strides = [1, 1, 1]} : vector<12x24x128xbf16> to vector<10x24x128xbf16>
    %14 = vector.extract_strided_slice %5 {offsets = [2, 0, 0], sizes = [10, 24, 128], strides = [1, 1, 1]} : vector<12x24x128xbf16> to vector<10x24x128xbf16>
    %15 = vector.extract_strided_slice %6 {offsets = [2, 0, 0], sizes = [10, 24, 128], strides = [1, 1, 1]} : vector<12x24x128xbf16> to vector<10x24x128xbf16>
    %16 = vector.extract_strided_slice %7 {offsets = [2, 0, 0], sizes = [10, 24, 128], strides = [1, 1, 1]} : vector<12x24x128xbf16> to vector<10x24x128xbf16>
    %17 = tpu.concatenate %8, %9, %10, %11, %12, %13, %14, %15, %16 in 2 : vector<10x24x128xbf16>, vector<10x24x128xbf16>, vector<10x24x128xbf16>, vector<10x24x128xbf16>, vector<10x24x128xbf16>, vector<10x24x128xbf16>, vector<10x24x128xbf16>, vector<10x24x128xbf16>, vector<10x24x128xbf16> -> vector<10x24x1152xbf16>
    %18 = vector.shape_cast %17 : vector<10x24x1152xbf16> to vector<240x1152xbf16>
    %c0_2 = arith.constant 0 : index
    %c0_3 = arith.constant 0 : index
    %19 = vector.load %arg4[%c0_2, %c0_3] : memref<1152x128xbf16, #tpu.memory_space<vmem>>, vector<1152x128xbf16>
    %cst = arith.constant dense<0.000000e+00> : vector<240x128xf32>
    %20 = tpu.matmul %18, %19, %cst {dimension_numbers = #tpu.dot_dimension_numbers<[1], [0], [0], [1], [0, 0, 1, 1], [], []>} : vector<240x1152xbf16>, vector<1152x128xbf16>, vector<240x128xf32> -> vector<240x128xf32>
    %c0_4 = arith.constant 0 : index
    %c0_5 = arith.constant 0 : index
    %21 = vector.load %arg5[%c0_4, %c0_5] : memref<1x128xf32, #tpu.memory_space<vmem>>, vector<1x128xf32>
    %22 = vector.broadcast %21 : vector<1x128xf32> to vector<240x128xf32>
    %23 = arith.mulf %20, %22 : vector<240x128xf32>
    %c0_6 = arith.constant 0 : index
    %c0_7 = arith.constant 0 : index
    %24 = vector.load %arg6[%c0_6, %c0_7] : memref<1x128xf32, #tpu.memory_space<vmem>>, vector<1x128xf32>
    %25 = vector.broadcast %24 : vector<1x128xf32> to vector<240x128xf32>
    %26 = arith.addf %23, %25 : vector<240x128xf32>
    %cst_8 = arith.constant 0.000000e+00 : f32
    %27 = vector.broadcast %cst_8 : f32 to vector<240x128xf32>
    %28 = arith.maximumf %26, %27 : vector<240x128xf32>
    %29 = vector.shape_cast %28 : vector<240x128xf32> to vector<10x24x128xf32>
    %30 = tpu.iota {dimensions = array<i32: 0>} : vector<10x24x1xi32>
    %c1_i32 = arith.constant 1 : i32
    %31 = arith.subi %1, %c1_i32 : i32
    %32 = vector.broadcast %31 : i32 to vector<10x24x1xi32>
    %33 = arith.addi %30, %32 : vector<10x24x1xi32>
    %34 = tpu.iota {dimensions = array<i32: 1>} : vector<10x24x1xi32>
    %c1_i32_9 = arith.constant 1 : i32
    %35 = vector.broadcast %c1_i32_9 : i32 to vector<10x24x1xi32>
    %36 = arith.subi %34, %35 : vector<10x24x1xi32>
    %c0_i32 = arith.constant 0 : i32
    %37 = vector.broadcast %c0_i32 : i32 to vector<10x24x1xi32>
    %38 = arith.cmpi sge, %33, %37 : vector<10x24x1xi32>
    %c16_i32 = arith.constant 16 : i32
    %39 = vector.broadcast %c16_i32 : i32 to vector<10x24x1xi32>
    %40 = arith.cmpi slt, %33, %39 : vector<10x24x1xi32>
    %41 = arith.andi %38, %40 : vector<10x24x1xi1>
    %c0_i32_10 = arith.constant 0 : i32
    %42 = vector.broadcast %c0_i32_10 : i32 to vector<10x24x1xi32>
    %43 = arith.cmpi sge, %36, %42 : vector<10x24x1xi32>
    %44 = arith.andi %41, %43 : vector<10x24x1xi1>
    %c16_i32_11 = arith.constant 16 : i32
    %45 = vector.broadcast %c16_i32_11 : i32 to vector<10x24x1xi32>
    %46 = arith.cmpi slt, %36, %45 : vector<10x24x1xi32>
    %47 = arith.andi %44, %46 : vector<10x24x1xi1>
    %cst_12 = arith.constant 0.000000e+00 : f32
    %48 = vector.shape_cast %47 : vector<10x24x1xi1> to vector<10x24x1xi1>
    %49 = vector.broadcast %48 : vector<10x24x1xi1> to vector<10x24x128xi1>
    %50 = vector.broadcast %cst_12 : f32 to vector<10x24x128xf32>
    %51 = arith.select %49, %29, %50 : vector<10x24x128xi1>, vector<10x24x128xf32>
    %52 = arith.truncf %51 : vector<10x24x128xf32> to vector<10x24x128xbf16>
    %53 = vector.extract_strided_slice %52 {offsets = [0, 0, 0], sizes = [10, 16, 128], strides = [1, 1, 1]} : vector<10x24x128xbf16> to vector<10x16x128xbf16>
    %54 = vector.extract_strided_slice %52 {offsets = [0, 1, 0], sizes = [10, 16, 128], strides = [1, 1, 1]} : vector<10x24x128xbf16> to vector<10x16x128xbf16>
    %55 = vector.extract_strided_slice %52 {offsets = [0, 2, 0], sizes = [10, 16, 128], strides = [1, 1, 1]} : vector<10x24x128xbf16> to vector<10x16x128xbf16>
    %56 = vector.extract_strided_slice %53 {offsets = [0, 0, 0], sizes = [8, 16, 128], strides = [1, 1, 1]} : vector<10x16x128xbf16> to vector<8x16x128xbf16>
    %57 = vector.extract_strided_slice %54 {offsets = [0, 0, 0], sizes = [8, 16, 128], strides = [1, 1, 1]} : vector<10x16x128xbf16> to vector<8x16x128xbf16>
    %58 = vector.extract_strided_slice %55 {offsets = [0, 0, 0], sizes = [8, 16, 128], strides = [1, 1, 1]} : vector<10x16x128xbf16> to vector<8x16x128xbf16>
    %59 = vector.extract_strided_slice %53 {offsets = [1, 0, 0], sizes = [8, 16, 128], strides = [1, 1, 1]} : vector<10x16x128xbf16> to vector<8x16x128xbf16>
    %60 = vector.extract_strided_slice %54 {offsets = [1, 0, 0], sizes = [8, 16, 128], strides = [1, 1, 1]} : vector<10x16x128xbf16> to vector<8x16x128xbf16>
    %61 = vector.extract_strided_slice %55 {offsets = [1, 0, 0], sizes = [8, 16, 128], strides = [1, 1, 1]} : vector<10x16x128xbf16> to vector<8x16x128xbf16>
    %62 = vector.extract_strided_slice %53 {offsets = [2, 0, 0], sizes = [8, 16, 128], strides = [1, 1, 1]} : vector<10x16x128xbf16> to vector<8x16x128xbf16>
    %63 = vector.extract_strided_slice %54 {offsets = [2, 0, 0], sizes = [8, 16, 128], strides = [1, 1, 1]} : vector<10x16x128xbf16> to vector<8x16x128xbf16>
    %64 = vector.extract_strided_slice %55 {offsets = [2, 0, 0], sizes = [8, 16, 128], strides = [1, 1, 1]} : vector<10x16x128xbf16> to vector<8x16x128xbf16>
    %65 = tpu.concatenate %56, %57, %58, %59, %60, %61, %62, %63, %64 in 2 : vector<8x16x128xbf16>, vector<8x16x128xbf16>, vector<8x16x128xbf16>, vector<8x16x128xbf16>, vector<8x16x128xbf16>, vector<8x16x128xbf16>, vector<8x16x128xbf16>, vector<8x16x128xbf16>, vector<8x16x128xbf16> -> vector<8x16x1152xbf16>
    %66 = vector.shape_cast %65 : vector<8x16x1152xbf16> to vector<128x1152xbf16>
    %c0_13 = arith.constant 0 : index
    %c0_14 = arith.constant 0 : index
    %67 = vector.load %arg7[%c0_13, %c0_14] : memref<1152x128xbf16, #tpu.memory_space<vmem>>, vector<1152x128xbf16>
    %cst_15 = arith.constant dense<0.000000e+00> : vector<128x128xf32>
    %68 = tpu.matmul %66, %67, %cst_15 {dimension_numbers = #tpu.dot_dimension_numbers<[1], [0], [0], [1], [0, 0, 1, 1], [], []>} : vector<128x1152xbf16>, vector<1152x128xbf16>, vector<128x128xf32> -> vector<128x128xf32>
    %c0_16 = arith.constant 0 : index
    %c0_17 = arith.constant 0 : index
    %69 = vector.load %arg8[%c0_16, %c0_17] : memref<1x128xf32, #tpu.memory_space<vmem>>, vector<1x128xf32>
    %70 = vector.broadcast %69 : vector<1x128xf32> to vector<128x128xf32>
    %71 = arith.mulf %68, %70 : vector<128x128xf32>
    %c0_18 = arith.constant 0 : index
    %c0_19 = arith.constant 0 : index
    %72 = vector.load %arg9[%c0_18, %c0_19] : memref<1x128xf32, #tpu.memory_space<vmem>>, vector<1x128xf32>
    %73 = vector.broadcast %72 : vector<1x128xf32> to vector<128x128xf32>
    %74 = arith.addf %71, %73 : vector<128x128xf32>
    %75 = vector.shape_cast %74 : vector<128x128xf32> to vector<8x16x128xf32>
    %c0_20 = arith.constant 0 : index
    %c0_21 = arith.constant 0 : index
    %c0_22 = arith.constant 0 : index
    %c0_23 = arith.constant 0 : index
    %76 = vector.load %arg3[%c0_20, %c0_21, %c0_22, %c0_23] : memref<1x8x16x128xf32, #tpu.memory_space<vmem>>, vector<1x8x16x128xf32>
    %77 = vector.shape_cast %76 : vector<1x8x16x128xf32> to vector<8x16x128xf32>
    %78 = arith.addf %75, %77 : vector<8x16x128xf32>
    %cst_24 = arith.constant 0.000000e+00 : f32
    %79 = vector.broadcast %cst_24 : f32 to vector<8x16x128xf32>
    %80 = arith.maximumf %78, %79 : vector<8x16x128xf32>
    %81 = arith.truncf %80 : vector<8x16x128xf32> to vector<8x16x128xbf16>
    %c0_25 = arith.constant 0 : index
    %c0_26 = arith.constant 0 : index
    %c0_27 = arith.constant 0 : index
    %c0_28 = arith.constant 0 : index
    %82 = vector.load %arg10[%c0_25, %c0_26, %c0_27, %c0_28] : memref<1x8x16x128xbf16, #tpu.memory_space<vmem>>, vector<1x8x16x128xbf16>
    %83 = vector.shape_cast %82 : vector<1x8x16x128xbf16> to vector<8x16x128xbf16>
    %84 = vector.shape_cast %81 : vector<8x16x128xbf16> to vector<1x8x16x128xbf16>
    tpu.vector_store %arg10[%c0_25, %c0_26, %c0_27, %c0_28], %84 {strides = array<i32>} : memref<1x8x16x128xbf16, #tpu.memory_space<vmem>>, vector<1x8x16x128xbf16>,
    return
  }
  func.func @transform_0(%arg0: i32, %arg1: i32) -> (i32, i32, i32, i32) {
    %c0_i32 = arith.constant 0 : i32
    %c0_i32_0 = arith.constant 0 : i32
    %c0_i32_1 = arith.constant 0 : i32
    %c0_i32_2 = arith.constant 0 : i32
    return %arg0, %c0_i32, %c0_i32_0, %c0_i32_1 : i32, i32, i32, i32
  }
  func.func @transform_1(%arg0: i32, %arg1: i32) -> (i32, i32, i32, i32) {
    %c0_i32 = arith.constant 0 : i32
    %c0_i32_0 = arith.constant 0 : i32
    %c0_i32_1 = arith.constant 0 : i32
    return %arg0, %arg1, %c0_i32, %c0_i32_0 : i32, i32, i32, i32
  }
  func.func @transform_2(%arg0: i32, %arg1: i32) -> (i32, i32) {
    %c0_i32 = arith.constant 0 : i32
    %c0_i32_0 = arith.constant 0 : i32
    %c0_i32_1 = arith.constant 0 : i32
    return %c0_i32, %c0_i32_0 : i32, i32
  }
  func.func @transform_3(%arg0: i32, %arg1: i32) -> (i32, i32) {
    %c0_i32 = arith.constant 0 : i32
    %c0_i32_0 = arith.constant 0 : i32
    %c0_i32_1 = arith.constant 0 : i32
    return %c0_i32, %c0_i32_0 : i32, i32
  }
  func.func @transform_4(%arg0: i32, %arg1: i32) -> (i32, i32) {
    %c0_i32 = arith.constant 0 : i32
    %c0_i32_0 = arith.constant 0 : i32
    %c0_i32_1 = arith.constant 0 : i32
    return %c0_i32, %c0_i32_0 : i32, i32
  }
  func.func @transform_5(%arg0: i32, %arg1: i32) -> (i32, i32) {
    %c0_i32 = arith.constant 0 : i32
    %c0_i32_0 = arith.constant 0 : i32
    %c0_i32_1 = arith.constant 0 : i32
    return %c0_i32, %c0_i32_0 : i32, i32
  }
  func.func @transform_6(%arg0: i32, %arg1: i32) -> (i32, i32) {
    %c0_i32 = arith.constant 0 : i32
    %c0_i32_0 = arith.constant 0 : i32
    %c0_i32_1 = arith.constant 0 : i32
    return %c0_i32, %c0_i32_0 : i32, i32
  }
  func.func @transform_7(%arg0: i32, %arg1: i32) -> (i32, i32) {
    %c0_i32 = arith.constant 0 : i32
    %c0_i32_0 = arith.constant 0 : i32
    %c0_i32_1 = arith.constant 0 : i32
    return %c0_i32, %c0_i32_0 : i32, i32
  }
  func.func @transform_8(%arg0: i32, %arg1: i32) -> (i32, i32, i32, i32) {
    %c0_i32 = arith.constant 0 : i32
    %c0_i32_0 = arith.constant 0 : i32
    %c0_i32_1 = arith.constant 0 : i32
    return %arg0, %arg1, %c0_i32, %c0_i32_0 : i32, i32, i32, i32
  }
}

</mosaic_0001>

<bundles_post_ra>
// kernel: tpu_custom_call.1
= control target key start
LH: loop header
LB: loop body
LE: loop exit
PB: predicated region body
PF: predicated region fallthrough
CT: control target
= control target key end

     0   :  { %s7715_s0 = inlined_call_operand.vmem [shape: bf16[2,20,26,128], index: 0, kind: input, shape index: {}]   ;;  %s7716_s1 = inlined_call_operand.hbm [shape: f32[2,16,16,128], index: 1, kind: input, shape index: {}]   ;;  %s7717_s2 = inlined_call_operand.vmem [shape: bf16[1152,128], index: 2, kind: input, shape index: {}]   ;;  %s7718_s3 = inlined_call_operand.vmem [shape: f32[1,128], index: 3, kind: input, shape index: {}]   ;;  %s7719_s4 = inlined_call_operand.vmem [shape: f32[1,128], index: 4, kind: input, shape index: {}]   ;;  %s7720_s5 = inlined_call_operand.vmem [shape: bf16[1152,128], index: 5, kind: input, shape index: {}]   ;;  %s7721_s6 = inlined_call_operand.vmem [shape: f32[1,128], index: 6, kind: input, shape index: {}]   ;;  %s7722_s7 = inlined_call_operand.vmem [shape: f32[1,128], index: 7, kind: input, shape index: {}]   ;;  %s7723_s8 = inlined_call_operand.hbm [shape: bf16[2,16,16,128], index: 8, kind: output, shape index: {}]  }
   0x1   :  { %7771 = sst [smem:[#allocation69_spill]] %s7723_s8 }
   0x2   :  { %13 = vsyncpa [#allocation3], 0 }
   0x3   :  { %15 = vsyncpa [#allocation3 + $0x1], 0 }
   0x4   :  { %16 = vsyncpa [#allocation4], 0 }
   0x5   :  { %18 = vsyncpa [#allocation4 + $0x1], 0  ;;  %s5351_s27 = smov 0   ;;  %s5353_s28 = smov 0  }
   0x6   :  { %s5355_s29 = smov 0   ;;  %s5357_s30 = smov 0  }
   0x7   :  { %s5359_s9 = smov 0   ;;  %s5361_s10 = smov 0  }
   0x8   :  { %s5363_s11 = smov 0   ;;  %s5365_s12 = smov 0  }
   0x9 LB: > { %7772 = sst [smem:[#allocation8_spill]] %s5272_s27  ;;  %s4200_s13 = sadd.s32 4294967295, %s5300_s12   ;;  %s5300_s12 = sphi %s5365_s12, %s24_s12   ;;  %s5296_s11 = sphi %s5363_s11, %s8001_s11   ;;  %s5292_s10 = sphi %s5361_s10, %s8000_s10   ;;  %s5288_s9 = sphi %s5359_s9, %s7999_s9   ;;  %s5284_s30 = sphi %s5357_s30, %s7998_s30   ;;  %s5280_s29 = sphi %s5355_s29, %s7993_s29   ;;  %s5276_s28 = sphi %s5353_s28, %s7997_s28   ;;  %s5272_s27 = sphi %s5351_s27, %s7996_s27  }
   0xa   : > { %7773 = sst [smem:[#allocation9_spill]] %s5280_s29  ;;  %s4201_s14 = sadd.s32 4294967294, %s5300_s12  }
   0xb   : > { %s33_s15 = sadd.s32 1, %s5292_s10  ;;  %s36_s16 = sadd.s32 1, %s5296_s11 }
   0xc   : > { %p34_p0 = scmp.ge.s32.totalorder %s33_s15, 2  ;;  %s71_s17 = sadd.s32 1, %s5280_s29 }
   0xd   : > { %p78_p1 = scmp.ne.s32.totalorder %s5280_s29, %s5276_s28  ;;  %p79_p2 = scmp.eq.s32.totalorder %s5300_s12, 0 }
   0xe   : > { %s8003_s15 = smov (%p34_p0, %s33_s15), 0  ;;  %s8005_s16 = smov (!%p34_p0, %s36_s16), %s5296_s11 }
   0xf   : > { %7774 = sst [smem:[#allocation10_spill]] %s8003_s15  ;;  %s67_s18 = ssub.s32 %s5292_s10, %s8003_s15 }
  0x10   : > { %p5404_p3 = por %p79_p2, %p78_p1  ;;  %p38_p4 = scmp.ge.s32.totalorder %s8005_s16, 2 }
  0x11   : > { %p84_p5 = scmp.ne.s32.totalorder %s5276_s28, %s5272_s27  ;;  %p85_p6 = scmp.eq.s32.totalorder %s4200_s13, 0 }
  0x12   : > { %p236_p7 = scmp.eq.s32.totalorder %s4200_s13, 3  ;;  %s8007_s16 = smov (%p38_p4, %s8005_s16), 0 }
  0x13   : > { %7776 = sst [smem:[#allocation11_spill]] %s8007_s16  ;;  %p5412_p8 = por %p85_p6, %p84_p5 }
  0x14   : > { %p5416_p9 = por %p236_p7, %p78_p1  ;;  %s66_s22 = ssub.s32 %s5296_s11, %s8007_s16 }
  0x15   : > { %p242_p10 = scmp.eq.s32.totalorder %s4201_s14, 3  ;;  %s68_s23 = sor.u32 %s67_s18, %s66_s22 }
  0x16   : > { %s7778_s21 = scalar_select %p5416_p9, 1, 0 }
  0x17   : > { %p69_p11 = scmp.eq.s32.totalorder %s68_s23, 0  ;;  %p5422_p12 = por %p242_p10, %p84_p5 }
  0x18   : > { %7779 = sst [smem:[#allocation12_spill]] %s7778_s21  ;;  %p5095_p13 = scmp.lt.s32.totalorder %s5300_s12, 4 }
  0x19   : > { %s7780_s24 = scalar_select %p5422_p12, 1, 0 }
  0x1a   : > { %s288_s25 = sand.u32 1, %s5280_s29   ;;  %s4807_s15 = sshll.u32 %s5292_s10, 4 }
  0x1b   : > { %7781 = sst [smem:[#allocation13_spill]] %s7780_s24  ;;  %s4204_s13 = sshll.u32 %s288_s25, 7 }
  0x1c   : > { %s5429_s26 = scalar_select %p69_p11, %s5280_s29, %s71_s17  }
  0x1d   : > { %s4207_s27 = sshll.u32 %s5296_s11, 5  ;;  %s292_s8 = scalar_lea.vmem [#allocation2], %s4204_s13 }
  0x1e   : > { %7782 = sst [smem:[#allocation14_spill]] %s5429_s26  ;;  %s303_s21 = sshll.u32 %s292_s8, 4  ;;  %s304_s21 = int_to_ptr.vmem [resolvable:$true] %s303_s21 }
  0x1f   : > { %s298_s16 = sadd.s32 %s4807_s15, %s4207_s27  ;;  %p5088_p0 = pnand %p5095_p13, %p5404_p3 }
  0x20   : > { %s4208_s14 = sshll.u32 %s298_s16, 3  ;;  %s289_s17 = scalar_lea.sflag [#allocation3], %s288_s25 }
  0x21   : > { %s300_s23 = scalar_lea.hbm %s7716_s1, %s4208_s14  ;;  %s5302_s26 = smov 128  }
  0x22   : > { %s301_s24 = sshll.u32 %s300_s23, 4  ;;  %s5303_s29 = smov 8   ;;  %s302_s24 = int_to_ptr.hbm [resolvable:$true] %s301_s24 }
  0x23   : > { %5090 = dma.hbm_to_vmem [thread:$0]  (!%p5088_p0), %s302_s24, 2048, %s304_s21, %s289_s17, %s5302_s26, %s5302_s26, %s5303_s29  }
  0x24   : > { %p4209_p1 = scmp.ge.s32.totalorder %s5300_s12, 1  ;;  %p311_p2 = scmp.lt.s32.totalorder %s5300_s12, 5 }
  0x26   : > { %p312_p4 = pnand %p4209_p1, %p311_p2 }
  0x28   : > { %315 = sbr.rel (%p312_p4) target bundleno = 1303 (0x517), region = 52 }
  0x2d   : > { %s5441_s8 = sand.u32 1, %s5276_s28  }
  0x2e   : > { %s4210_s27 = sshll.u32 %s5441_s8, 7  ;;  %s318_s15 = scalar_lea.sflag [#allocation3], %s5441_s8 }
  0x2f   : > { %s5445_s16 = scalar_lea.vmem [#allocation2], %s4210_s27 }
  0x30   : > { %5263 = dma.done.wait (%p5412_p8), %s318_s15, 2048  }
  0x31   : > { %5265 = vsyncadd (%p5412_p8), %s318_s15, 4294965248  ;;  %p360_p3 = scmp.lt.s32.totalorder %s5288_s9, 1  ;;  %v4818_v0 = vld [vmem:[%s7717_s2 + $0x38] sm:$0xff]  ;;  %v4817_v3 = vld [vmem:[%s7717_s2 + $0x30] sm:$0xff]  ;;  %s4809_s24 = sshll.u32 %s5284_s30, 7  ;;  %vm670_vm1 = vcmask 1046528  }
  0x32   : > { %v4826_v1 = vld [vmem:[%s7717_s2 + $0x78] sm:$0xff]  ;;  %1592 = vmatpush.bf16.msra.mxu0 %v4818_v0  ;;  %v4825_v4 = vld [vmem:[%s7717_s2 + $0x70] sm:$0xff]  ;;  %v4816_v6 = vld [vmem:[%s7717_s2 + $0x28] sm:$0xff]  ;;  %vm519_vm0 = vsmask.f32 7424  ;;  %s4211_s25 = sshll.u32 %s5441_s8, 6 }
  0x33   : > { %s361_s29 = scalar_select %p360_p3, %s5288_s9, 1  ;;  %v5462_v2 = vld [vmem:[%s7717_s2 + $0xb8] sm:$0xff]  ;;  %1676 = vmatpush.bf16.msra.mxu1 %v4826_v1  ;;  %5058 = vmatpush.bf16.msra.mxu3 %v4826_v1  ;;  %v5474_v5 = vld [vmem:[%s7717_s2 + $0xb0] sm:$0xff]  ;;  %v4824_v7 = vld [vmem:[%s7717_s2 + $0x68] sm:$0xff] }
  0x34   : > { %1760 = vmatpush.bf16.msra.mxu2 %v5462_v2  ;;  %v5492_v8 = vld [vmem:[%s7717_s2 + $0xa8] sm:$0xff]  ;;  %v4815_v9 = vld [vmem:[%s7717_s2 + $0x20] sm:$0xff]  ;;  %v4814_v29 = vld [vmem:[%s7717_s2 + $0x18] sm:$0xff]  ;;  %s7605_s26 = scalar_lea.vmem [#allocation5], %s4211_s25  ;;  %s4803_s13 = sshll.u32 %s5288_s9, 5 }
  0x35   : > { %s5082_s19 = smul.u32 320, %s361_s29  ;;  %v4823_v10 = vld [vmem:[%s7717_s2 + $0x60] sm:$0xff]  ;;  %v4822_v30 = vld [vmem:[%s7717_s2 + $0x58] sm:$0xff]  ;;  %v4813_v38 = vld [vmem:[%s7717_s2 + $0x10] sm:$0xff]  ;;  %s7988_s18 = sld [smem:[#allocation69_spill]] }
  0x36   : > { %1593 = vmatpush.bf16.msra.mxu0 %v4817_v3  ;;  %v5517_v20 = vld [vmem:[%s7717_s2 + $0xa0] sm:$0xff]  ;;  %v5543_v32 = vld [vmem:[%s7717_s2 + $0x98] sm:$0xff]  ;;  %v4821_v39 = vld [vmem:[%s7717_s2 + $0x50] sm:$0xff]  ;;  %s4093_s17 = sshll.u32 %s7605_s26, 4  ;;  %s4078_s15 = scalar_lea.sflag [#allocation4], %s5441_s8  ;;  %s4094_s17 = int_to_ptr.vmem [resolvable:$true] %s4093_s17 }
  0x37   : > { %s364_s21 = scalar_lea.vmem %s7715_s0, %s5082_s19  ;;  %1677 = vmatpush.bf16.msra.mxu1 %v4825_v4  ;;  %5059 = vmatpush.bf16.msra.mxu3 %v4825_v4  ;;  %v5565_v42 = vld [vmem:[%s7717_s2 + $0x90] sm:$0xff]  ;;  %v4812_v50 = vld [vmem:[%s7717_s2 + $0x8] sm:$0xff]  ;;  %v4811_v60 = vld [vmem:[%s7717_s2] sm:$0xff] }
  0x38   : > { %s5486_s20 = scalar_lea.vmem %s364_s21, %s4809_s24  ;;  %1761 = vmatpush.bf16.msra.mxu2 %v5474_v5  ;;  %v4820_v51 = vld [vmem:[%s7717_s2 + $0x48] sm:$0xff]  ;;  %v4819_v61 = vld [vmem:[%s7717_s2 + $0x40] sm:$0xff] }
  0x39   : > { %v5501_v11 = vld [vmem:[%s5486_s20 + $0x8] sm:$0xf]  ;;  %v406_v13 = vld [vmem:[%s5486_s20 + $0x8c] sm:$0x1]  ;;  %v5506_v14 = vld [vmem:[%s5486_s20 + $0x90] sm:$0xff]  }
  0x3a   : > { %v405_v12 = vld [vmem:[%s5486_s20 + $0x88] sm:$0xf]  ;;  %1594 = vmatpush.bf16.msra.mxu0 %v4816_v6  ;;  %v374_v15 = vld [vmem:[%s5486_s20 + $0xc] sm:$0x1]  ;;  %v409_v16 = vld [vmem:[%s5486_s20 + $0x98] sm:$0xf]  ;;  %v497_v19 = vunpack.c.l.b16 %v406_v13  ;;  %v451_v26 = vunpack.c.l.b16 %v5501_v11 }
  0x3b   : > { %1678 = vmatpush.bf16.msra.mxu1 %v4824_v7  ;;  %v410_v17 = vld [vmem:[%s5486_s20 + $0x9c] sm:$0x1]  ;;  %v5511_v18 = vunpack.c.l.b16 %v405_v12  ;;  %5060 = vmatpush.bf16.msra.mxu3 %v4824_v7  ;;  %v5519_v21 = vunpack.c.l.b16 %v409_v16  ;;  %v658_v24 = vshll.u32 %v5506_v14, 16  ;;  %v5526_v25 = vld [vmem:[%s5486_s20] sm:$0xff]  ;;  %v489_v27 = vunpack.c.l.b16 %v374_v15  ;;  %v377_v45 = vld [vmem:[%s5486_s20 + $0x18] sm:$0xf] }
  0x3c   : > { %1762 = vmatpush.bf16.msra.mxu2 %v5492_v8  ;;  %v498_v22 = vunpack.c.l.b16 %v410_v17  ;;  %v656_v33 = vshrl.u32 %v5506_v14, 16  ;;  %v523_v37 = vshll.u32 %v5526_v25, 16  ;;  %v378_v46 = vld [vmem:[%s5486_s20 + $0x1c] sm:$0x1]  ;;  %v521_v47 = vshrl.u32 %v5526_v25, 16  ;;  %v5588_v55 = vld [vmem:[%s7717_s2 + $0x88] sm:$0xff] }
  0x3d   : > { %v5522_v23 = vpack.c.b16 %v497_v19, %v5511_v18  ;;  %v660_v34 = vrot.slane %v658_v24, 1  ;;  %v5549_v36 = vpack.c.b16 %v489_v27, %v451_v26  ;;  %v5582_v53 = vunpack.c.l.b16 %v377_v45  ;;  %v5595_v57 = vld [vmem:[%s5486_s20 + $0x10] sm:$0xff]   ;;  %v5613_v3 = vld [vmem:[%s7717_s2 + $0x80] sm:$0xff]  ;;  %v4850_v7 = vld [vmem:[%s7717_s2 + $0x138] sm:$0xff]  ;;  %s5222_s25 = scalar_lea.hbm %s7988_s18, 256 }
  0x3e   : > { %v5530_v28 = vpack.c.b16 %v498_v22, %v5519_v21  ;;  %1595 = vmatpush.bf16.msra.mxu0 %v4815_v9  ;;  %v525_v48 = vrot.slane %v523_v37, 1  ;;  %v490_v54 = vunpack.c.l.b16 %v378_v46  ;;  %v538_v1 = vshll.u32 %v5595_v57, 16  ;;  %v4849_v17 = vld [vmem:[%s7717_s2 + $0x130] sm:$0xff] }
  0x3f   : > { %1679 = vmatpush.bf16.msra.mxu1 %v4823_v10  ;;  %v648_v31 = vshll.u32 %v5522_v23, 16  ;;  %5061 = vmatpush.bf16.msra.mxu3 %v4823_v10  ;;  %v652_v41 = vshrl.u32 %v5522_v23, 16  ;;  %v661_v43 = vor.u32 %v660_v34, %v656_v33  ;;  %v528_v49 = vshll.u32 %v5549_v36, 16 }
  0x40   : > { %1763 = vmatpush.bf16.msra.mxu2 %v5517_v20  ;;  %v663_v35 = vshll.u32 %v5530_v28, 16  ;;  %v526_v58 = vor.u32 %v525_v48, %v521_v47  ;;  %v5606_v0 = vpack.c.b16 %v490_v54, %v5582_v53  ;;  %v671_v4 = vrot.slane %v5526_v25, 1  ;;  %v4848_v47 = vld [vmem:[%s7717_s2 + $0x128] sm:$0xff] }
  0x41   : > { %v5558_v40 = vrot.slane %v648_v31, 1  ;;  %v530_v59 = vrot.slane %v528_v49, 1  ;;  %v672_v6 = vrot.slane %v5549_v36, 1  ;;  %v536_v12 = vshrl.u32 %v5595_v57, 16  ;;  %v4842_v49 = vld [vmem:[%s7717_s2 + $0xf8] sm:$0xff] }
  0x42   : > { %1596 = vmatpush.bf16.msra.mxu0 %v4814_v29  ;;  %v5567_v44 = vrot.slane %v663_v35, 1  ;;  %v540_v13 = vrot.slane %v538_v1, 1  ;;  %v543_v15 = vshll.u32 %v5606_v0, 16  ;;  %v532_v19 = vshrl.u32 %v5549_v36, 16 }
  0x43   : > { %1680 = vmatpush.bf16.msra.mxu1 %v4822_v30  ;;  %5062 = vmatpush.bf16.msra.mxu3 %v4822_v30  ;;  %v5580_v52 = vor.u32 %v652_v41, %v5558_v40  ;;  %v531_v9 = vsel %vm519_vm0, %v526_v58, %v530_v59  ;;  %v673_v16 = vsel %vm670_vm1, %v671_v4, %v672_v6  ;;  %v667_v27 = vshrl.u32 %v5530_v28, 16  ;;  %v381_v58 = vld [vmem:[%s5486_s20 + $0x28] sm:$0xf] }
  0x44   : > { %1764 = vmatpush.bf16.msra.mxu2 %v5543_v32  ;;  %v5592_v56 = vsel %vm519_vm0, %v661_v43, %v5567_v44  ;;  %v541_v22 = vor.u32 %v540_v13, %v536_v12  ;;  %v545_v24 = vrot.slane %v543_v15, 1  ;;  %v674_v29 = vrot.slane %v5595_v57, 1  ;;  %v4840_v12 = vld [vmem:[%s7717_s2 + $0xe8] sm:$0xff]  ;;  %v385_v13 = vld [vmem:[%s5486_s20 + $0x38] sm:$0xf] }
  0x45   : > { %7783 = vst [vmem:[#allocation15_spill] sm:$0xff] %v5580_v52  ;;  %v7733_v62 = vunpack.c.l.b16 %v5580_v52  ;;  %v811_v63 = vunpack.c.l.b16 %v5592_v56  ;;  %v534_v30 = vor.u32 %v532_v19, %v530_v59  ;;  %v5644_v31 = vor.u32 %v667_v27, %v5567_v44  ;;  %v382_v59 = vld [vmem:[%s5486_s20 + $0x2c] sm:$0x1]  ;;  %v386_v15 = vld [vmem:[%s5486_s20 + $0x3c] sm:$0x1]  ;;  %v4839_v27 = vld [vmem:[%s7717_s2 + $0xe0] sm:$0xff] }
  0x46   : > { %1597 = vmatpush.bf16.msra.mxu0 %v4813_v38  ;;  %7784 = vst [vmem:[#allocation16_spill] sm:$0xff] %v5592_v56  ;;  %v4958_v34 = vunpack.c.l.b16 %v5595_v57  ;;  %v547_v45 = vshrl.u32 %v5606_v0, 16  ;;  %v699_v11 = vrot.slane %v5530_v28, 1  ;;  %v7738_v46 = vrot.slane %v5522_v23, 1 }
  0x47   : > { %1681 = vmatpush.bf16.msra.mxu1 %v4821_v39  ;;  %5063 = vmatpush.bf16.msra.mxu3 %v4821_v39  ;;  %v5623_v10 = vpack.c.b16 %v811_v63, %v7733_v62  ;;  %7786 = vst [vmem:[#allocation18_spill] sm:$0xff] %v5644_v31  ;;  %v769_v36 = vunpack.c.l.b16 %v534_v30  ;;  %v7732_v37 = vunpack.c.l.b16 %v5644_v31  ;;  %v770_v39 = vunpack.c.l.b16 %v672_v6  ;;  %v5708_v6 = vld [vmem:[%s5486_s20 + $0x20] sm:$0xff]   ;;  %v5923_v31 = vld [vmem:[%s5486_s20 + $0x70] sm:$0xff]  }
  0x48   : > { %1765 = vmatpush.bf16.msra.mxu2 %v5565_v42  ;;  %v979_v41 = vpack.c.b16 %v4958_v34, %v451_v26  ;;  %v5668_v26 = vor.u32 %v547_v45, %v545_v24  ;;  %v4959_v48 = vunpack.c.h.b16 %v5595_v57  ;;  %v5689_v54 = vunpack.c.l.b16 %v7738_v46 }
  0x49   : > { %7785 = vst [vmem:[#allocation17_spill] sm:$0xff] %v5623_v10  ;;  %v5702_v1 = vunpack.c.l.b16 %v381_v58  ;;  %v491_v4 = vunpack.c.l.b16 %v382_v59  ;;  %v5728_v30 = vunpack.c.l.b16 %v699_v11  ;;  %v4836_v58 = vld [vmem:[%s7717_s2 + $0xc8] sm:$0xff] }
  0x4a   : > { %1598 = vmatpush.bf16.msra.mxu0 %v4812_v50  ;;  %7789 = vst [vmem:[#allocation21_spill] sm:$0xff] %v5689_v54 }
  0x4b   : > { %1682 = vmatpush.bf16.msra.mxu1 %v4820_v51  ;;  %5064 = vmatpush.bf16.msra.mxu3 %v4820_v51  ;;  %7791 = vst [vmem:[#allocation23_spill] sm:$0xff] %v5728_v30 }
  0x4c   : > { %1766 = vmatpush.bf16.msra.mxu2 %v5588_v55 }
  0x4e   : > { %1599 = vmatpush.bf16.msra.mxu0 %v4811_v60  ;;  %v988_v60 = vpack.c.b16 %v5582_v53, %v4959_v48  ;;  %v4837_v48 = vld [vmem:[%s7717_s2 + $0xd0] sm:$0xff] }
  0x4f   : > { %1683 = vmatpush.bf16.msra.mxu1 %v4819_v61  ;;  %5065 = vmatpush.bf16.msra.mxu3 %v4819_v61 }
  0x50   : > { %1767 = vmatpush.bf16.msra.mxu2 %v5613_v3 }
  0x51   : > { %1600 = vmatmul.bf16.vlgmr.msra.gmra.mxu0 %v5526_v25  ;;  %v5641_v25 = vsel %vm519_vm0, %v541_v22, %v545_v24  ;;  %v5719_v22 = vunpack.c.l.b16 %v385_v13  ;;  %v492_v24 = vunpack.c.l.b16 %v386_v15 }
  0x52   : > { %1928 = vmatpush.bf16.msrb.mxu0 %v4850_v7  ;;  %1684 = vmatmul.bf16.vlgmr.msra.gmra.mxu1 %v531_v9  ;;  %v759_v35 = vunpack.c.l.b16 %v5641_v25  ;;  %v765_v28 = vunpack.c.h.b16 %v5641_v25  ;;  %v504_v7 = vpack.c.b16 %v491_v4, %v5702_v1  ;;  %v553_v9 = vshll.u32 %v5708_v6, 16  ;;  %v4835_v4 = vld [vmem:[%s7717_s2 + $0xc0] sm:$0xff] }
  0x53   : > { %5066 = vmatpush.bf16.msrb.mxu3 %v5462_v2  ;;  %1768 = vmatmul.bf16.vlgmr.msra.gmra.mxu2 %v673_v16  ;;  %v675_v2 = vrot.slane %v5606_v0, 1  ;;  %v551_v16 = vshrl.u32 %v5708_v6, 16 }
  0x54   : > { %1749 = vmatmul.bf16.vlgmr.msra.gmra.mxu3 %v5623_v10  ;;  %v980_v43 = vpack.c.b16 %v759_v35, %v769_v36  ;;  %v558_v19 = vshll.u32 %v504_v7, 16  ;;  %v506_v36 = vpack.c.b16 %v492_v24, %v5719_v22 }
  0x55   : > { %v5647_v33 = vsel %vm670_vm1, %v674_v29, %v675_v2  ;;  %v5685_v51 = vunpack.c.l.b16 %v675_v2  ;;  %v5725_v29 = vld [vmem:[%s5486_s20 + $0x30] sm:$0xff]  }
  0x56   : > { %1929 = vmatpush.bf16.msrb.mxu0 %v4849_v17  ;;  %v760_v38 = vunpack.c.l.b16 %v5647_v33  ;;  %v766_v50 = vunpack.c.h.b16 %v5647_v33  ;;  %v555_v17 = vrot.slane %v553_v9, 1  ;;  %v560_v35 = vrot.slane %v558_v19, 1 }
  0x57   : > { %5067 = vmatpush.bf16.msrb.mxu3 %v5474_v5  ;;  %v813_v5 = vunpack.c.h.b16 %v5592_v56  ;;  %v566_v45 = vshrl.u32 %v5725_v29, 16  ;;  %v680_v59 = vrot.slane %v5725_v29, 1  ;;  %v577_v24 = vshrl.u32 %v506_v36, 16 }
  0x58   : > { %v981_v44 = vpack.c.b16 %v760_v38, %v770_v39  ;;  %v990_v63 = vpack.c.b16 %v5685_v51, %v766_v50  ;;  %v556_v34 = vor.u32 %v555_v17, %v551_v16  ;;  %v677_v38 = vrot.slane %v5708_v6, 1 }
  0x59   : > { %v678_v39 = vrot.slane %v504_v7, 1 }
  0x5a   : > { %1930 = vmatpush.bf16.msrb.mxu0 %v4848_v47 }
  0x5b   : > { %5068 = vmatpush.bf16.msrb.mxu3 %v5492_v8  ;;  %v5660_v8 = vpack.c.b16 %v7732_v37, %v813_v5  ;;  %v568_v5 = vshll.u32 %v5725_v29, 16  ;;  %v5744_v47 = vsel %vm670_vm1, %v677_v38, %v678_v39  ;;  %v5774_v13 = vunpack.c.l.b16 %v678_v39 }
  0x5c   : > { %v4962_v39 = vunpack.c.l.b16 %v5708_v6 }
  0x5d   : > { %7787 = vst [vmem:[#allocation19_spill] sm:$0xff] %v5660_v8 }
  0x5f   : > { %5069 = vmatpush.bf16.msrb.mxu3 %v5517_v20  ;;  %v698_v20 = vrot.slane %v5506_v14, 1 }
  0x61   : > { %1605 = vmatmul.bf16.gmra.mxu0 %v979_v41  ;;  %v4838_v41 = vld [vmem:[%s7717_s2 + $0xd8] sm:$0xff] }
  0x62   : > { %1689 = vmatmul.bf16.gmra.mxu1 %v980_v43 }
  0x63   : > { %5070 = vmatpush.bf16.msrb.mxu3 %v5543_v32  ;;  %1773 = vmatmul.bf16.gmra.mxu2 %v981_v44  ;;  %v5672_v32 = vsel %vm670_vm1, %v698_v20, %v699_v11  ;;  %v5740_v44 = vsel %vm519_vm0, %v556_v34, %v560_v35  ;;  %v570_v20 = vrot.slane %v568_v5, 1  ;;  %v573_v11 = vshll.u32 %v506_v36, 16 }
  0x64   : > { %1754 = vmatmul.bf16.gmra.mxu3 %v5660_v8  ;;  %7788 = vst [vmem:[#allocation20_spill] sm:$0xff] %v5672_v32  ;;  %v814_v2 = vunpack.c.h.b16 %v5672_v32 }
  0x65   : > { %v575_v50 = vrot.slane %v573_v11, 1  ;;  %v982_v11 = vpack.c.b16 %v4962_v39, %v5582_v53  ;;  %v4846_v53 = vld [vmem:[%s7717_s2 + $0x118] sm:$0xff] }
  0x66   : > { %v5737_v43 = vpack.c.b16 %v5728_v30, %v814_v2  ;;  %v4967_v2 = vunpack.c.h.b16 %v5725_v29 }
  0x67   : > { %5071 = vmatpush.bf16.msrb.mxu3 %v5565_v42  ;;  %v7737_v42 = vunpack.c.l.b16 %v5668_v26 }
  0x68   : > { %7792 = vst [vmem:[#allocation24_spill] sm:$0xff] %v5737_v43 }
  0x69   : > { %v989_v61 = vpack.c.b16 %v7737_v42, %v765_v28  ;;  %v562_v28 = vshrl.u32 %v504_v7, 16  ;;  %v4966_v7 = vunpack.c.l.b16 %v5725_v29 }
  0x6b   : > { %5072 = vmatpush.bf16.msrb.mxu3 %v5588_v55  ;;  %v812_v55 = vunpack.c.l.b16 %v5672_v32  ;;  %v5778_v16 = vpack.c.b16 %v4966_v7, %v5702_v1 }
  0x6d   : > { %v5700_v0 = vpack.c.b16 %v812_v55, %v5689_v54  ;;  %v4847_v55 = vld [vmem:[%s7717_s2 + $0x120] sm:$0xff] }
  0x6e   : > { %1931 = vmatpush.bf16.msrb.mxu0 %v4847_v55 }
  0x6f   : > { %5073 = vmatpush.bf16.msrb.mxu3 %v5613_v3  ;;  %7790 = vst [vmem:[#allocation22_spill] sm:$0xff] %v5700_v0  ;;  %v4841_v3 = vld [vmem:[%s7717_s2 + $0xf0] sm:$0xff] }
  0x71   : > { %1610 = vmatmul.bf16.gmra.mxu0 %v988_v60  ;;  %v681_v60 = vrot.slane %v506_v36, 1  ;;  %v389_v36 = vld [vmem:[%s5486_s20 + $0x48] sm:$0xf] }
  0x72   : > { %1694 = vmatmul.bf16.gmra.mxu1 %v989_v61  ;;  %v5760_v61 = vor.u32 %v562_v28, %v560_v35  ;;  %1932 = vmatpush.bf16.msrb.mxu0 %v4846_v53 }
  0x73   : > { %1844 = vmatpush.bf16.msra.mxu3 %v4842_v49  ;;  %1778 = vmatmul.bf16.gmra.mxu2 %v990_v63  ;;  %v571_v49 = vor.u32 %v570_v20, %v566_v45  ;;  %v5797_v38 = vunpack.c.l.b16 %v681_v60 }
  0x74   : > { %1833 = vmatmul.bf16.vlgmr.msrb.gmra.mxu3 %v5700_v0  ;;  %v7736_v9 = vunpack.c.l.b16 %v5760_v61  ;;  %v5906_v0 = vld [vmem:[%s5486_s20 + $0x60] sm:$0xff]  }
  0x75   : > { %v5763_v63 = vsel %vm519_vm0, %v571_v49, %v575_v50  ;;  %v5816_v49 = vld [vmem:[%s5486_s20 + $0x40] sm:$0xff]  }
  0x76   : > { %v777_v34 = vunpack.c.h.b16 %v5763_v63  ;;  %v583_v55 = vshll.u32 %v5816_v49, 16  ;;  %v4971_v56 = vunpack.c.h.b16 %v5816_v49 }
  0x77   : > { %1845 = vmatpush.bf16.msra.mxu3 %v4841_v3  ;;  %v5769_v3 = vsel %vm670_vm1, %v680_v59, %v681_v60  ;;  %v394_v59 = vld [vmem:[%s5486_s20 + $0x5c] sm:$0x1]  ;;  %v581_v60 = vshrl.u32 %v5816_v49, 16 }
  0x78   : > { %v776_v15 = vunpack.c.l.b16 %v5769_v3  ;;  %v778_v5 = vunpack.c.h.b16 %v5769_v3 }
  0x7a   : > { %v5785_v19 = vpack.c.b16 %v776_v15, %v5774_v13  ;;  %v5810_v20 = vpack.c.b16 %v5797_v38, %v778_v5  ;;  %v494_v15 = vunpack.c.l.b16 %v394_v59 }
  0x7b   : > { %1846 = vmatpush.bf16.msra.mxu3 %v4840_v12  ;;  %v775_v12 = vunpack.c.l.b16 %v5763_v63 }
  0x7c   : > { %7793 = vst [vmem:[#allocation25_spill] sm:$0xff] %v5785_v19 }
  0x7d   : > { %v5782_v17 = vpack.c.b16 %v775_v12, %v7736_v9  ;;  %7794 = vst [vmem:[#allocation26_spill] sm:$0xff] %v5810_v20 }
  0x7f   : > { %1847 = vmatpush.bf16.msra.mxu3 %v4839_v27  ;;  %v5791_v27 = vor.u32 %v577_v24, %v575_v50  ;;  %v5832_v24 = vld [vmem:[%s5486_s20 + $0x50] sm:$0xff]  }
  0x80   : > { %v596_v53 = vshrl.u32 %v5832_v24, 16 }
  0x81   : > { %1615 = vmatmul.bf16.gmra.mxu0 %v5708_v6  ;;  %v7735_v35 = vunpack.c.l.b16 %v5791_v27 }
  0x82   : > { %1699 = vmatmul.bf16.gmra.mxu1 %v5740_v44 }
  0x83   : > { %1848 = vmatpush.bf16.msra.mxu3 %v4838_v41  ;;  %1783 = vmatmul.bf16.gmra.mxu2 %v5744_v47  ;;  %v390_v41 = vld [vmem:[%s5486_s20 + $0x4c] sm:$0x1]  ;;  %v5807_v45 = vpack.c.b16 %v7735_v35, %v777_v34 }
  0x84   : > { %1838 = vmatmul.bf16.gmra.mxu3 %v5737_v43  ;;  %v493_v28 = vunpack.c.l.b16 %v390_v41  ;;  %v683_v41 = vrot.slane %v5816_v49, 1 }
  0x87   : > { %1849 = vmatpush.bf16.msra.mxu3 %v4837_v48  ;;  %v5813_v48 = vunpack.c.l.b16 %v389_v36  ;;  %v598_v36 = vshll.u32 %v5832_v24, 16 }
  0x89   : > { %v508_v50 = vpack.c.b16 %v493_v28, %v5813_v48 }
  0x8b   : > { %1850 = vmatpush.bf16.msra.mxu3 %v4836_v58  ;;  %v393_v58 = vld [vmem:[%s5486_s20 + $0x58] sm:$0xf]  ;;  %v588_v7 = vshll.u32 %v508_v50, 16 }
  0x8c   : > { %v5829_v12 = vunpack.c.l.b16 %v393_v58  ;;  %v600_v58 = vrot.slane %v598_v36, 1 }
  0x8d   : > { %v590_v5 = vrot.slane %v588_v7, 1  ;;  %v686_v7 = vrot.slane %v5832_v24, 1 }
  0x8e   : > { %v510_v39 = vpack.c.b16 %v494_v15, %v5829_v12 }
  0x8f   : > { %1851 = vmatpush.bf16.msra.mxu3 %v4835_v4  ;;  %v585_v4 = vrot.slane %v583_v55, 1 }
  0x90   : > { %v603_v59 = vshll.u32 %v510_v39, 16  ;;  %v687_v15 = vrot.slane %v510_v39, 1 }
  0x91   : > { %1620 = vmatmul.bf16.gmra.mxu0 %v5778_v16  ;;  %v586_v34 = vor.u32 %v585_v4, %v581_v60  ;;  %v592_v60 = vshrl.u32 %v508_v50, 16  ;;  %v601_v4 = vor.u32 %v600_v58, %v596_v53 }
  0x92   : > { %1704 = vmatmul.bf16.gmra.mxu1 %v5782_v17  ;;  %v5856_v36 = vsel %vm670_vm1, %v686_v7, %v687_v15 }
  0x93   : > { %1788 = vmatmul.bf16.gmra.mxu2 %v5785_v19  ;;  %v5840_v55 = vsel %vm519_vm0, %v586_v34, %v590_v5  ;;  %v788_v53 = vunpack.c.l.b16 %v5856_v36 }
  0x94   : > { %1852 = vmatmul.bf16.vlgmr.msra.gmra.mxu3 %v5595_v57  ;;  %v5803_v57 = vpack.c.b16 %v5719_v22, %v4967_v2  ;;  %v4963_v2 = vunpack.c.h.b16 %v5708_v6 }
  0x96   : > { %v991_v28 = vpack.c.b16 %v5702_v1, %v4963_v2  ;;  %v605_v1 = vrot.slane %v603_v59, 1  ;;  %v5850_v2 = vor.u32 %v592_v60, %v590_v5 }
  0x98   : > { %v5853_v34 = vsel %vm519_vm0, %v601_v4, %v605_v1  ;;  %v4975_v4 = vunpack.c.h.b16 %v5832_v24 }
  0x99   : > { %v787_v62 = vunpack.c.l.b16 %v5853_v34  ;;  %v789_v7 = vunpack.c.h.b16 %v5853_v34 }
  0xa1   : > { %1625 = vmatmul.bf16.gmra.mxu0 %v5803_v57 }
  0xa2   : > { %1709 = vmatmul.bf16.gmra.mxu1 %v5807_v45 }
  0xa3   : > { %1793 = vmatmul.bf16.gmra.mxu2 %v5810_v20 }
  0xa4   : > { %1857 = vmatmul.bf16.gmra.mxu3 %v982_v11  ;;  %v684_v11 = vrot.slane %v508_v50, 1  ;;  %v7734_v50 = vunpack.c.l.b16 %v5850_v2 }
  0xa6   : > { %v5844_v37 = vsel %vm670_vm1, %v683_v41, %v684_v11  ;;  %v4974_v41 = vunpack.c.l.b16 %v5832_v24  ;;  %v5869_v5 = vpack.c.b16 %v787_v62, %v7734_v50  ;;  %v4845_v62 = vld [vmem:[%s7717_s2 + $0x110] sm:$0xff]  ;;  %v5893_v50 = vpack.c.b16 %v5829_v12, %v4975_v4 }
  0xa7   : > { %1933 = vmatpush.bf16.msrb.mxu0 %v4845_v62 }
  0xa8   : > { %v5865_v58 = vpack.c.b16 %v4974_v41, %v5813_v48  ;;  %7795 = vst [vmem:[#allocation27_spill] sm:$0xff] %v5869_v5 }
  0xb1   : > { %1630 = vmatmul.bf16.gmra.mxu0 %v5816_v49 }
  0xb2   : > { %1714 = vmatmul.bf16.gmra.mxu1 %v5840_v55 }
  0xb3   : > { %1798 = vmatmul.bf16.gmra.mxu2 %v5844_v37 }
  0xb4   : > { %1862 = vmatmul.bf16.gmra.mxu3 %v991_v28  ;;  %v5861_v28 = vunpack.c.l.b16 %v684_v11  ;;  %v607_v11 = vshrl.u32 %v510_v39, 16  ;;  %v790_v39 = vunpack.c.h.b16 %v5856_v36 }
  0xb6   : > { %v5872_v59 = vpack.c.b16 %v788_v53, %v5861_v28  ;;  %v5878_v60 = vor.u32 %v607_v11, %v605_v1  ;;  %v5887_v53 = vunpack.c.l.b16 %v687_v15  ;;  %v397_v1 = vld [vmem:[%s5486_s20 + $0x68] sm:$0xf]  ;;  %v398_v11 = vld [vmem:[%s5486_s20 + $0x6c] sm:$0x1] }
  0xb7   : > { %v5899_v9 = vunpack.c.l.b16 %v397_v1  ;;  %v495_v62 = vunpack.c.l.b16 %v398_v11  ;;  %v613_v1 = vshll.u32 %v5906_v0, 16  ;;  %v401_v11 = vld [vmem:[%s5486_s20 + $0x78] sm:$0xf] }
  0xb8   : > { %7796 = vst [vmem:[#allocation28_spill] sm:$0xff] %v5872_v59  ;;  %v7741_v41 = vunpack.c.l.b16 %v5878_v60  ;;  %v5902_v15 = vpack.c.b16 %v5887_v53, %v790_v39  ;;  %v402_v39 = vld [vmem:[%s5486_s20 + $0x7c] sm:$0x1] }
  0xb9   : > { %7797 = vst [vmem:[#allocation29_spill] sm:$0xff] %v5878_v60  ;;  %v496_v8 = vunpack.c.l.b16 %v402_v39 }
  0xba   : > { %v5897_v35 = vpack.c.b16 %v7741_v41, %v789_v7  ;;  %7799 = vst [vmem:[#allocation31_spill] sm:$0xff] %v5902_v15  ;;  %v512_v7 = vpack.c.b16 %v495_v62, %v5899_v9  ;;  %v5920_v62 = vunpack.c.l.b16 %v401_v11 }
  0xbc   : > { %7798 = vst [vmem:[#allocation30_spill] sm:$0xff] %v5897_v35  ;;  %v5927_v30 = vpack.c.b16 %v496_v8, %v5920_v62  ;;  %v626_v8 = vshrl.u32 %v5923_v31, 16 }
  0xbe   : > { %v633_v32 = vshll.u32 %v5927_v30, 16 }
  0xc1   : > { %1635 = vmatmul.bf16.gmra.mxu0 %v5865_v58 }
  0xc2   : > { %1719 = vmatmul.bf16.gmra.mxu1 %v5869_v5 }
  0xc3   : > { %1803 = vmatmul.bf16.gmra.mxu2 %v5872_v59 }
  0xc4   : > { %1867 = vmatmul.bf16.gmra.mxu3 %v5725_v29  ;;  %v4970_v29 = vunpack.c.l.b16 %v5816_v49 }
  0xc6   : > { %v1001_v43 = vpack.c.b16 %v4970_v29, %v5719_v22  ;;  %v611_v29 = vshrl.u32 %v5906_v0, 16 }
  0xce   : > { %v1601_v42 = vpop.f32.mrf.mxu0 }
  0xcf   : > { %v1685_v46 = vpop.f32.mrf.mxu1 }
  0xd0   : > { %v1686_v4 = vadd.f32 %v1685_v46, %v1601_v42  ;;  %v615_v46 = vrot.slane %v613_v1, 1  ;;  %v618_v42 = vshll.u32 %v512_v7, 16  ;;  %v628_v1 = vshll.u32 %v5923_v31, 16 }
  0xd1   : > { %1640 = vmatmul.bf16.gmra.mxu0 %v5893_v50 }
  0xd2   : > { %1724 = vmatmul.bf16.gmra.mxu1 %v5897_v35 }
  0xd3   : > { %1808 = vmatmul.bf16.gmra.mxu2 %v5902_v15  ;;  %v620_v15 = vrot.slane %v618_v42, 1  ;;  %v630_v42 = vrot.slane %v628_v1, 1  ;;  %v693_v1 = vrot.slane %v5927_v30, 1 }
  0xd4   : > { %1872 = vmatmul.bf16.gmra.mxu3 %v1001_v43  ;;  %v616_v43 = vor.u32 %v615_v46, %v611_v29 }
  0xd6   : > { %v1769_v22 = vpop.f32.mrf.mxu2  ;;  %v1603_v20 = vpop.f32.mrf.mxu0  ;;  %v5934_v39 = vsel %vm519_vm0, %v616_v43, %v620_v15  ;;  %v622_v43 = vshrl.u32 %v512_v7, 16 }
  0xd7   : > { %v5915_v41 = vpop.f32.mrf.mxu3  ;;  %v5918_v59 = vadd.f32 %v1769_v22, %v1686_v4  ;;  %v1687_v19 = vpop.f32.mrf.mxu1  ;;  %v689_v4 = vrot.slane %v5906_v0, 1  ;;  %v690_v22 = vrot.slane %v512_v7, 1  ;;  %7802 = vst [vmem:[#allocation34_spill] sm:$0xff] %v5934_v39 }
  0xd8   : > { %7800 = vst [vmem:[#allocation32_spill] sm:$0xff] %v5915_v41  ;;  %v1688_v10 = vadd.f32 %v1687_v19, %v1603_v20  ;;  %v1007_v19 = vpack.c.b16 %v5813_v48, %v4971_v56  ;;  %v631_v56 = vor.u32 %v630_v42, %v626_v8  ;;  %v692_v48 = vrot.slane %v5923_v31, 1 }
  0xd9   : > { %v5942_v54 = vsel %vm670_vm1, %v689_v4, %v690_v22  ;;  %v4982_v42 = vunpack.c.l.b16 %v5923_v31 }
  0xda   : > { %v5962_v8 = vsel %vm670_vm1, %v692_v48, %v693_v1 }
  0xdb   : > { %7806 = vst [vmem:[#allocation38_spill] sm:$0xff] %v5962_v8  ;;  %v5973_v5 = vpack.c.b16 %v4982_v42, %v5899_v9 }
  0xde   : > { %v1771_v11 = vpop.f32.mrf.mxu2  ;;  %v1606_v29 = vpop.f32.mrf.mxu0 }
  0xdf   : > { %v5931_v52 = vpop.f32.mrf.mxu3  ;;  %v5937_v20 = vadd.f32 %v1771_v11, %v1688_v10  ;;  %v1690_v46 = vpop.f32.mrf.mxu1  ;;  %v635_v10 = vrot.slane %v633_v32, 1  ;;  %v4844_v32 = vld [vmem:[%s7717_s2 + $0x108] sm:$0xff] }
  0xe0   : > { %7801 = vst [vmem:[#allocation33_spill] sm:$0xff] %v5931_v52  ;;  %v1691_v41 = vadd.f32 %v1690_v46, %v1606_v29  ;;  %v5951_v46 = vor.u32 %v622_v43, %v620_v15  ;;  %1934 = vmatpush.bf16.msrb.mxu0 %v4844_v32  ;;  %v5967_v43 = vunpack.c.l.b16 %v690_v22 }
  0xe1   : > { %1645 = vmatmul.bf16.gmra.mxu0 %v5906_v0  ;;  %v5956_v7 = vsel %vm519_vm0, %v631_v56, %v635_v10  ;;  %v800_v56 = vunpack.c.l.b16 %v5962_v8 }
  0xe2   : > { %1729 = vmatmul.bf16.gmra.mxu1 %v5934_v39  ;;  %7804 = vst [vmem:[#allocation36_spill] sm:$0xff] %v5951_v46  ;;  %v7757_v15 = vunpack.c.l.b16 %v5951_v46  ;;  %v6018_v39 = vld [vmem:[%s5486_s20 + $0x80] sm:$0xff]  }
  0xe3   : > { %1813 = vmatmul.bf16.gmra.mxu2 %v5942_v54  ;;  %7805 = vst [vmem:[#allocation37_spill] sm:$0xff] %v5956_v7  ;;  %v5982_v60 = vpack.c.b16 %v800_v56, %v5967_v43 }
  0xe4   : > { %1877 = vmatmul.bf16.gmra.mxu3 %v1007_v19 }
  0xe5   : > { %7809 = vst [vmem:[#allocation41_spill] sm:$0xff] %v5982_v60 }
  0xe6   : > { %v1774_v29 = vpop.f32.mrf.mxu2  ;;  %v1608_v52 = vpop.f32.mrf.mxu0 }
  0xe7   : > { %v5949_v11 = vpop.f32.mrf.mxu3  ;;  %v5953_v4 = vadd.f32 %v1774_v29, %v1691_v41  ;;  %v1692_v35 = vpop.f32.mrf.mxu1  ;;  %v799_v41 = vunpack.c.l.b16 %v5956_v7 }
  0xe8   : > { %7803 = vst [vmem:[#allocation35_spill] sm:$0xff] %v5949_v11  ;;  %v1693_v19 = vadd.f32 %v1692_v35, %v1608_v52 }
  0xe9   : > { %v5977_v52 = vpack.c.b16 %v799_v41, %v7757_v15 }
  0xeb   : > { %7808 = vst [vmem:[#allocation40_spill] sm:$0xff] %v5977_v52 }
  0xee   : > { %v1776_v11 = vpop.f32.mrf.mxu2  ;;  %v1611_v48 = vpop.f32.mrf.mxu0 }
  0xef   : > { %v5970_v29 = vpop.f32.mrf.mxu3  ;;  %v5979_v35 = vadd.f32 %v1776_v11, %v1693_v19  ;;  %v1695_v32 = vpop.f32.mrf.mxu1 }
  0xf0   : > { %7807 = vst [vmem:[#allocation39_spill] sm:$0xff] %v5970_v29  ;;  %v1696_v22 = vadd.f32 %v1695_v32, %v1611_v48  ;;  %v637_v29 = vshrl.u32 %v5927_v30, 16  ;;  %v4983_v32 = vunpack.c.h.b16 %v5923_v31 }
  0xf1   : > { %1650 = vmatmul.bf16.gmra.mxu0 %v5973_v5 }
  0xf2   : > { %1734 = vmatmul.bf16.gmra.mxu1 %v5977_v52  ;;  %v5991_v11 = vor.u32 %v637_v29, %v635_v10  ;;  %v801_v52 = vunpack.c.h.b16 %v5956_v7 }
  0xf3   : > { %1818 = vmatmul.bf16.gmra.mxu2 %v5982_v60  ;;  %v802_v60 = vunpack.c.h.b16 %v5962_v8 }
  0xf4   : > { %1882 = vmatmul.bf16.gmra.mxu3 %v5832_v24  ;;  %7811 = vst [vmem:[#allocation43_spill] sm:$0xff] %v5991_v11  ;;  %v7765_v30 = vunpack.c.l.b16 %v5991_v11  ;;  %v5999_v24 = vunpack.c.l.b16 %v693_v1  ;;  %v7818_v11 = vrot.slane %v5522_v23, 1  ;;  %v4854_v23 = vld [vmem:[%s7717_s2 + $0x158] sm:$0xff] }
  0xf6   : > { %v1779_v42 = vpop.f32.mrf.mxu2  ;;  %v1613_v56 = vpop.f32.mrf.mxu0  ;;  %7812 = vst [vmem:[#allocation44_spill] sm:$0xff] %v5999_v24  ;;  %v6014_v46 = vpack.c.b16 %v5999_v24, %v802_v60  ;;  %v4858_v60 = vld [vmem:[%s7717_s2 + $0x178] sm:$0xff] }
  0xf7   : > { %v5989_v41 = vpop.f32.mrf.mxu3  ;;  %v5993_v19 = vadd.f32 %v1779_v42, %v1696_v22  ;;  %v1697_v15 = vpop.f32.mrf.mxu1  ;;  %v6005_v22 = vpack.c.b16 %v5920_v62, %v4983_v32  ;;  %v4866_v32 = vld [vmem:[%s7717_s2 + $0x1b8] sm:$0xff]  ;;  %2012 = vmatpush.bf16.msrb.mxu1 %v4858_v60  ;;  %v695_v60 = vrot.slane %v6018_v39, 1 }
  0xf8   : > { %7810 = vst [vmem:[#allocation42_spill] sm:$0xff] %v5989_v41  ;;  %v1698_v48 = vadd.f32 %v1697_v15, %v1613_v56  ;;  %v4978_v41 = vunpack.c.l.b16 %v5906_v0  ;;  %v6009_v15 = vpack.c.b16 %v7765_v30, %v801_v52  ;;  %v643_v52 = vshll.u32 %v6018_v39, 16  ;;  %2096 = vmatpush.bf16.msrb.mxu2 %v4866_v32 }
  0xf9   : > { %7815 = vst [vmem:[#allocation47_spill] sm:$0xff] %v6014_v46  ;;  %v641_v30 = vshrl.u32 %v6018_v39, 16  ;;  %v6067_v24 = vsel %vm670_vm1, %v695_v60, %v7818_v11 }
  0xfa   : > { %7814 = vst [vmem:[#allocation46_spill] sm:$0xff] %v6009_v15  ;;  %v1017_v1 = vpack.c.b16 %v4978_v41, %v5829_v12  ;;  %v4843_v12 = vld [vmem:[%s7717_s2 + $0x100] sm:$0xff]  ;;  %v645_v32 = vrot.slane %v643_v52, 1  ;;  %v4856_v52 = vld [vmem:[%s7717_s2 + $0x168] sm:$0xff] }
  0xfb   : > { %1935 = vmatpush.bf16.msrb.mxu0 %v4843_v12  ;;  %v4864_v12 = vld [vmem:[%s7717_s2 + $0x1a8] sm:$0xff] }
  0xfe   : > { %v1781_v10 = vpop.f32.mrf.mxu2  ;;  %v1616_v56 = vpop.f32.mrf.mxu0 }
  0xff   : > { %v6002_v29 = vpop.f32.mrf.mxu3  ;;  %v6011_v42 = vadd.f32 %v1781_v10, %v1698_v48  ;;  %v1700_v7 = vpop.f32.mrf.mxu1 }
 0x100   : > { %7813 = vst [vmem:[#allocation45_spill] sm:$0xff] %v6002_v29  ;;  %v1701_v8 = vadd.f32 %v1700_v7, %v1616_v56  ;;  %v4865_v7 = vld [vmem:[%s7717_s2 + $0x1b0] sm:$0xff] }
 0x101   : > { %1655 = vmatmul.bf16.gmra.mxu0 %v6005_v22  ;;  %2097 = vmatpush.bf16.msrb.mxu2 %v4865_v7  ;;  %v4863_v7 = vld [vmem:[%s7717_s2 + $0x1a0] sm:$0xff] }
 0x102   : > { %1739 = vmatmul.bf16.gmra.mxu1 %v6009_v15  ;;  %v4857_v15 = vld [vmem:[%s7717_s2 + $0x170] sm:$0xff] }
 0x103   : > { %1823 = vmatmul.bf16.gmra.mxu2 %v6014_v46  ;;  %2013 = vmatpush.bf16.msrb.mxu1 %v4857_v15 }
 0x104   : > { %1887 = vmatmul.bf16.gmra.mxu3 %v1017_v1 }
 0x105   : > { %2098 = vmatpush.bf16.msrb.mxu2 %v4864_v12 }
 0x106   : > { %v1784_v41 = vpop.f32.mrf.mxu2  ;;  %v1618_v56 = vpop.f32.mrf.mxu0 }
 0x107   : > { %v6036_v48 = vpop.f32.mrf.mxu3  ;;  %v6038_v10 = vadd.f32 %v1784_v41, %v1701_v8  ;;  %v1702_v1 = vpop.f32.mrf.mxu1  ;;  %v4979_v8 = vunpack.c.h.b16 %v5906_v0  ;;  %2014 = vmatpush.bf16.msrb.mxu1 %v4856_v52  ;;  %v4862_v52 = vld [vmem:[%s7717_s2 + $0x198] sm:$0xff] }
 0x108   : > { %7816 = vst [vmem:[#allocation48_spill] sm:$0xff] %v6036_v48  ;;  %v1703_v46 = vadd.f32 %v1702_v1, %v1618_v56  ;;  %v646_v48 = vor.u32 %v645_v32, %v641_v30 }
 0x109   : > { %v1023_v12 = vpack.c.b16 %v5899_v9, %v4979_v8  ;;  %2099 = vmatpush.bf16.msrb.mxu2 %v4863_v7 }
 0x10a   : > { %v6061_v32 = vsel %vm519_vm0, %v646_v48, %v5558_v40  ;;  %v4861_v40 = vld [vmem:[%s7717_s2 + $0x190] sm:$0xff] }
 0x10d   : > { %2100 = vmatpush.bf16.msrb.mxu2 %v4862_v52 }
 0x10e   : > { %v1786_v41 = vpop.f32.mrf.mxu2  ;;  %v1621_v30 = vpop.f32.mrf.mxu0 }
 0x10f   : > { %v6055_v56 = vpop.f32.mrf.mxu3  ;;  %v6057_v1 = vadd.f32 %v1786_v41, %v1703_v46  ;;  %v1705_v15 = vpop.f32.mrf.mxu1  ;;  %v4855_v46 = vld [vmem:[%s7717_s2 + $0x160] sm:$0xff] }
 0x110   : > { %7817 = vst [vmem:[#allocation49_spill] sm:$0xff] %v6055_v56  ;;  %v1706_v29 = vadd.f32 %v1705_v15, %v1621_v30  ;;  %2015 = vmatpush.bf16.msrb.mxu1 %v4855_v46  ;;  %v4853_v30 = vld [vmem:[%s7717_s2 + $0x150] sm:$0xff]  ;;  %v4860_v15 = vld [vmem:[%s7717_s2 + $0x188] sm:$0xff]  ;;  %v4859_v46 = vld [vmem:[%s7717_s2 + $0x180] sm:$0xff] }
 0x111   : > { %1660 = vmatmul.bf16.gmra.mxu0 %v6018_v39  ;;  %2101 = vmatpush.bf16.msrb.mxu2 %v4861_v40 }
 0x112   : > { %1744 = vmatmul.bf16.gmra.mxu1 %v6061_v32 }
 0x113   : > { %1828 = vmatmul.bf16.gmra.mxu2 %v6067_v24 }
 0x114   : > { %1892 = vmatmul.bf16.gmra.mxu3 %v1023_v12  ;;  %2016 = vmatpush.bf16.msrb.mxu1 %v4854_v23  ;;  %v4852_v12 = vld [vmem:[%s7717_s2 + $0x148] sm:$0xff] }
 0x115   : > { %2102 = vmatpush.bf16.msrb.mxu2 %v4860_v15 }
 0x116   : > { %v1789_v9 = vpop.f32.mrf.mxu2  ;;  %v1623_v60 = vpop.f32.mrf.mxu0 }
 0x117   : > { %v1853_v11 = vpop.f32.mrf.mxu3  ;;  %v6084_v48 = vadd.f32 %v1789_v9, %v1706_v29  ;;  %v1707_v7 = vpop.f32.mrf.mxu1  ;;  %v4874_v29 = vld [vmem:[%s7717_s2 + $0x1f8] sm:$0xff] }
 0x118   : > { %v6087_v8 = vadd.f32 %v1853_v11, %v5918_v59  ;;  %v1708_v41 = vadd.f32 %v1707_v7, %v1623_v60  ;;  %v4990_v59 = vunpack.c.l.b16 %v5506_v14  ;;  %2180 = vmatpush.bf16.msrb.mxu3 %v4874_v29  ;;  %2017 = vmatpush.bf16.msrb.mxu1 %v4853_v30  ;;  %v4851_v30 = vld [vmem:[%s7717_s2 + $0x140] sm:$0xff] }
 0x119   : > { %2103 = vmatpush.bf16.msrb.mxu2 %v4859_v46 }
 0x11a   : > { %v6106_v40 = vpack.c.b16 %v4990_v59, %v5511_v18 }
 0x11c   : > { %2018 = vmatpush.bf16.msrb.mxu1 %v4852_v12 }
 0x11e   : > { %v1791_v52 = vpop.f32.mrf.mxu2  ;;  %v1626_v11 = vpop.f32.mrf.mxu0 }
 0x11f   : > { %v1855_v23 = vpop.f32.mrf.mxu3  ;;  %v6108_v9 = vadd.f32 %v1791_v52, %v1708_v41  ;;  %v1710_v60 = vpop.f32.mrf.mxu1  ;;  %v6129_v52 = vld [vmem:[%s5486_s20 + $0x90] sm:$0xff]  }
 0x120   : > { %v6111_v14 = vadd.f32 %v1855_v23, %v5937_v20  ;;  %v1711_v7 = vadd.f32 %v1710_v60, %v1626_v11  ;;  %v4882_v20 = vld [vmem:[%s7717_s2 + $0x238] sm:$0xff]  ;;  %2019 = vmatpush.bf16.msrb.mxu1 %v4851_v30  ;;  %v4986_v23 = vunpack.c.l.b16 %v6018_v39 }
 0x121   : > { %1665 = vmatmul.bf16.gmra.mxu0 %v6106_v40 }
 0x122   : > { %2264 = vmatpush.bf16.msra.mxu0 %v4882_v20 }
 0x123   : > { %2104 = vmatmul.bf16.vlgmr.msrb.gmra.mxu2 %v5708_v6  ;;  %2020 = vmatmul.bf16.vlgmr.msrb.gmra.mxu1 %v5647_v33  ;;  %v4991_v6 = vunpack.c.h.b16 %v6129_v52  ;;  %v1033_v33 = vpack.c.b16 %v4986_v23, %v5920_v62  ;;  %v4873_v23 = vld [vmem:[%s7717_s2 + $0x1f0] sm:$0xff] }
 0x124   : > { %1897 = vmatmul.bf16.gmra.mxu3 %v5923_v31 }
 0x125   : > { %v6134_v30 = vpack.c.b16 %v5519_v21, %v4991_v6  ;;  %2181 = vmatpush.bf16.msrb.mxu3 %v4873_v23 }
 0x126   : > { %v1794_v41 = vpop.f32.mrf.mxu2  ;;  %v1628_v12 = vpop.f32.mrf.mxu0 }
 0x127   : > { %v1858_v15 = vpop.f32.mrf.mxu3  ;;  %v6122_v29 = vadd.f32 %v1794_v41, %v1711_v7  ;;  %v1712_v46 = vpop.f32.mrf.mxu1 }
 0x128   : > { %v6125_v59 = vadd.f32 %v1858_v15, %v5953_v4  ;;  %v1713_v31 = vadd.f32 %v1712_v46, %v1628_v12  ;;  %v762_v12 = vunpack.c.l.b16 %v5744_v47 }
 0x12a   : > { %v984_v46 = vpack.c.b16 %v762_v12, %v5685_v51 }
 0x12e   : > { %v1796_v11 = vpop.f32.mrf.mxu2  ;;  %v1631_v20 = vpop.f32.mrf.mxu0 }
 0x12f   : > { %v1860_v60 = vpop.f32.mrf.mxu3  ;;  %v6136_v7 = vadd.f32 %v1796_v11, %v1713_v31  ;;  %v1715_v41 = vpop.f32.mrf.mxu1 }
 0x130   : > { %v6139_v4 = vadd.f32 %v1860_v60, %v5979_v35  ;;  %v1716_v15 = vadd.f32 %v1715_v41, %v1631_v20 }
 0x131   : > { %1670 = vmatmul.bf16.gmra.mxu0 %v6134_v30 }
 0x133   : > { %2109 = vmatmul.bf16.gmra.mxu2 %v5778_v16  ;;  %2025 = vmatmul.bf16.gmra.mxu1 %v984_v46  ;;  %v4987_v16 = vunpack.c.h.b16 %v6018_v39 }
 0x134   : > { %1902 = vmatmul.bf16.gmra.mxu3 %v1033_v33 }
 0x135   : > { %v1039_v12 = vpack.c.b16 %v5511_v18, %v4987_v16 }
 0x136   : > { %v1799_v6 = vpop.f32.mrf.mxu2  ;;  %v1633_v60 = vpop.f32.mrf.mxu0 }
 0x137   : > { %v1863_v31 = vpop.f32.mrf.mxu3  ;;  %v6146_v11 = vadd.f32 %v1799_v6, %v1716_v15  ;;  %v1717_v56 = vpop.f32.mrf.mxu1  ;;  %v768_v6 = vunpack.c.h.b16 %v5744_v47 }
 0x138   : > { %v6149_v35 = vadd.f32 %v1863_v31, %v5993_v19  ;;  %v1718_v62 = vadd.f32 %v1717_v56, %v1633_v60  ;;  %v4881_v56 = vld [vmem:[%s7717_s2 + $0x230] sm:$0xff] }
 0x139   : > { %v993_v31 = vpack.c.b16 %v5774_v13, %v768_v6  ;;  %2265 = vmatpush.bf16.msra.mxu0 %v4881_v56 }
 0x13e   : > { %v1801_v20 = vpop.f32.mrf.mxu2  ;;  %v1636_v19 = vpop.f32.mrf.mxu0 }
 0x13f   : > { %v1865_v51 = vpop.f32.mrf.mxu3  ;;  %v6155_v41 = vadd.f32 %v1801_v20, %v1718_v62  ;;  %v1720_v15 = vpop.f32.mrf.mxu1 }
 0x140   : > { %v6158_v33 = vadd.f32 %v1865_v51, %v6011_v42  ;;  %v1721_v46 = vadd.f32 %v1720_v15, %v1636_v19  ;;  %v7819_v19 = vunpack.c.l.b16 %v5668_v26  ;;  %v4870_v26 = vld [vmem:[%s7717_s2 + $0x1d8] sm:$0xff] }
 0x141   : > { %1936 = vmatmul.bf16.vlgmr.msrb.gmra.mxu0 %v5641_v25  ;;  %v4872_v25 = vld [vmem:[%s7717_s2 + $0x1e8] sm:$0xff] }
 0x142   : > { %2182 = vmatpush.bf16.msrb.mxu3 %v4872_v25 }
 0x143   : > { %2114 = vmatmul.bf16.gmra.mxu2 %v5803_v57  ;;  %2030 = vmatmul.bf16.gmra.mxu1 %v993_v31  ;;  %v761_v57 = vunpack.c.l.b16 %v5740_v44 }
 0x144   : > { %1907 = vmatmul.bf16.gmra.mxu3 %v1039_v12 }
 0x145   : > { %v983_v15 = vpack.c.b16 %v761_v57, %v7819_v19 }
 0x146   : > { %v1804_v42 = vpop.f32.mrf.mxu2  ;;  %v1638_v23 = vpop.f32.mrf.mxu0 }
 0x147   : > { %v1868_v60 = vpop.f32.mrf.mxu3  ;;  %v6168_v62 = vadd.f32 %v1804_v42, %v1721_v46  ;;  %v1722_v16 = vpop.f32.mrf.mxu1 }
 0x148   : > { %v6171_v18 = vadd.f32 %v1868_v60, %v6038_v10  ;;  %v1723_v20 = vadd.f32 %v1722_v16, %v1638_v23  ;;  %v4871_v10 = vld [vmem:[%s7717_s2 + $0x1e0] sm:$0xff] }
 0x149   : > { %2183 = vmatpush.bf16.msrb.mxu3 %v4871_v10 }
 0x14d   : > { %2184 = vmatpush.bf16.msrb.mxu3 %v4870_v26 }
 0x14e   : > { %v1806_v13 = vpop.f32.mrf.mxu2  ;;  %v1641_v56 = vpop.f32.mrf.mxu0 }
 0x14f   : > { %v1870_v51 = vpop.f32.mrf.mxu3  ;;  %v6182_v12 = vadd.f32 %v1806_v13, %v1723_v20  ;;  %v1725_v6 = vpop.f32.mrf.mxu1  ;;  %v767_v13 = vunpack.c.h.b16 %v5740_v44 }
 0x150   : > { %v6185_v46 = vadd.f32 %v1870_v51, %v6057_v1  ;;  %v1726_v31 = vadd.f32 %v1725_v6, %v1641_v56  ;;  %v4869_v1 = vld [vmem:[%s7717_s2 + $0x1d0] sm:$0xff] }
 0x151   : > { %1941 = vmatmul.bf16.gmra.mxu0 %v983_v15  ;;  %2185 = vmatpush.bf16.msrb.mxu3 %v4869_v1  ;;  %v7820_v15 = vunpack.c.l.b16 %v5760_v61  ;;  %v782_v61 = vunpack.c.l.b16 %v5844_v37 }
 0x153   : > { %2119 = vmatmul.bf16.gmra.mxu2 %v5816_v49  ;;  %2035 = vmatmul.bf16.gmra.mxu1 %v5769_v3  ;;  %v4868_v49 = vld [vmem:[%s7717_s2 + $0x1c8] sm:$0xff]  ;;  %v992_v10 = vpack.c.b16 %v7820_v15, %v767_v13  ;;  %v4867_v3 = vld [vmem:[%s7717_s2 + $0x1c0] sm:$0xff] }
 0x154   : > { %1912 = vmatmul.bf16.gmra.mxu3 %v6129_v52  ;;  %v6202_v52 = vld [vmem:[%s5486_s20 + $0xa0] sm:$0xff]  }
 0x155   : > { %v4994_v51 = vunpack.c.l.b16 %v6202_v52  ;;  %2186 = vmatpush.bf16.msrb.mxu3 %v4868_v49 }
 0x156   : > { %v1809_v42 = vpop.f32.mrf.mxu2  ;;  %v1643_v20 = vpop.f32.mrf.mxu0 }
 0x157   : > { %v1873_v60 = vpop.f32.mrf.mxu3  ;;  %v6195_v23 = vadd.f32 %v1809_v42, %v1726_v31  ;;  %v1727_v25 = vpop.f32.mrf.mxu1  ;;  %v1049_v42 = vpack.c.b16 %v4994_v51, %v5519_v21 }
 0x158   : > { %v6198_v16 = vadd.f32 %v1873_v60, %v6084_v48  ;;  %v1728_v57 = vadd.f32 %v1727_v25, %v1643_v20  ;;  %v4880_v60 = vld [vmem:[%s7717_s2 + $0x228] sm:$0xff] }
 0x159   : > { %2187 = vmatpush.bf16.msrb.mxu3 %v4867_v3  ;;  %2266 = vmatpush.bf16.msra.mxu0 %v4880_v60  ;;  %v784_v60 = vunpack.c.h.b16 %v5844_v37 }
 0x15e   : > { %v1811_v19 = vpop.f32.mrf.mxu2  ;;  %v1646_v31 = vpop.f32.mrf.mxu0 }
 0x15f   : > { %v1875_v48 = vpop.f32.mrf.mxu3  ;;  %v6214_v56 = vadd.f32 %v1811_v19, %v1728_v57  ;;  %v1730_v26 = vpop.f32.mrf.mxu1  ;;  %v413_v19 = vld [vmem:[%s5486_s20 + $0xa8] sm:$0xf] }
 0x160   : > { %v6217_v6 = vadd.f32 %v1875_v48, %v6108_v9  ;;  %v1731_v1 = vadd.f32 %v1730_v26, %v1646_v31  ;;  %v1003_v9 = vpack.c.b16 %v782_v61, %v5797_v38  ;;  %v4995_v48 = vunpack.c.h.b16 %v6202_v52 }
 0x161   : > { %1946 = vmatmul.bf16.gmra.mxu0 %v992_v10  ;;  %v6233_v15 = vunpack.c.l.b16 %v413_v19  ;;  %v7821_v19 = vunpack.c.l.b16 %v5791_v27 }
 0x163   : > { %2124 = vmatmul.bf16.gmra.mxu2 %v5865_v58  ;;  %2040 = vmatmul.bf16.gmra.mxu1 %v1003_v9 }
 0x164   : > { %1917 = vmatmul.bf16.gmra.mxu3 %v1049_v42 }
 0x166   : > { %v1814_v20 = vpop.f32.mrf.mxu2  ;;  %v1648_v49 = vpop.f32.mrf.mxu0 }
 0x167   : > { %v1878_v25 = vpop.f32.mrf.mxu3  ;;  %v6226_v57 = vadd.f32 %v1814_v20, %v1731_v1  ;;  %v1732_v13 = vpop.f32.mrf.mxu1  ;;  %v1009_v1 = vpack.c.b16 %v5861_v28, %v784_v60 }
 0x168   : > { %v6229_v21 = vadd.f32 %v1878_v25, %v6122_v29  ;;  %v1733_v51 = vadd.f32 %v1732_v13, %v1648_v49  ;;  %v1055_v29 = vpack.c.b16 %v6233_v15, %v4995_v48 }
 0x16e   : > { %v1816_v10 = vpop.f32.mrf.mxu2  ;;  %v1651_v31 = vpop.f32.mrf.mxu0 }
 0x16f   : > { %v1880_v58 = vpop.f32.mrf.mxu3  ;;  %v6235_v3 = vadd.f32 %v1816_v10, %v1733_v51  ;;  %v1735_v26 = vpop.f32.mrf.mxu1  ;;  %v781_v51 = vunpack.c.l.b16 %v5840_v55 }
 0x170   : > { %v6238_v38 = vadd.f32 %v1880_v58, %v6136_v7  ;;  %v1736_v42 = vadd.f32 %v1735_v26, %v1651_v31 }
 0x171   : > { %1951 = vmatmul.bf16.gmra.mxu0 %v5763_v63  ;;  %v4879_v63 = vld [vmem:[%s7717_s2 + $0x220] sm:$0xff]  ;;  %v1002_v48 = vpack.c.b16 %v781_v51, %v7821_v19 }
 0x172   : > { %2267 = vmatpush.bf16.msra.mxu0 %v4879_v63 }
 0x173   : > { %2129 = vmatmul.bf16.gmra.mxu2 %v5893_v50  ;;  %2045 = vmatmul.bf16.gmra.mxu1 %v1009_v1 }
 0x174   : > { %1922 = vmatmul.bf16.gmra.mxu3 %v1055_v29 }
 0x176   : > { %v1819_v61 = vpop.f32.mrf.mxu2  ;;  %v1653_v25 = vpop.f32.mrf.mxu0 }
 0x177   : > { %v1883_v9 = vpop.f32.mrf.mxu3  ;;  %v6245_v20 = vadd.f32 %v1819_v61, %v1736_v42  ;;  %v1737_v49 = vpop.f32.mrf.mxu1 }
 0x178   : > { %v6248_v7 = vadd.f32 %v1883_v9, %v6146_v11  ;;  %v1738_v13 = vadd.f32 %v1737_v49, %v1653_v25  ;;  %v783_v9 = vunpack.c.h.b16 %v5840_v55 }
 0x17e   : > { %v1821_v50 = vpop.f32.mrf.mxu2  ;;  %v1656_v58 = vpop.f32.mrf.mxu0 }
 0x17f   : > { %v1885_v28 = vpop.f32.mrf.mxu3  ;;  %v6256_v10 = vadd.f32 %v1821_v50, %v1738_v13  ;;  %v1740_v31 = vpop.f32.mrf.mxu1 }
 0x180   : > { %v6259_v11 = vadd.f32 %v1885_v28, %v6155_v41  ;;  %v1741_v26 = vadd.f32 %v1740_v31, %v1656_v58  ;;  %v794_v28 = vunpack.c.l.b16 %v5942_v54 }
 0x181   : > { %1956 = vmatmul.bf16.gmra.mxu0 %v1002_v48 }
 0x183   : > { %2134 = vmatmul.bf16.gmra.mxu2 %v5906_v0  ;;  %2050 = vmatmul.bf16.gmra.mxu1 %v5856_v36  ;;  %v1019_v36 = vpack.c.b16 %v794_v28, %v5887_v53 }
 0x184   : > { %2188 = vmatmul.bf16.vlgmr.msrb.gmra.mxu3 %v5740_v44  ;;  %v7822_v44 = vunpack.c.l.b16 %v5850_v2 }
 0x186   : > { %v1824_v29 = vpop.f32.mrf.mxu2  ;;  %v1658_v1 = vpop.f32.mrf.mxu0  ;;  %v1008_v13 = vpack.c.b16 %v7822_v44, %v783_v9  ;;  %v7823_v44 = vld [vmem:[#allocation34_spill] sm:$0xff] }
 0x187   : > { %v1888_v42 = vpop.f32.mrf.mxu3  ;;  %v6263_v60 = vadd.f32 %v1824_v29, %v1741_v26  ;;  %v1742_v61 = vpop.f32.mrf.mxu1  ;;  %v4878_v29 = vld [vmem:[%s7717_s2 + $0x218] sm:$0xff] }
 0x188   : > { %v6266_v27 = vadd.f32 %v1888_v42, %v6168_v62  ;;  %v1743_v41 = vadd.f32 %v1742_v61, %v1658_v1  ;;  %2268 = vmatpush.bf16.msra.mxu0 %v4878_v29 }
 0x18e   : > { %v1826_v25 = vpop.f32.mrf.mxu2  ;;  %v1661_v51 = vpop.f32.mrf.mxu0 }
 0x18f   : > { %v1890_v49 = vpop.f32.mrf.mxu3  ;;  %v6272_v0 = vadd.f32 %v1826_v25, %v1743_v41  ;;  %v1745_v62 = vpop.f32.mrf.mxu1 }
 0x190   : > { %v6275_v63 = vadd.f32 %v1890_v49, %v6182_v12  ;;  %v1746_v50 = vadd.f32 %v1745_v62, %v1661_v51 }
 0x191   : > { %1961 = vmatmul.bf16.gmra.mxu0 %v1008_v13  ;;  %v793_v13 = vunpack.c.l.b16 %v7823_v44 }
 0x193   : > { %2139 = vmatmul.bf16.gmra.mxu2 %v5973_v5  ;;  %2055 = vmatmul.bf16.gmra.mxu1 %v1019_v36 }
 0x194   : > { %2193 = vmatmul.bf16.gmra.mxu3 %v5782_v17 }
 0x196   : > { %v1829_v19 = vpop.f32.mrf.mxu2  ;;  %v1663_v12 = vpop.f32.mrf.mxu0 }
 0x197   : > { %v1893_v2 = vpop.f32.mrf.mxu3  ;;  %v6281_v48 = vadd.f32 %v1829_v19, %v1746_v50  ;;  %v1747_v31 = vpop.f32.mrf.mxu1 }
 0x198   : > { %v6284_v58 = vadd.f32 %v1893_v2, %v6195_v23  ;;  %v1748_v26 = vadd.f32 %v1747_v31, %v1663_v12  ;;  %v796_v23 = vunpack.c.h.b16 %v5942_v54  ;;  %v7826_v31 = vld [vmem:[#allocation38_spill] sm:$0xff] }
 0x19a   : > { %v1025_v61 = vpack.c.b16 %v5967_v43, %v796_v23 }
 0x19e   : > { %v1831_v17 = vpop.f32.mrf.mxu2  ;;  %v6294_v1 = vpop.f32.mrf.mxu0 }
 0x19f   : > { %v1895_v5 = vpop.f32.mrf.mxu3  ;;  %v6289_v42 = vadd.f32 %v1831_v17, %v1748_v26  ;;  %v795_v26 = vunpack.c.h.b16 %v7823_v44 }
 0x1a0   : > { %v6292_v53 = vadd.f32 %v1895_v5, %v6214_v56  ;;  %v2021_v41 = vpop.f32.mrf.mxu1 }
 0x1a1   : > { %1966 = vmatmul.bf16.gmra.mxu0 %v5853_v34  ;;  %v7824_v34 = vld [vmem:[#allocation29_spill] sm:$0xff] }
 0x1a2   : > { %v7825_v50 = vunpack.c.l.b16 %v7824_v34  ;;  %v7829_v34 = vld [vmem:[#allocation27_spill] sm:$0xff] }
 0x1a3   : > { %2144 = vmatmul.bf16.gmra.mxu2 %v6005_v22  ;;  %2060 = vmatmul.bf16.gmra.mxu1 %v1025_v61 }
 0x1a4   : > { %2198 = vmatmul.bf16.gmra.mxu3 %v5807_v45  ;;  %v1018_v45 = vpack.c.b16 %v793_v13, %v7825_v50  ;;  %v806_v13 = vunpack.c.l.b16 %v6067_v24  ;;  %v7830_v50 = vld [vmem:[#allocation44_spill] sm:$0xff] }
 0x1a6   : > { %v2105_v25 = vpop.f32.mrf.mxu2  ;;  %v6304_v56 = vpop.f32.mrf.mxu0 }
 0x1a7   : > { %v1898_v9 = vpop.f32.mrf.mxu3 }
 0x1a8   : > { %v6302_v49 = vadd.f32 %v1898_v9, %v6226_v57  ;;  %v2023_v51 = vpop.f32.mrf.mxu1 }
 0x1ae   : > { %v2107_v28 = vpop.f32.mrf.mxu2  ;;  %v6312_v43 = vpop.f32.mrf.mxu0 }
 0x1af   : > { %v1900_v62 = vpop.f32.mrf.mxu3 }
 0x1b0   : > { %v6310_v22 = vadd.f32 %v1900_v62, %v6235_v3  ;;  %v2026_v57 = vpop.f32.mrf.mxu1  ;;  %v4877_v3 = vld [vmem:[%s7717_s2 + $0x210] sm:$0xff] }
 0x1b1   : > { %1971 = vmatmul.bf16.gmra.mxu0 %v1018_v45  ;;  %v1035_v45 = vpack.c.b16 %v806_v13, %v7830_v50  ;;  %v808_v13 = vunpack.c.h.b16 %v6067_v24 }
 0x1b2   : > { %2269 = vmatpush.bf16.msra.mxu0 %v4877_v3 }
 0x1b3   : > { %2149 = vmatmul.bf16.gmra.mxu2 %v6018_v39  ;;  %2065 = vmatmul.bf16.gmra.mxu1 %v7826_v31  ;;  %v7827_v39 = vld [vmem:[#allocation36_spill] sm:$0xff] }
 0x1b4   : > { %2203 = vmatmul.bf16.gmra.mxu3 %v5840_v55  ;;  %v7828_v17 = vunpack.c.l.b16 %v7827_v39 }
 0x1b6   : > { %v2110_v19 = vpop.f32.mrf.mxu2  ;;  %v6319_v12 = vpop.f32.mrf.mxu0  ;;  %v1024_v5 = vpack.c.b16 %v7828_v17, %v795_v26 }
 0x1b7   : > { %v1903_v36 = vpop.f32.mrf.mxu3 }
 0x1b8   : > { %v6317_v2 = vadd.f32 %v1903_v36, %v6245_v20  ;;  %v2028_v55 = vpop.f32.mrf.mxu1 }
 0x1be   : > { %v2112_v23 = vpop.f32.mrf.mxu2  ;;  %v1937_v61 = vpop.f32.mrf.mxu0 }
 0x1bf   : > { %v1905_v29 = vpop.f32.mrf.mxu3  ;;  %v1938_v9 = vadd.f32 %v1937_v61, %v6087_v8 }
 0x1c0   : > { %v6329_v20 = vadd.f32 %v1905_v29, %v6256_v10  ;;  %v2031_v31 = vpop.f32.mrf.mxu1 }
 0x1c1   : > { %v2022_v62 = vadd.f32 %v2021_v41, %v1938_v9  ;;  %1976 = vmatmul.bf16.gmra.mxu0 %v1024_v5 }
 0x1c3   : > { %2154 = vmatmul.bf16.gmra.mxu2 %v6106_v40  ;;  %v6336_v36 = vadd.f32 %v2105_v25, %v2022_v62  ;;  %2070 = vmatmul.bf16.gmra.mxu1 %v1035_v45  ;;  %v7831_v62 = vld [vmem:[#allocation37_spill] sm:$0xff] }
 0x1c4   : > { %2208 = vmatmul.bf16.gmra.mxu3 %v7829_v34  ;;  %v7832_v34 = vld [vmem:[#allocation30_spill] sm:$0xff] }
 0x1c6   : > { %v2115_v26 = vpop.f32.mrf.mxu2  ;;  %v1939_v29 = vpop.f32.mrf.mxu0 }
 0x1c7   : > { %v1908_v3 = vpop.f32.mrf.mxu3  ;;  %v1940_v8 = vadd.f32 %v1939_v29, %v6111_v14  ;;  %v7833_v14 = vld [vmem:[#allocation21_spill] sm:$0xff] }
 0x1c8   : > { %v6339_v10 = vadd.f32 %v1908_v3, %v6263_v60  ;;  %v2033_v17 = vpop.f32.mrf.mxu1 }
 0x1c9   : > { %v2024_v41 = vadd.f32 %v2023_v51, %v1940_v8  ;;  %v1041_v51 = vpack.c.b16 %v7833_v14, %v808_v13 }
 0x1cb   : > { %v6342_v39 = vadd.f32 %v2107_v28, %v2024_v41 }
 0x1ce   : > { %v2117_v40 = vpop.f32.mrf.mxu2  ;;  %v1942_v25 = vpop.f32.mrf.mxu0 }
 0x1cf   : > { %v1910_v5 = vpop.f32.mrf.mxu3  ;;  %v1943_v9 = vadd.f32 %v1942_v25, %v6125_v59 }
 0x1d0   : > { %v6345_v61 = vadd.f32 %v1910_v5, %v6272_v0  ;;  %v6355_v50 = vpop.f32.mrf.mxu1 }
 0x1d1   : > { %v2027_v60 = vadd.f32 %v2026_v57, %v1943_v9  ;;  %1981 = vmatmul.bf16.gmra.mxu0 %v7831_v62  ;;  %v4876_v57 = vld [vmem:[%s7717_s2 + $0x208] sm:$0xff] }
 0x1d2   : > { %2270 = vmatpush.bf16.msra.mxu0 %v4876_v57 }
 0x1d3   : > { %2159 = vmatmul.bf16.gmra.mxu2 %v6134_v30  ;;  %v6353_v28 = vadd.f32 %v2110_v19, %v2027_v60  ;;  %2075 = vmatmul.bf16.gmra.mxu1 %v1041_v51  ;;  %v805_v19 = vunpack.c.l.b16 %v6061_v32 }
 0x1d4   : > { %2213 = vmatmul.bf16.gmra.mxu3 %v7832_v34 }
 0x1d6   : > { %v6357_v45 = vpop.f32.mrf.mxu2  ;;  %v1944_v3 = vpop.f32.mrf.mxu0 }
 0x1d7   : > { %v1913_v0 = vpop.f32.mrf.mxu3  ;;  %v1945_v30 = vadd.f32 %v1944_v3, %v6139_v4 }
 0x1d8   : > { %v6360_v59 = vadd.f32 %v1913_v0, %v6281_v48  ;;  %v6369_v41 = vpop.f32.mrf.mxu1  ;;  %v7834_v48 = vld [vmem:[#allocation43_spill] sm:$0xff]  ;;  %v414_v0 = vld [vmem:[%s5486_s20 + $0xac] sm:$0x1] }
 0x1d9   : > { %v2029_v29 = vadd.f32 %v2028_v55, %v1945_v30  ;;  %v7835_v25 = vunpack.c.l.b16 %v7834_v48  ;;  %v7836_v55 = vld [vmem:[#allocation32_spill] sm:$0xff]  ;;  %v807_v48 = vunpack.c.h.b16 %v6061_v32 }
 0x1da   : > { %v1751_v34 = vadd.f32 %v7836_v55, %v6294_v1  ;;  %v7840_v55 = vld [vmem:[#allocation45_spill] sm:$0xff] }
 0x1db   : > { %v6367_v8 = vadd.f32 %v2112_v23, %v2029_v29  ;;  %v1034_v9 = vpack.c.b16 %v805_v19, %v7835_v25  ;;  %v708_v29 = vunpack.c.l.b16 %v414_v0  ;;  %v7841_v0 = vld [vmem:[#allocation15_spill] sm:$0xff] }
 0x1dd   : > { %v6399_v25 = vpack.c.b16 %v708_v29, %v6233_v15 }
 0x1de   : > { %v6373_v13 = vpop.f32.mrf.mxu2  ;;  %v1947_v62 = vpop.f32.mrf.mxu0 }
 0x1df   : > { %v1915_v5 = vpop.f32.mrf.mxu3  ;;  %v1948_v4 = vadd.f32 %v1947_v62, %v6149_v35 }
 0x1e0   : > { %v6376_v60 = vadd.f32 %v1915_v5, %v6289_v42  ;;  %v6385_v51 = vpop.f32.mrf.mxu1  ;;  %v7837_v42 = vld [vmem:[#allocation42_spill] sm:$0xff] }
 0x1e1   : > { %v2032_v14 = vadd.f32 %v2031_v31, %v1948_v4  ;;  %1986 = vmatmul.bf16.gmra.mxu0 %v1034_v9  ;;  %v1835_v3 = vadd.f32 %v7837_v42, %v1751_v34  ;;  %v7838_v31 = vld [vmem:[#allocation20_spill] sm:$0xff]  ;;  %v6406_v4 = vld [vmem:[%s5486_s20 + $0xb0] sm:$0xff]   ;;  %v7842_v42 = vunpack.c.l.b16 %v7841_v0 }
 0x1e3   : > { %2164 = vmatmul.bf16.gmra.mxu2 %v6202_v52  ;;  %v6383_v23 = vadd.f32 %v2115_v26, %v2032_v14  ;;  %2080 = vmatmul.bf16.gmra.mxu1 %v7838_v31  ;;  %v7839_v26 = vld [vmem:[#allocation33_spill] sm:$0xff]  ;;  %v4998_v14 = vunpack.c.l.b16 %v6406_v4 }
 0x1e4   : > { %2218 = vmatmul.bf16.gmra.mxu3 %v7823_v44  ;;  %v1753_v19 = vadd.f32 %v7839_v26, %v6304_v56  ;;  %v1040_v56 = vpack.c.b16 %v7842_v42, %v807_v48  ;;  %v7844_v26 = vld [vmem:[#allocation35_spill] sm:$0xff]  ;;  %v7845_v48 = vld [vmem:[#allocation40_spill] sm:$0xff] }
 0x1e5   : > { %v1052_v31 = vpack.c.b16 %v4998_v14, %v6233_v15  ;;  %v7848_v15 = vld [vmem:[#allocation48_spill] sm:$0xff] }
 0x1e6   : > { %v6389_v30 = vpop.f32.mrf.mxu2  ;;  %v1949_v1 = vpop.f32.mrf.mxu0  ;;  %v1837_v34 = vadd.f32 %v7840_v55, %v1753_v19  ;;  %v1756_v19 = vadd.f32 %v7844_v26, %v6312_v43  ;;  %v7846_v55 = vld [vmem:[#allocation23_spill] sm:$0xff]  ;;  %v714_v26 = vshll.u32 %v6202_v52, 16 }
 0x1e7   : > { %v1918_v57 = vpop.f32.mrf.mxu3  ;;  %v1950_v44 = vadd.f32 %v1949_v1, %v6158_v33 }
 0x1e8   : > { %v6391_v35 = vadd.f32 %v1918_v57, %v1835_v3  ;;  %v6403_v62 = vpop.f32.mrf.mxu1  ;;  %v726_v3 = vrot.slane %v6202_v52, 1  ;;  %v727_v57 = vrot.slane %v6399_v25, 1  ;;  %v1840_v14 = vadd.f32 %v7848_v15, %v1756_v19  ;;  %v4898_v19 = vld [vmem:[%s7720_s5 + $0x78] sm:$0xff] }
 0x1e9   : > { %v2034_v5 = vadd.f32 %v2033_v17, %v1950_v44  ;;  %3565 = vmatpush.bf16.msra.mxu2 %v4898_v19  ;;  %v7854_v19 = vld [vmem:[#allocation16_spill] sm:$0xff] }
 0x1ea   : > { %v6423_v44 = vsel %vm670_vm1, %v726_v3, %v727_v57 }
 0x1eb   : > { %v6401_v9 = vadd.f32 %v2117_v40, %v2034_v5  ;;  %v818_v5 = vunpack.c.l.b16 %v6423_v44 }
 0x1ee   : > { %v6412_v17 = vpop.f32.mrf.mxu2  ;;  %v1952_v1 = vpop.f32.mrf.mxu0 }
 0x1ef   : > { %v1920_v33 = vpop.f32.mrf.mxu3  ;;  %7843 = vst [vmem:[#allocation34_spill] sm:$0xff] %v6412_v17  ;;  %v6420_v29 = vadd.f32 %v1952_v1, %v6171_v18  ;;  %v4875_v18 = vld [vmem:[%s7717_s2 + $0x200] sm:$0xff] }
 0x1f0   : > { %v6416_v40 = vadd.f32 %v1920_v33, %v1837_v34  ;;  %v1051_v34 = vpack.c.b16 %v818_v5, %v7846_v55  ;;  %v6430_v33 = vpop.f32.mrf.mxu1  ;;  %2271 = vmatpush.bf16.msra.mxu0 %v4875_v18  ;;  %v7850_v1 = vld [vmem:[#allocation39_spill] sm:$0xff]  ;;  %v7852_v55 = vld [vmem:[#allocation49_spill] sm:$0xff] }
 0x1f1   : > { %1991 = vmatmul.bf16.gmra.mxu0 %v1040_v56  ;;  %7847 = vst [vmem:[#allocation29_spill] sm:$0xff] %v6430_v33 }
 0x1f3   : > { %2169 = vmatmul.bf16.gmra.mxu2 %v1052_v31  ;;  %2085 = vmatmul.bf16.gmra.mxu1 %v1051_v34  ;;  %v1758_v31 = vadd.f32 %v7850_v1, %v6319_v12  ;;  %v4999_v34 = vunpack.c.h.b16 %v6406_v4  ;;  %v716_v1 = vrot.slane %v714_v26, 1  ;;  %v7855_v26 = vld [vmem:[#allocation46_spill] sm:$0xff] }
 0x1f4   : > { %2223 = vmatmul.bf16.gmra.mxu3 %v7845_v48  ;;  %v6452_v48 = vld [vmem:[%s5486_s20 + $0xb8] sm:$0xf] }
 0x1f5   : > { %v1842_v18 = vadd.f32 %v7852_v55, %v1758_v31  ;;  %v4890_v55 = vld [vmem:[%s7720_s5 + $0x38] sm:$0xff] }
 0x1f6   : > { %v6436_v42 = vpop.f32.mrf.mxu2  ;;  %v1954_v56 = vpop.f32.mrf.mxu0  ;;  %3516 = vmatpush.bf16.msra.mxu1 %v4890_v55 }
 0x1f7   : > { %v1923_v0 = vpop.f32.mrf.mxu3  ;;  %7849 = vst [vmem:[#allocation38_spill] sm:$0xff] %v6436_v42  ;;  %v6441_v3 = vadd.f32 %v1954_v56, %v6185_v46  ;;  %v7770_v46 = vunpack.c.l.b16 %v6452_v48 }
 0x1f8   : > { %v6438_v43 = vadd.f32 %v1923_v0, %v1840_v14  ;;  %v6446_v5 = vpop.f32.mrf.mxu1  ;;  %v712_v14 = vshrl.u32 %v6202_v52, 16  ;;  %v820_v52 = vunpack.c.h.b16 %v6423_v44 }
 0x1f9   : > { %7851 = vst [vmem:[#allocation36_spill] sm:$0xff] %v6446_v5  ;;  %v719_v5 = vshll.u32 %v6399_v25, 16  ;;  %v1058_v42 = vpack.c.b16 %v7770_v46, %v4999_v34 }
 0x1fe   : > { %v6458_v12 = vpop.f32.mrf.mxu2  ;;  %v1957_v56 = vpop.f32.mrf.mxu0 }
 0x1ff   : > { %v1925_v15 = vpop.f32.mrf.mxu3  ;;  %7853 = vst [vmem:[#allocation27_spill] sm:$0xff] %v6458_v12  ;;  %v6466_v31 = vadd.f32 %v1957_v56, %v6198_v16  ;;  %v6472_v12 = vunpack.c.l.b16 %v727_v57 }
 0x200   : > { %v6460_v0 = vadd.f32 %v1925_v15, %v1842_v18  ;;  %v717_v18 = vor.u32 %v716_v1, %v712_v14  ;;  %v721_v15 = vrot.slane %v719_v5, 1  ;;  %v6477_v16 = vpop.f32.mrf.mxu1  ;;  %v7857_v1 = vld [vmem:[#allocation18_spill] sm:$0xff] }
 0x201   : > { %1996 = vmatmul.bf16.gmra.mxu0 %v7854_v19  ;;  %v1057_v34 = vpack.c.b16 %v6472_v12, %v820_v52  ;;  %v7858_v52 = vunpack.c.l.b16 %v7857_v1 }
 0x202   : > { %v6485_v17 = vsel %vm519_vm0, %v717_v18, %v721_v15 }
 0x203   : > { %2174 = vmatmul.bf16.gmra.mxu2 %v1058_v42  ;;  %2090 = vmatmul.bf16.gmra.mxu1 %v1057_v34  ;;  %v817_v42 = vunpack.c.l.b16 %v6485_v17 }
 0x204   : > { %2228 = vmatmul.bf16.gmra.mxu3 %v7855_v26 }
 0x205   : > { %v1050_v19 = vpack.c.b16 %v817_v42, %v7858_v52 }
 0x206   : > { %v6479_v46 = vpop.f32.mrf.mxu2  ;;  %v1959_v57 = vpop.f32.mrf.mxu0 }
 0x207   : > { %v2189_v56 = vpop.f32.mrf.mxu3  ;;  %v6488_v55 = vadd.f32 %v1959_v57, %v6217_v6  ;;  %v723_v6 = vshrl.u32 %v6399_v25, 16 }
 0x208   : > { %v6482_v33 = vadd.f32 %v2189_v56, %v6336_v36  ;;  %v6491_v5 = vpop.f32.mrf.mxu1 }
 0x209   : > { %7856 = vst [vmem:[#allocation44_spill] sm:$0xff] %v6491_v5  ;;  %v6507_v5 = vor.u32 %v723_v6, %v721_v15 }
 0x20b   : > { %v821_v25 = vunpack.c.l.b16 %v6507_v5 }
 0x20e   : > { %v6495_v26 = vpop.f32.mrf.mxu2  ;;  %v1962_v56 = vpop.f32.mrf.mxu0 }
 0x20f   : > { %v2191_v14 = vpop.f32.mrf.mxu3  ;;  %v6501_v18 = vadd.f32 %v1962_v56, %v6229_v21  ;;  %v819_v21 = vunpack.c.h.b16 %v6485_v17 }
 0x210   : > { %v6498_v36 = vadd.f32 %v2191_v14, %v6342_v39  ;;  %v6505_v34 = vpop.f32.mrf.mxu1 }
 0x211   : > { %2001 = vmatmul.bf16.gmra.mxu0 %v1050_v19  ;;  %7859 = vst [vmem:[#allocation37_spill] sm:$0xff] %v6505_v34  ;;  %v1056_v19 = vpack.c.b16 %v821_v25, %v819_v21 }
 0x214   : > { %2233 = vmatmul.bf16.gmra.mxu3 %v6061_v32  ;;  %v4897_v32 = vld [vmem:[%s7720_s5 + $0x70] sm:$0xff] }
 0x215   : > { %3566 = vmatpush.bf16.msra.mxu2 %v4897_v32 }
 0x216   : > { %v6509_v42 = vpop.f32.mrf.mxu2  ;;  %v1964_v39 = vpop.f32.mrf.mxu0 }
 0x217   : > { %v2194_v57 = vpop.f32.mrf.mxu3  ;;  %7860 = vst [vmem:[#allocation30_spill] sm:$0xff] %v6509_v42  ;;  %v6515_v14 = vadd.f32 %v1964_v39, %v6238_v38  ;;  %v4889_v38 = vld [vmem:[%s7720_s5 + $0x30] sm:$0xff] }
 0x218   : > { %v6512_v1 = vadd.f32 %v2194_v57, %v6353_v28  ;;  %v6522_v15 = vpop.f32.mrf.mxu1  ;;  %3517 = vmatpush.bf16.msra.mxu1 %v4889_v38  ;;  %v7863_v57 = vld [vmem:[#allocation17_spill] sm:$0xff] }
 0x219   : > { %7861 = vst [vmem:[#allocation21_spill] sm:$0xff] %v6522_v15 }
 0x21e   : > { %v1967_v56 = vpop.f32.mrf.mxu0  ;;  %v6527_v6 = vpop.f32.mrf.mxu2 }
 0x21f   : > { %v2196_v52 = vpop.f32.mrf.mxu3  ;;  %7862 = vst [vmem:[#allocation43_spill] sm:$0xff] %v6527_v6  ;;  %v6533_v5 = vadd.f32 %v1967_v56, %v6248_v7 }
 0x220   : > { %v6525_v28 = vadd.f32 %v2196_v52, %v6367_v8  ;;  %v6539_v32 = vpop.f32.mrf.mxu1 }
 0x221   : > { %2006 = vmatmul.bf16.gmra.mxu0 %v1056_v19  ;;  %7864 = vst [vmem:[#allocation32_spill] sm:$0xff] %v6539_v32 }
 0x224   : > { %2238 = vmatmul.bf16.gmra.mxu3 %v7863_v57 }
 0x226   : > { %v1969_v8 = vpop.f32.mrf.mxu0  ;;  %v6544_v6 = vpop.f32.mrf.mxu2 }
 0x227   : > { %v2199_v39 = vpop.f32.mrf.mxu3  ;;  %v6542_v52 = vadd.f32 %v1969_v8, %v6259_v11  ;;  %7865 = vst [vmem:[#allocation42_spill] sm:$0xff] %v6544_v6  ;;  %v418_v11 = vld [vmem:[%s5486_s20 + $0xbc] sm:$0x1]  ;;  %s4213_s20 = sshll.u32 %s5284_s30, 3 }
 0x228   : > { %v6537_v21 = vadd.f32 %v2199_v39, %v6383_v23  ;;  %v6552_v38 = vpop.f32.mrf.mxu1  ;;  %v7867_v23 = vld [vmem:[#allocation19_spill] sm:$0xff]  ;;  %v736_v6 = vunpack.c.l.b16 %v418_v11  ;;  %v4888_v11 = vld [vmem:[%s7720_s5 + $0x28] sm:$0xff]  ;;  %s4508_s22 = sadd.s32 4294967295, %s4213_s20  ;;  %s4955_s20 = sshll.u32 %s5284_s30, 4 }
 0x229   : > { %7866 = vst [vmem:[#allocation20_spill] sm:$0xff] %v6552_v38  ;;  %3518 = vmatpush.bf16.msra.mxu1 %v4888_v11  ;;  %s4090_s14 = sadd.s32 %s4955_s20, %s4803_s13 }
 0x22a   : > { %s4804_s19 = sshll.u32 %s4090_s14, 2 }
 0x22e   : > { %v1972_v19 = vpop.f32.mrf.mxu0  ;;  %v6556_v57 = vpop.f32.mrf.mxu2 }
 0x22f   : > { %v2201_v15 = vpop.f32.mrf.mxu3  ;;  %v6550_v56 = vadd.f32 %v1972_v19, %v6266_v27  ;;  %7868 = vst [vmem:[#allocation33_spill] sm:$0xff] %v6556_v57  ;;  %v4896_v27 = vld [vmem:[%s7720_s5 + $0x68] sm:$0xff] }
 0x230   : > { %v6547_v7 = vadd.f32 %v2201_v15, %v6401_v9  ;;  %3567 = vmatpush.bf16.msra.mxu2 %v4896_v27  ;;  %v6567_v15 = vpop.f32.mrf.mxu1 }
 0x231   : > { %2272 = vmatmul.bf16.vlgmr.msra.gmra.mxu0 %v5744_v47  ;;  %7870 = vst [vmem:[#allocation15_spill] sm:$0xff] %v6567_v15  ;;  %v7871_v47 = vunpack.c.l.b16 %v6452_v48  ;;  %v740_v15 = vshrl.u32 %v6406_v4, 16 }
 0x233   : > { %v6571_v19 = vpack.c.b16 %v736_v6, %v7871_v47  ;;  %v7874_v47 = vld [vmem:[#allocation25_spill] sm:$0xff] }
 0x234   : > { %2243 = vmatmul.bf16.gmra.mxu3 %v7867_v23  ;;  %v742_v23 = vshll.u32 %v6406_v4, 16 }
 0x235   : > { %v747_v6 = vshll.u32 %v6571_v19, 16 }
 0x236   : > { %v1974_v8 = vpop.f32.mrf.mxu0  ;;  %v6577_v57 = vpop.f32.mrf.mxu2  ;;  %v744_v48 = vrot.slane %v742_v23, 1 }
 0x237   : > { %v6559_v39 = vpop.f32.mrf.mxu3  ;;  %v6562_v9 = vadd.f32 %v1974_v8, %v6275_v63  ;;  %7872 = vst [vmem:[#allocation35_spill] sm:$0xff] %v6577_v57  ;;  %v749_v32 = vrot.slane %v747_v6, 1  ;;  %v7880_v6 = vld [vmem:[#allocation26_spill] sm:$0xff] }
 0x238   : > { %v745_v38 = vor.u32 %v744_v48, %v740_v15 }
 0x239   : > { %7869 = vst [vmem:[#allocation45_spill] sm:$0xff] %v6562_v9  ;;  %v6588_v9 = vpop.f32.mrf.mxu1 }
 0x23a   : > { %7875 = vst [vmem:[#allocation23_spill] sm:$0xff] %v6588_v9  ;;  %v750_v23 = vsel %vm519_vm0, %v745_v38, %v749_v32 }
 0x23e   : > { %v1977_v8 = vpop.f32.mrf.mxu0  ;;  %v6592_v42 = vpop.f32.mrf.mxu2 }
 0x23f   : > { %v6579_v63 = vpop.f32.mrf.mxu3  ;;  %v6582_v27 = vadd.f32 %v1977_v8, %v6284_v58  ;;  %7876 = vst [vmem:[#allocation48_spill] sm:$0xff] %v6592_v42  ;;  %v823_v8 = vunpack.c.l.b16 %v750_v23 }
 0x241   : > { %7873 = vst [vmem:[#allocation40_spill] sm:$0xff] %v6582_v27  ;;  %2277 = vmatmul.bf16.gmra.mxu0 %v7874_v47  ;;  %v1053_v34 = vpack.c.b16 %v823_v8, %v821_v25  ;;  %v4895_v25 = vld [vmem:[%s7720_s5 + $0x60] sm:$0xff] }
 0x242   : > { %3568 = vmatpush.bf16.msra.mxu2 %v4895_v25 }
 0x244   : > { %2248 = vmatmul.bf16.gmra.mxu3 %v6485_v17  ;;  %v6600_v17 = vpop.f32.mrf.mxu1 }
 0x245   : > { %7877 = vst [vmem:[#allocation39_spill] sm:$0xff] %v6600_v17 }
 0x246   : > { %v1979_v11 = vpop.f32.mrf.mxu0  ;;  %v6605_v48 = vpop.f32.mrf.mxu2 }
 0x247   : > { %v6590_v57 = vpop.f32.mrf.mxu3  ;;  %v6595_v58 = vadd.f32 %v1979_v11, %v6292_v53  ;;  %7879 = vst [vmem:[#allocation16_spill] sm:$0xff] %v6605_v48  ;;  %v751_v53 = vshrl.u32 %v6571_v19, 16 }
 0x249   : > { %v753_v42 = vor.u32 %v751_v53, %v749_v32 }
 0x24e   : > { %v1982_v47 = vpop.f32.mrf.mxu0  ;;  %v6622_v48 = vpop.f32.mrf.mxu2 }
 0x24f   : > { %v6598_v27 = vpop.f32.mrf.mxu3  ;;  %v6603_v15 = vadd.f32 %v1982_v47, %v6302_v49  ;;  %v6617_v49 = vpop.f32.mrf.mxu1  ;;  %v825_v47 = vunpack.c.h.b16 %v750_v23  ;;  %7883 = vst [vmem:[#allocation17_spill] sm:$0xff] %v6622_v48 }
 0x250   : > { %7882 = vst [vmem:[#allocation18_spill] sm:$0xff] %v6617_v49 }
 0x251   : > { %7878 = vst [vmem:[#allocation49_spill] sm:$0xff] %v6603_v15  ;;  %2282 = vmatmul.bf16.gmra.mxu0 %v7880_v6  ;;  %v827_v6 = vunpack.c.l.b16 %v753_v42 }
 0x253   : > { %v1059_v17 = vpack.c.b16 %v827_v6, %v825_v47 }
 0x254   : > { %2253 = vmatmul.bf16.gmra.mxu3 %v1053_v34  ;;  %v4887_v34 = vld [vmem:[%s7720_s5 + $0x20] sm:$0xff] }
 0x255   : > { %3519 = vmatpush.bf16.msra.mxu1 %v4887_v34  ;;  %v4906_v34 = vld [vmem:[%s7720_s5 + $0xb8] sm:$0xff] }
 0x256   : > { %v1984_v38 = vpop.f32.mrf.mxu0  ;;  %3614 = vmatpush.bf16.msra.mxu3 %v4906_v34 }
 0x257   : > { %v6609_v11 = vpop.f32.mrf.mxu3  ;;  %v6615_v8 = vadd.f32 %v1984_v38, %v6310_v22  ;;  %v6630_v22 = vpop.f32.mrf.mxu1 }
 0x258   : > { %7885 = vst [vmem:[#allocation25_spill] sm:$0xff] %v6630_v22  ;;  %v6632_v38 = vpop.f32.mrf.mxu2 }
 0x259   : > { %7881 = vst [vmem:[#allocation46_spill] sm:$0xff] %v6615_v8 }
 0x25a   : > { %7886 = vst [vmem:[#allocation26_spill] sm:$0xff] %v6632_v38 }
 0x25e   : > { %v1987_v53 = vpop.f32.mrf.mxu0 }
 0x25f   : > { %v6624_v32 = vpop.f32.mrf.mxu3  ;;  %v6627_v9 = vadd.f32 %v1987_v53, %v6317_v2  ;;  %v6642_v2 = vpop.f32.mrf.mxu1  ;;  %v7891_v53 = vld [vmem:[#allocation28_spill] sm:$0xff] }
 0x260   : > { %7888 = vst [vmem:[#allocation51_spill] sm:$0xff] %v6642_v2 }
 0x261   : > { %7884 = vst [vmem:[#allocation19_spill] sm:$0xff] %v6627_v9  ;;  %2287 = vmatmul.bf16.gmra.mxu0 %v5844_v37 }
 0x264   : > { %2258 = vmatmul.bf16.gmra.mxu3 %v1059_v17  ;;  %v6646_v17 = vpop.f32.mrf.mxu2 }
 0x265   : > { %7889 = vst [vmem:[#allocation52_spill] sm:$0xff] %v6646_v17 }
 0x266   : > { %v1989_v42 = vpop.f32.mrf.mxu0 }
 0x267   : > { %v6634_v25 = vpop.f32.mrf.mxu3  ;;  %v6637_v23 = vadd.f32 %v1989_v42, %v6329_v20  ;;  %v4894_v20 = vld [vmem:[%s7720_s5 + $0x58] sm:$0xff]  ;;  %v6657_v38 = vpop.f32.mrf.mxu1 }
 0x268   : > { %3569 = vmatpush.bf16.msra.mxu2 %v4894_v20  ;;  %7892 = vst [vmem:[#allocation28_spill] sm:$0xff] %v6657_v38 }
 0x269   : > { %7887 = vst [vmem:[#allocation50_spill] sm:$0xff] %v6637_v23 }
 0x26e   : > { %v1992_v37 = vpop.f32.mrf.mxu0 }
 0x26f   : > { %v6644_v47 = vpop.f32.mrf.mxu3  ;;  %v6649_v6 = vadd.f32 %v1992_v37, %v6339_v10  ;;  %v4886_v10 = vld [vmem:[%s7720_s5 + $0x18] sm:$0xff]  ;;  %v6665_v37 = vpop.f32.mrf.mxu2 }
 0x270   : > { %7894 = vst [vmem:[#allocation55_spill] sm:$0xff] %v6665_v37  ;;  %3520 = vmatpush.bf16.msra.mxu1 %v4886_v10  ;;  %v6672_v20 = vpop.f32.mrf.mxu1  ;;  %v4905_v37 = vld [vmem:[%s7720_s5 + $0xb0] sm:$0xff] }
 0x271   : > { %7890 = vst [vmem:[#allocation53_spill] sm:$0xff] %v6649_v6  ;;  %2292 = vmatmul.bf16.gmra.mxu0 %v7891_v53  ;;  %v7897_v6 = vld [vmem:[#allocation31_spill] sm:$0xff]  ;;  %3615 = vmatpush.bf16.msra.mxu3 %v4905_v37 }
 0x272   : > { %7896 = vst [vmem:[#allocation57_spill] sm:$0xff] %v6672_v20 }
 0x276   : > { %v1994_v34 = vpop.f32.mrf.mxu0 }
 0x277   : > { %v6655_v42 = vpop.f32.mrf.mxu3  ;;  %v6660_v2 = vadd.f32 %v1994_v34, %v6345_v61  ;;  %v6675_v38 = vpop.f32.mrf.mxu2 }
 0x278   : > { %7898 = vst [vmem:[#allocation31_spill] sm:$0xff] %v6675_v38 }
 0x279   : > { %7893 = vst [vmem:[#allocation54_spill] sm:$0xff] %v6660_v2  ;;  %v2086_v2 = vpop.f32.mrf.mxu1 }
 0x27e   : > { %v1997_v17 = vpop.f32.mrf.mxu0 }
 0x27f   : > { %v6667_v53 = vpop.f32.mrf.mxu3  ;;  %v6670_v22 = vadd.f32 %v1997_v17, %v6360_v59  ;;  %v2170_v59 = vpop.f32.mrf.mxu2 }
 0x281   : > { %7895 = vst [vmem:[#allocation56_spill] sm:$0xff] %v6670_v22  ;;  %2297 = vmatmul.bf16.gmra.mxu0 %v7897_v6  ;;  %v6691_v48 = vpop.f32.mrf.mxu1 }
 0x282   : > { %7900 = vst [vmem:[#allocation59_spill] sm:$0xff] %v6691_v48 }
 0x286   : > { %v1999_v34 = vpop.f32.mrf.mxu0 }
 0x287   : > { %v6677_v61 = vpop.f32.mrf.mxu3  ;;  %v6683_v10 = vadd.f32 %v1999_v34, %v6376_v60  ;;  %v6695_v60 = vpop.f32.mrf.mxu2  ;;  %v4904_v34 = vld [vmem:[%s7720_s5 + $0xa8] sm:$0xff] }
 0x288   : > { %7902 = vst [vmem:[#allocation61_spill] sm:$0xff] %v6695_v60  ;;  %3616 = vmatpush.bf16.msra.mxu3 %v4904_v34  ;;  %v4883_v60 = vld [vmem:[%s7720_s5] sm:$0xff] }
 0x289   : > { %7899 = vst [vmem:[#allocation58_spill] sm:$0xff] %v6683_v10 }
 0x28e   : > { %v2002_v20 = vpop.f32.mrf.mxu0 }
 0x28f   : > { %v6685_v17 = vpop.f32.mrf.mxu3  ;;  %v2003_v6 = vadd.f32 %v2002_v20, %v6391_v35  ;;  %v4885_v35 = vld [vmem:[%s7720_s5 + $0x10] sm:$0xff]  ;;  %v4884_v20 = vld [vmem:[%s7720_s5 + $0x8] sm:$0xff] }
 0x290   : > { %3521 = vmatpush.bf16.msra.mxu1 %v4885_v35  ;;  %v4902_v35 = vld [vmem:[%s7720_s5 + $0x98] sm:$0xff] }
 0x291   : > { %v2087_v22 = vadd.f32 %v2086_v2, %v2003_v6  ;;  %2302 = vmatmul.bf16.gmra.mxu0 %v5942_v54  ;;  %v4893_v54 = vld [vmem:[%s7720_s5 + $0x50] sm:$0xff]  ;;  %v2091_v2 = vpop.f32.mrf.mxu1  ;;  %v2175_v6 = vpop.f32.mrf.mxu2 }
 0x292   : > { %3570 = vmatpush.bf16.msra.mxu2 %v4893_v54  ;;  %v7905_v54 = vld [vmem:[#allocation41_spill] sm:$0xff] }
 0x293   : > { %v6689_v38 = vadd.f32 %v2170_v59, %v2087_v22 }
 0x294   : > { %3522 = vmatpush.bf16.msra.mxu1 %v4884_v20  ;;  %v2457_v20 = vlaneseq }
 0x296   : > { %v2004_v23 = vpop.f32.mrf.mxu0 }
 0x297   : > { %v6693_v49 = vpop.f32.mrf.mxu3  ;;  %v6698_v37 = vadd.f32 %v2004_v23, %v6416_v40  ;;  %v4903_v40 = vld [vmem:[%s7720_s5 + $0xa0] sm:$0xff] }
 0x298   : > { %7901 = vst [vmem:[#allocation60_spill] sm:$0xff] %v6693_v49  ;;  %3617 = vmatpush.bf16.msra.mxu3 %v4903_v40  ;;  %3523 = vmatpush.bf16.msra.mxu1 %v4883_v60  ;;  %v4901_v40 = vld [vmem:[%s7720_s5 + $0x90] sm:$0xff]  ;;  %v4892_v60 = vld [vmem:[%s7720_s5 + $0x48] sm:$0xff] }
 0x299   : > { %7903 = vst [vmem:[#allocation62_spill] sm:$0xff] %v6698_v37  ;;  %3571 = vmatpush.bf16.msra.mxu2 %v4892_v60  ;;  %v7909_v37 = vld [vmem:[#allocation47_spill] sm:$0xff] }
 0x29c   : > { %3618 = vmatpush.bf16.msra.mxu3 %v4902_v35 }
 0x29e   : > { %v2007_v23 = vpop.f32.mrf.mxu0 }
 0x29f   : > { %v6709_v22 = vpop.f32.mrf.mxu3  ;;  %v2008_v59 = vadd.f32 %v2007_v23, %v6438_v43 }
 0x2a0   : > { %7904 = vst [vmem:[#allocation63_spill] sm:$0xff] %v6709_v22  ;;  %3619 = vmatpush.bf16.msra.mxu3 %v4901_v40 }
 0x2a1   : > { %v2092_v34 = vadd.f32 %v2091_v2, %v2008_v59  ;;  %2307 = vmatmul.bf16.gmra.mxu0 %v7905_v54  ;;  %v4900_v59 = vld [vmem:[%s7720_s5 + $0x88] sm:$0xff]  ;;  %v4899_v54 = vld [vmem:[%s7720_s5 + $0x80] sm:$0xff] }
 0x2a3   : > { %v6725_v48 = vadd.f32 %v2175_v6, %v2092_v34  ;;  %v2458_v34 = vshrl.u32 %v2457_v20, 7  ;;  %v4891_v20 = vld [vmem:[%s7720_s5 + $0x40] sm:$0xff] }
 0x2a4   : > { %3620 = vmatpush.bf16.msra.mxu3 %v4900_v59  ;;  %v6758_v59 = vstv %s4508_s22  ;;  %3572 = vmatpush.bf16.msra.mxu2 %v4891_v20  ;;  %s4092_s22 = scalar_lea.hbm %s7988_s18, %s4804_s19 }
 0x2a5   : > { %vm2464_vm2 = vcmp.ge.s32.totalorder %v6758_v59, 0  ;;  %vm2474_vm3 = vcmp.lt.s32.totalorder %v6758_v59, 16  ;;  %v2460_v20 = vadd.s32 16, %v2458_v34  ;;  %s4095_s27 = sshll.u32 %s4092_s22, 4  ;;  %s4096_s27 = int_to_ptr.hbm [resolvable:$true] %s4095_s27 }
 0x2a6   : > { %v2009_v23 = vpop.f32.mrf.mxu0  ;;  %vm6770_vm4 = vmand %vm2464_vm2, %vm2474_vm3  ;;  %s5216_s29 = sshra.s32 %s4096_s27, 4  ;;  %s5217_s29 = int_to_ptr.hbm [resolvable:$true] %s5216_s29 }
 0x2a7   : > { %v6727_v43 = vpop.f32.mrf.mxu3  ;;  %v6733_v2 = vadd.f32 %v2009_v23, %v6460_v0  ;;  %v6747_v0 = vld [vmem:[%s7718_s3] ss:$0 sm:$0xff]  ;;  %v6786_v8 = vadd.s32 4294967295, %v2460_v20  ;;  %v2448_v20 = vadd.s32 1, %v6758_v59  ;;  %p5223_p8 = scmp.lt.s32.totalorder %s5217_s29, %s7988_s18 }
 0x2a8   : > { %7906 = vst [vmem:[#allocation41_spill] sm:$0xff] %v6727_v43  ;;  %v6756_v23 = vld [vmem:[%s7719_s4] ss:$0 sm:$0xff]  ;;  %3621 = vmatpush.bf16.msra.mxu3 %v4899_v54 }
 0x2a9   : > { %7907 = vst [vmem:[#allocation64_spill] sm:$0xff] %v6733_v2  ;;  %v6764_v2 = vadd.s32 4294967295, %v2458_v34  ;;  %vm2529_vm7 = vcmp.lt.s32.totalorder %v6786_v8, 16  ;;  %vm2465_vm9 = vcmp.ge.s32.totalorder %v2448_v20, 0  ;;  %vm2475_vm10 = vcmp.lt.s32.totalorder %v2448_v20, 16  ;;  %v4950_v8 = vld [vmem:[%s7720_s5 + $0x218] sm:$0xff] }
 0x2aa   : > { %vm2532_vm8 = vmand %vm6770_vm4, %vm2529_vm7 }
 0x2ab   : > { %vm2494_vm5 = vcmp.ge.s32.totalorder %v6764_v2, 0  ;;  %vm6805_vm11 = vmand %vm2465_vm9, %vm2475_vm10 }
 0x2ac   : > { %vm2497_vm6 = vmand %vm6770_vm4, %vm2494_vm5 }
 0x2ad   : > { %vm2500_vm12 = vmand %vm6805_vm11, %vm2494_vm5 }
 0x2ae   : > { %v2273_v35 = vpop.f32.mrf.mxu0  ;;  %vm2535_vm13 = vmand %vm6805_vm11, %vm2529_vm7 }
 0x2af   : > { %v6742_v6 = vpop.f32.mrf.mxu3  ;;  %v2274_v40 = vadd.f32 %v2273_v35, %v6482_v33 }
 0x2b0   : > { %7908 = vst [vmem:[#allocation65_spill] sm:$0xff] %v6742_v6 }
 0x2b1   : > { %v2352_v60 = vmul.f32 %v6747_v0, %v2274_v40  ;;  %2312 = vmatmul.bf16.gmra.mxu0 %v7909_v37 }
 0x2b3   : > { %v2386_v33 = vadd.f32 %v6756_v23, %v2352_v60 }
 0x2b5   : > { %v2416_v10 = vmax.f32 %v2386_v33, 0.0 }
 0x2b6   : > { %v2275_v40 = vpop.f32.mrf.mxu0 }
 0x2b7   : > { %v6775_v54 = vpop.f32.mrf.mxu3  ;;  %v2276_v6 = vadd.f32 %v2275_v40, %v6498_v36  ;;  %v2620_v60 = vsel %vm2497_vm6, %v2416_v10, 0.0 }
 0x2b8   : > { %7912 = vst [vmem:[#allocation47_spill] sm:$0xff] %v6775_v54  ;;  %v2650_v54 = vpack.c.bf16 %v2620_v60, %v2620_v60 }
 0x2b9   : > { %v2353_v37 = vmul.f32 %v6747_v0, %v2276_v6 }
 0x2ba   : > { %v2696_v10 = vunpack.c.l.b16 %v2650_v54 }
 0x2bb   : > { %v2387_v43 = vadd.f32 %v6756_v23, %v2353_v37 }
 0x2bd   : > { %v2417_v9 = vmax.f32 %v2387_v43, 0.0 }
 0x2be   : > { %v2278_v33 = vpop.f32.mrf.mxu0 }
 0x2bf   : > { %v6784_v22 = vpop.f32.mrf.mxu3  ;;  %v2621_v36 = vsel %vm6770_vm4, %v2417_v9, 0.0  ;;  %v2279_v40 = vadd.f32 %v2278_v33, %v6512_v1 }
 0x2c0   : > { %7913 = vst [vmem:[#allocation66_spill] sm:$0xff] %v6784_v22  ;;  %v2651_v49 = vpack.c.bf16 %v2621_v36, %v2621_v36 }
 0x2c1   : > { %v2354_v15 = vmul.f32 %v6747_v0, %v2279_v40  ;;  %2317 = vmatmul.bf16.gmra.mxu0 %v6067_v24 }
 0x2c2   : > { %v2697_v43 = vunpack.c.l.b16 %v2651_v49 }
 0x2c3   : > { %v2388_v6 = vadd.f32 %v6756_v23, %v2354_v15 }
 0x2c4   : > { %v2712_v34 = vpack.c.b16 %v2697_v43, %v2696_v10 }
 0x2c5   : > { %v2418_v9 = vmax.f32 %v2388_v6, 0.0 }
 0x2c6   : > { %v2280_v1 = vpop.f32.mrf.mxu0  ;;  %3524 = vmatmul.bf16.vlgmr.msra.gmra.mxu1 %v2712_v34  ;;  %v2755_v49 = vshll.u32 %v2712_v34, 16 }
 0x2c7   : > { %v6799_v37 = vpop.f32.mrf.mxu3  ;;  %v2622_v60 = vsel %vm2532_vm8, %v2418_v9, 0.0  ;;  %v2281_v24 = vadd.f32 %v2280_v1, %v6525_v28  ;;  %v2856_v28 = vrot.slane %v2712_v34, 1 }
 0x2c8   : > { %7914 = vst [vmem:[#allocation67_spill] sm:$0xff] %v6799_v37  ;;  %v2652_v54 = vpack.c.bf16 %v2622_v60, %v2622_v60  ;;  %v2757_v40 = vrot.slane %v2755_v49, 1  ;;  %v2753_v60 = vshrl.u32 %v2712_v34, 16 }
 0x2c9   : > { %v2355_v15 = vmul.f32 %v6747_v0, %v2281_v24 }
 0x2ca   : > { %v2736_v33 = vunpack.c.l.b16 %v2652_v54  ;;  %v2758_v54 = vor.u32 %v2757_v40, %v2753_v60  ;;  %v2037_v40 = vadd.f32 %v6355_v50, %v6420_v29 }
 0x2cb   : > { %v2389_v35 = vadd.f32 %v6756_v23, %v2355_v15 }
 0x2cc   : > { %v2744_v36 = vpack.c.b16 %v2736_v33, %v2736_v33  ;;  %v7918_v33 = vld [vmem:[#allocation22_spill] sm:$0xff] }
 0x2cd   : > { %v2419_v37 = vmax.f32 %v2389_v35, 0.0 }
 0x2ce   : > { %v2760_v6 = vshll.u32 %v2744_v36, 16  ;;  %v2283_v9 = vpop.f32.mrf.mxu0  ;;  %v2857_v1 = vrot.slane %v2744_v36, 1 }
 0x2cf   : > { %v6809_v43 = vpop.f32.mrf.mxu3  ;;  %v2284_v24 = vadd.f32 %v2283_v9, %v6537_v21  ;;  %v2623_v34 = vsel %vm2500_vm12, %v2419_v37, 0.0 }
 0x2d0   : > { %7917 = vst [vmem:[#allocation68_spill] sm:$0xff] %v6809_v43  ;;  %v2858_v20 = vsel %vm670_vm1, %v2856_v28, %v2857_v1  ;;  %v2762_v49 = vrot.slane %v2760_v6, 1  ;;  %v2653_v43 = vpack.c.bf16 %v2623_v34, %v2623_v34 }
 0x2d1   : > { %v2356_v15 = vmul.f32 %v6747_v0, %v2284_v24  ;;  %2322 = vmatmul.bf16.gmra.mxu0 %v7918_v33  ;;  %3622 = vmatmul.bf16.vlgmr.msra.gmra.mxu3 %v2858_v20 }
 0x2d2   : > { %v2763_v36 = vsel %vm519_vm0, %v2758_v54, %v2762_v49  ;;  %v2698_v24 = vunpack.c.l.b16 %v2653_v43  ;;  %v2121_v54 = vadd.f32 %v6357_v45, %v2037_v40  ;;  %v2449_v43 = vadd.s32 2, %v6758_v59 }
 0x2d3   : > { %v2390_v35 = vadd.f32 %v6756_v23, %v2356_v15  ;;  %3573 = vmatmul.bf16.vlgmr.msra.gmra.mxu2 %v2763_v36  ;;  %v2039_v45 = vadd.f32 %v6369_v41, %v6441_v3 }
 0x2d4   : > { %v2205_v50 = vadd.f32 %v6559_v39, %v2121_v54  ;;  %v6851_v39 = vld [vmem:[%s7720_s5 + $0x1b8] sm:$0xff]  ;;  %vm2466_vm14 = vcmp.ge.s32.totalorder %v2449_v43, 0  ;;  %vm2476_vm15 = vcmp.lt.s32.totalorder %v2449_v43, 16 }
 0x2d5   : > { %v2420_v21 = vmax.f32 %v2390_v35, 0.0  ;;  %3810 = vmatpush.bf16.msrb.mxu0 %v6851_v39  ;;  %vm6857_vm2 = vmand %vm2466_vm14, %vm2476_vm15 }
 0x2d6   : > { %v2285_v28 = vpop.f32.mrf.mxu0  ;;  %vm2503_vm3 = vmand %vm6857_vm2, %vm2494_vm5 }
 0x2d7   : > { %v2254_v9 = vpop.f32.mrf.mxu3  ;;  %v2624_v6 = vsel %vm6805_vm11, %v2420_v21, 0.0  ;;  %v2286_v1 = vadd.f32 %v2285_v28, %v6547_v7  ;;  %v7919_v21 = vld [vmem:[#allocation24_spill] sm:$0xff]  ;;  %v2123_v28 = vadd.f32 %v6373_v13, %v2039_v45  ;;  %vm2538_vm4 = vmand %vm6857_vm2, %vm2529_vm7 }
 0x2d8   : > { %v6822_v22 = vadd.f32 %v2254_v9, %v6689_v38  ;;  %v2654_v60 = vpack.c.bf16 %v2624_v6, %v2624_v6 }
 0x2d9   : > { %v2357_v37 = vmul.f32 %v6747_v0, %v2286_v1  ;;  %v2207_v6 = vadd.f32 %v6579_v63, %v2123_v28  ;;  %v7923_v1 = vld [vmem:[#allocation29_spill] sm:$0xff] }
 0x2da   : > { %v2699_v20 = vunpack.c.l.b16 %v2654_v60 }
 0x2db   : > { %v2391_v49 = vadd.f32 %v6756_v23, %v2357_v37 }
 0x2dc   : > { %v6832_v38 = vpack.c.b16 %v2699_v20, %v2698_v24  ;;  %v6865_v24 = vld [vmem:[%s7720_s5 + $0x1b0] sm:$0xff] }
 0x2dd   : > { %v2421_v29 = vmax.f32 %v2391_v49, 0.0  ;;  %3811 = vmatpush.bf16.msrb.mxu0 %v6865_v24 }
 0x2de   : > { %v2288_v15 = vpop.f32.mrf.mxu0  ;;  %3529 = vmatmul.bf16.gmra.mxu1 %v6832_v38  ;;  %v2767_v35 = vshll.u32 %v6832_v38, 16  ;;  %v2859_v37 = vrot.slane %v6832_v38, 1  ;;  %v2765_v49 = vshrl.u32 %v6832_v38, 16 }
 0x2df   : > { %v6839_v7 = vpop.f32.mrf.mxu3  ;;  %v2625_v33 = vsel %vm2535_vm13, %v2421_v29, 0.0  ;;  %v2289_v36 = vadd.f32 %v2288_v15, %v2205_v50  ;;  %v2042_v50 = vadd.f32 %v6385_v51, %v6466_v31  ;;  %v6886_v51 = vld [vmem:[%s7720_s5 + $0x1a8] sm:$0xff] }
 0x2e0   : > { %v2655_v34 = vpack.c.bf16 %v2625_v33, %v2625_v33  ;;  %v2769_v40 = vrot.slane %v2767_v35, 1 }
 0x2e1   : > { %v2358_v10 = vmul.f32 %v6747_v0, %v2289_v36  ;;  %2327 = vmatmul.bf16.gmra.mxu0 %v7919_v21  ;;  %v2126_v36 = vadd.f32 %v6389_v30, %v2042_v50  ;;  %v2044_v30 = vadd.f32 %v6403_v62, %v6488_v55 }
 0x2e2   : > { %v2737_v9 = vunpack.c.l.b16 %v2655_v34  ;;  %v2770_v43 = vor.u32 %v2769_v40, %v2765_v49  ;;  %3812 = vmatpush.bf16.msrb.mxu0 %v6886_v51  ;;  %v7922_v49 = vld [vmem:[#allocation34_spill] sm:$0xff] }
 0x2e3   : > { %v2392_v41 = vadd.f32 %v6756_v23, %v2358_v10  ;;  %v2210_v10 = vadd.f32 %v6590_v57, %v2126_v36  ;;  %v4922_v57 = vld [vmem:[%s7720_s5 + $0x138] sm:$0xff]  ;;  %v2047_v36 = vadd.f32 %v7923_v1, %v6501_v18 }
 0x2e4   : > { %v2745_v3 = vpack.c.b16 %v2737_v9, %v2737_v9  ;;  %v6899_v9 = vld [vmem:[%s7720_s5 + $0x1a0] sm:$0xff]  ;;  %3712 = vmatpush.bf16.msrb.mxu2 %v4922_v57  ;;  %v4914_v18 = vld [vmem:[%s7720_s5 + $0xf8] sm:$0xff] }
 0x2e5   : > { %v2422_v29 = vmax.f32 %v2392_v41, 0.0  ;;  %3663 = vmatpush.bf16.msrb.mxu1 %v4914_v18  ;;  %v4921_v18 = vld [vmem:[%s7720_s5 + $0x130] sm:$0xff] }
 0x2e6   : > { %v2290_v20 = vpop.f32.mrf.mxu0  ;;  %v2860_v54 = vrot.slane %v2745_v3, 1  ;;  %v2772_v63 = vshll.u32 %v2745_v3, 16  ;;  %3813 = vmatpush.bf16.msrb.mxu0 %v6899_v9 }
 0x2e7   : > { %v2259_v60 = vpop.f32.mrf.mxu3  ;;  %v2291_v15 = vadd.f32 %v2290_v20, %v2207_v6  ;;  %v2626_v34 = vsel %vm2503_vm3, %v2422_v29, 0.0  ;;  %v754_v20 = vrot.slane %v6406_v4, 1  ;;  %v6931_v4 = vld [vmem:[%s7720_s5 + $0x190] sm:$0xff] }
 0x2e8   : > { %v6868_v13 = vadd.f32 %v2259_v60, %v6725_v48  ;;  %v6879_v48 = vsel %vm670_vm1, %v2859_v37, %v2860_v54  ;;  %v2774_v45 = vrot.slane %v2772_v63, 1  ;;  %v2656_v28 = vpack.c.bf16 %v2626_v34, %v2626_v34  ;;  %v6914_v37 = vld [vmem:[%s7720_s5 + $0x198] sm:$0xff]  ;;  %3713 = vmatpush.bf16.msrb.mxu2 %v4921_v18 }
 0x2e9   : > { %v2359_v33 = vmul.f32 %v6747_v0, %v2291_v15  ;;  %3627 = vmatmul.bf16.gmra.mxu3 %v6879_v48  ;;  %v755_v54 = vrot.slane %v6571_v19, 1  ;;  %v2128_v63 = vadd.f32 %v7922_v49, %v2044_v30  ;;  %v6966_v49 = vld [vmem:[%s7720_s5 + $0x180] sm:$0xff] }
 0x2ea   : > { %v6889_v31 = vsel %vm519_vm0, %v2770_v43, %v2774_v45  ;;  %v2700_v62 = vunpack.c.l.b16 %v2656_v28  ;;  %3814 = vmatpush.bf16.msrb.mxu0 %v6914_v37  ;;  %v2450_v45 = vadd.s32 3, %v6758_v59 }
 0x2eb   : > { %v2393_v35 = vadd.f32 %v6756_v23, %v2359_v33  ;;  %3578 = vmatmul.bf16.gmra.mxu2 %v6889_v31  ;;  %v6938_v33 = vsel %vm670_vm1, %v754_v20, %v755_v54 }
 0x2ec   : > { %v824_v28 = vunpack.c.l.b16 %v6938_v33  ;;  %vm2467_vm6 = vcmp.ge.s32.totalorder %v2450_v45, 0  ;;  %vm2477_vm8 = vcmp.lt.s32.totalorder %v2450_v45, 16 }
 0x2ed   : > { %v2423_v21 = vmax.f32 %v2393_v35, 0.0  ;;  %vm6958_vm9 = vmand %vm2467_vm6, %vm2477_vm8 }
 0x2ee   : > { %v2293_v41 = vpop.f32.mrf.mxu0  ;;  %3815 = vmatpush.bf16.msrb.mxu0 %v6931_v4  ;;  %v1054_v20 = vpack.c.b16 %v824_v28, %v6472_v12  ;;  %vm2506_vm10 = vmand %vm6958_vm9, %vm2494_vm5 }
 0x2ef   : > { %v2627_v3 = vsel %vm6857_vm2, %v2423_v21, 0.0  ;;  %v2294_v40 = vadd.f32 %v2293_v41, %v2210_v10  ;;  %v6949_v41 = vld [vmem:[%s7720_s5 + $0x188] sm:$0xff]  ;;  %vm2541_vm11 = vmand %vm6958_vm9, %vm2529_vm7 }
 0x2f0   : > { %v2657_v6 = vpack.c.bf16 %v2627_v3, %v2627_v3  ;;  %v7924_v3 = vld [vmem:[#allocation38_spill] sm:$0xff] }
 0x2f1   : > { %v2360_v60 = vmul.f32 %v6747_v0, %v2294_v40  ;;  %2332 = vmatmul.bf16.gmra.mxu0 %v6423_v44  ;;  %v2212_v44 = vadd.f32 %v6598_v27, %v2128_v63  ;;  %v2131_v40 = vadd.f32 %v7924_v3, %v2047_v36 }
 0x2f2   : > { %v2701_v55 = vunpack.c.l.b16 %v2657_v6  ;;  %3816 = vmatpush.bf16.msrb.mxu0 %v6949_v41 }
 0x2f3   : > { %v2394_v50 = vadd.f32 %v6756_v23, %v2360_v60 }
 0x2f4   : > { %v6921_v29 = vpack.c.b16 %v2701_v55, %v2700_v62  ;;  %v2215_v62 = vadd.f32 %v6609_v11, %v2131_v40  ;;  %v7927_v11 = vld [vmem:[#allocation36_spill] sm:$0xff] }
 0x2f5   : > { %v2424_v15 = vmax.f32 %v2394_v50, 0.0  ;;  %v2049_v45 = vadd.f32 %v7927_v11, %v6515_v14  ;;  %v4913_v11 = vld [vmem:[%s7720_s5 + $0xf0] sm:$0xff] }
 0x2f6   : > { %v2295_v43 = vpop.f32.mrf.mxu0  ;;  %3534 = vmatmul.bf16.gmra.mxu1 %v6921_v29  ;;  %v2779_v10 = vshll.u32 %v6921_v29, 16  ;;  %v2862_v50 = vrot.slane %v6921_v29, 1  ;;  %3817 = vmatpush.bf16.msrb.mxu0 %v6966_v49 }
 0x2f7   : > { %v2628_v27 = vsel %vm2538_vm4, %v2424_v15, 0.0  ;;  %v2296_v34 = vadd.f32 %v2295_v43, %v2212_v44  ;;  %v2777_v15 = vshrl.u32 %v6921_v29, 16  ;;  %3664 = vmatpush.bf16.msrb.mxu1 %v4913_v11 }
 0x2f8   : > { %v2658_v35 = vpack.c.bf16 %v2628_v27, %v2628_v27  ;;  %v2781_v60 = vrot.slane %v2779_v10, 1  ;;  %v7928_v10 = vld [vmem:[#allocation27_spill] sm:$0xff] }
 0x2f9   : > { %v2361_v21 = vmul.f32 %v6747_v0, %v2296_v34 }
 0x2fa   : > { %v2738_v30 = vunpack.c.l.b16 %v2658_v35  ;;  %v2782_v27 = vor.u32 %v2781_v60, %v2777_v15  ;;  %v2052_v60 = vadd.f32 %v6477_v16, %v6533_v5  ;;  %v828_v15 = vunpack.c.l.b16 %v755_v54 }
 0x2fb   : > { %v2395_v6 = vadd.f32 %v6756_v23, %v2361_v21  ;;  %v2133_v21 = vadd.f32 %v7928_v10, %v2049_v45 }
 0x2fc   : > { %v2746_v57 = vpack.c.b16 %v2738_v30, %v2738_v30  ;;  %v2136_v16 = vadd.f32 %v6479_v46, %v2052_v60  ;;  %v7929_v46 = vld [vmem:[#allocation44_spill] sm:$0xff] }
 0x2fd   : > { %v2425_v1 = vmax.f32 %v2395_v6, 0.0  ;;  %v2217_v3 = vadd.f32 %v6624_v32, %v2133_v21 }
 0x2fe   : > { %v2298_v63 = vpop.f32.mrf.mxu0  ;;  %v2863_v44 = vrot.slane %v2746_v57, 1  ;;  %v2784_v43 = vshll.u32 %v2746_v57, 16  ;;  %v2220_v19 = vadd.f32 %v6634_v25, %v2136_v16 }
 0x2ff   : > { %v2299_v36 = vadd.f32 %v2298_v63, %v2215_v62  ;;  %v2629_v28 = vsel %vm2506_vm10, %v2425_v1, 0.0 }
 0x300   : > { %v6978_v12 = vsel %vm670_vm1, %v2862_v50, %v2863_v44  ;;  %v2786_v34 = vrot.slane %v2784_v43, 1  ;;  %v2659_v6 = vpack.c.bf16 %v2629_v28, %v2629_v28  ;;  %v826_v44 = vunpack.c.h.b16 %v6938_v33  ;;  %v4920_v28 = vld [vmem:[%s7720_s5 + $0x128] sm:$0xff] }
 0x301   : > { %v2362_v35 = vmul.f32 %v6747_v0, %v2299_v36  ;;  %2337 = vmatmul.bf16.gmra.mxu0 %v1054_v20  ;;  %3632 = vmatmul.bf16.gmra.mxu3 %v6978_v12  ;;  %v2451_v36 = vadd.s32 4, %v6758_v59 }
 0x302   : > { %v6983_v14 = vsel %vm519_vm0, %v2782_v27, %v2786_v34  ;;  %v2702_v32 = vunpack.c.l.b16 %v2659_v6  ;;  %v1060_v33 = vpack.c.b16 %v828_v15, %v826_v44  ;;  %v2054_v27 = vadd.f32 %v7929_v46, %v6542_v52  ;;  %3714 = vmatpush.bf16.msrb.mxu2 %v4920_v28  ;;  %v4919_v28 = vld [vmem:[%s7720_s5 + $0x120] sm:$0xff] }
 0x303   : > { %v2396_v30 = vadd.f32 %v6756_v23, %v2362_v35  ;;  %3583 = vmatmul.bf16.gmra.mxu2 %v6983_v14  ;;  %vm2468_vm12 = vcmp.ge.s32.totalorder %v2451_v36, 0  ;;  %vm2478_vm13 = vcmp.lt.s32.totalorder %v2451_v36, 16 }
 0x304   : > { %vm7024_vm14 = vmand %vm2468_vm12, %vm2478_vm13 }
 0x305   : > { %v2426_v40 = vmax.f32 %v2396_v30, 0.0  ;;  %v2138_v30 = vadd.f32 %v6495_v26, %v2054_v27  ;;  %v7932_v26 = vld [vmem:[#allocation37_spill] sm:$0xff]  ;;  %vm2509_vm15 = vmand %vm7024_vm14, %vm2494_vm5 }
 0x306   : > { %v2300_v57 = vpop.f32.mrf.mxu0  ;;  %3715 = vmatpush.bf16.msrb.mxu2 %v4919_v28  ;;  %vm2544_vm2 = vmand %vm7024_vm14, %vm2529_vm7 }
 0x307   : > { %v2630_v62 = vsel %vm6958_vm9, %v2426_v40, 0.0  ;;  %v2301_v20 = vadd.f32 %v2300_v57, %v2217_v3  ;;  %v2222_v40 = vadd.f32 %v6644_v47, %v2138_v30 }
 0x308   : > { %v2660_v63 = vpack.c.bf16 %v2630_v62, %v2630_v62 }
 0x309   : > { %v2363_v50 = vmul.f32 %v6747_v0, %v2301_v20 }
 0x30a   : > { %v2703_v43 = vunpack.c.l.b16 %v2660_v63 }
 0x30b   : > { %v2397_v5 = vadd.f32 %v6756_v23, %v2363_v50  ;;  %v2057_v50 = vadd.f32 %v7932_v26, %v6550_v56  ;;  %v7933_v56 = vld [vmem:[#allocation30_spill] sm:$0xff]  ;;  %v7937_v26 = vld [vmem:[#allocation40_spill] sm:$0xff] }
 0x30c   : > { %v7005_v45 = vpack.c.b16 %v2703_v43, %v2702_v32 }
 0x30d   : > { %v2427_v54 = vmax.f32 %v2397_v5, 0.0  ;;  %v2141_v5 = vadd.f32 %v7933_v56, %v2057_v50  ;;  %v7938_v50 = vld [vmem:[#allocation32_spill] sm:$0xff] }
 0x30e   : > { %v2303_v1 = vpop.f32.mrf.mxu0  ;;  %3539 = vmatmul.bf16.gmra.mxu1 %v7005_v45  ;;  %v2791_v21 = vshll.u32 %v7005_v45, 16  ;;  %v2865_v60 = vrot.slane %v7005_v45, 1  ;;  %v2789_v20 = vshrl.u32 %v7005_v45, 16 }
 0x30f   : > { %v2631_v34 = vsel %vm2541_vm11, %v2427_v54, 0.0  ;;  %v2304_v35 = vadd.f32 %v2303_v1, %v2220_v19  ;;  %v2225_v1 = vadd.f32 %v6655_v42, %v2141_v5  ;;  %v7939_v5 = vld [vmem:[#allocation42_spill] sm:$0xff] }
 0x310   : > { %v2661_v10 = vpack.c.bf16 %v2631_v34, %v2631_v34  ;;  %v2793_v3 = vrot.slane %v2791_v21, 1  ;;  %v7934_v34 = vld [vmem:[#allocation45_spill] sm:$0xff] }
 0x311   : > { %v2364_v55 = vmul.f32 %v6747_v0, %v2304_v35  ;;  %2342 = vmatmul.bf16.gmra.mxu0 %v1060_v33  ;;  %v4912_v33 = vld [vmem:[%s7720_s5 + $0xe8] sm:$0xff]  ;;  %v7935_v35 = vld [vmem:[#allocation21_spill] sm:$0xff] }
 0x312   : > { %v2739_v25 = vunpack.c.l.b16 %v2661_v10  ;;  %v2794_v32 = vor.u32 %v2793_v3, %v2789_v20  ;;  %3665 = vmatpush.bf16.msrb.mxu1 %v4912_v33  ;;  %v2059_v10 = vadd.f32 %v7935_v35, %v7934_v34 }
 0x313   : > { %v2398_v18 = vadd.f32 %v6756_v23, %v2364_v55 }
 0x314   : > { %v2747_v52 = vpack.c.b16 %v2739_v25, %v2739_v25 }
 0x315   : > { %v2428_v44 = vmax.f32 %v2398_v18, 0.0 }
 0x316   : > { %v2305_v57 = vpop.f32.mrf.mxu0  ;;  %v2866_v62 = vrot.slane %v2747_v52, 1  ;;  %v2796_v63 = vshll.u32 %v2747_v52, 16  ;;  %v7936_v52 = vld [vmem:[#allocation43_spill] sm:$0xff] }
 0x317   : > { %v2306_v15 = vadd.f32 %v2305_v57, %v2222_v40  ;;  %v2632_v19 = vsel %vm2509_vm15, %v2428_v44, 0.0  ;;  %v2143_v3 = vadd.f32 %v7936_v52, %v2059_v10  ;;  %v2062_v44 = vadd.f32 %v7938_v50, %v7937_v26 }
 0x318   : > { %v7037_v47 = vsel %vm670_vm1, %v2865_v60, %v2866_v62  ;;  %v2798_v43 = vrot.slane %v2796_v63, 1  ;;  %v2662_v46 = vpack.c.bf16 %v2632_v19, %v2632_v19  ;;  %v2452_v63 = vadd.s32 5, %v6758_v59 }
 0x319   : > { %v2365_v11 = vmul.f32 %v6747_v0, %v2306_v15  ;;  %3637 = vmatmul.bf16.gmra.mxu3 %v7037_v47  ;;  %v2227_v60 = vadd.f32 %v6667_v53, %v2143_v3  ;;  %v4911_v53 = vld [vmem:[%s7720_s5 + $0xe0] sm:$0xff]  ;;  %v2146_v19 = vadd.f32 %v7939_v5, %v2062_v44  ;;  %v7943_v3 = vld [vmem:[#allocation33_spill] sm:$0xff] }
 0x31a   : > { %v7042_v16 = vsel %vm519_vm0, %v2794_v32, %v2798_v43  ;;  %v2704_v42 = vunpack.c.l.b16 %v2662_v46  ;;  %vm2469_vm3 = vcmp.ge.s32.totalorder %v2452_v63, 0  ;;  %vm2479_vm4 = vcmp.lt.s32.totalorder %v2452_v63, 16  ;;  %3666 = vmatpush.bf16.msrb.mxu1 %v4911_v53 }
 0x31b   : > { %v2399_v54 = vadd.f32 %v6756_v23, %v2365_v11  ;;  %3588 = vmatmul.bf16.gmra.mxu2 %v7042_v16  ;;  %vm7081_vm6 = vmand %vm2469_vm3, %vm2479_vm4 }
 0x31c   : > { %vm2512_vm8 = vmand %vm7081_vm6, %vm2494_vm5 }
 0x31d   : > { %v2429_v36 = vmax.f32 %v2399_v54, 0.0  ;;  %vm2547_vm9 = vmand %vm7081_vm6, %vm2529_vm7 }
 0x31e   : > { %v2308_v27 = vpop.f32.mrf.mxu0 }
 0x31f   : > { %v2633_v21 = vsel %vm7024_vm14, %v2429_v36, 0.0  ;;  %v2309_v55 = vadd.f32 %v2308_v27, %v2225_v1  ;;  %v2230_v36 = vadd.f32 %v6677_v61, %v2146_v19 }
 0x320   : > { %v2663_v25 = vpack.c.bf16 %v2633_v21, %v2633_v21 }
 0x321   : > { %v2366_v30 = vmul.f32 %v6747_v0, %v2309_v55  ;;  %3818 = vmatmul.bf16.vlgmr.msrb.gmra.mxu0 %v6921_v29  ;;  %v7942_v55 = vld [vmem:[#allocation20_spill] sm:$0xff] }
 0x322   : > { %v2705_v18 = vunpack.c.l.b16 %v2663_v25  ;;  %v2064_v25 = vadd.f32 %v7942_v55, %v6595_v58  ;;  %v7948_v55 = vld [vmem:[#allocation46_spill] sm:$0xff] }
 0x323   : > { %v2400_v40 = vadd.f32 %v6756_v23, %v2366_v30 }
 0x324   : > { %v7062_v57 = vpack.c.b16 %v2705_v18, %v2704_v42 }
 0x325   : > { %v2430_v62 = vmax.f32 %v2400_v40, 0.0  ;;  %v2148_v40 = vadd.f32 %v7943_v3, %v2064_v25  ;;  %v7949_v25 = vld [vmem:[#allocation23_spill] sm:$0xff] }
 0x326   : > { %v2310_v20 = vpop.f32.mrf.mxu0  ;;  %3544 = vmatmul.bf16.gmra.mxu1 %v7062_v57  ;;  %v2803_v11 = vshll.u32 %v7062_v57, 16  ;;  %v2868_v34 = vrot.slane %v7062_v57, 1  ;;  %v2801_v10 = vshrl.u32 %v7062_v57, 16 }
 0x327   : > { %v2634_v15 = vsel %vm2544_vm2, %v2430_v62, 0.0  ;;  %v2311_v32 = vadd.f32 %v2310_v20, %v2227_v60  ;;  %v4918_v20 = vld [vmem:[%s7720_s5 + $0x118] sm:$0xff]  ;;  %v2232_v63 = vadd.f32 %v6685_v17, %v2148_v40  ;;  %v4917_v40 = vld [vmem:[%s7720_s5 + $0x110] sm:$0xff] }
 0x328   : > { %v2664_v43 = vpack.c.bf16 %v2634_v15, %v2634_v15  ;;  %v2805_v1 = vrot.slane %v2803_v11, 1  ;;  %3716 = vmatpush.bf16.msrb.mxu2 %v4918_v20  ;;  %v7944_v15 = vld [vmem:[#allocation49_spill] sm:$0xff]  ;;  %v4910_v17 = vld [vmem:[%s7720_s5 + $0xd8] sm:$0xff] }
 0x329   : > { %v2367_v56 = vmul.f32 %v6747_v0, %v2311_v32  ;;  %v7945_v32 = vld [vmem:[#allocation15_spill] sm:$0xff]  ;;  %3667 = vmatpush.bf16.msrb.mxu1 %v4910_v17 }
 0x32a   : > { %v2740_v6 = vunpack.c.l.b16 %v2664_v43  ;;  %v2806_v42 = vor.u32 %v2805_v1, %v2801_v10  ;;  %v2067_v43 = vadd.f32 %v7945_v32, %v7944_v15  ;;  %v4908_v15 = vld [vmem:[%s7720_s5 + $0xc8] sm:$0xff] }
 0x32b   : > { %v2401_v54 = vadd.f32 %v6756_v23, %v2367_v56 }
 0x32c   : > { %v2748_v33 = vpack.c.b16 %v2740_v6, %v2740_v6  ;;  %3717 = vmatpush.bf16.msrb.mxu2 %v4917_v40  ;;  %v7174_v40 = vpop.f32.mrf.mxu2 }
 0x32d   : > { %v2431_v28 = vmax.f32 %v2401_v54, 0.0  ;;  %v7946_v54 = vld [vmem:[#allocation35_spill] sm:$0xff] }
 0x32e   : > { %v2313_v27 = vpop.f32.mrf.mxu0  ;;  %v2869_v35 = vrot.slane %v2748_v33, 1  ;;  %v2808_v21 = vshll.u32 %v2748_v33, 16  ;;  %v2151_v33 = vadd.f32 %v7946_v54, %v2067_v43 }
 0x32f   : > { %v2314_v30 = vadd.f32 %v2313_v27, %v2230_v36  ;;  %v2635_v60 = vsel %vm2512_vm8, %v2431_v28, 0.0  ;;  %v7947_v27 = vld [vmem:[#allocation60_spill] sm:$0xff]  ;;  %v2069_v28 = vadd.f32 %v7949_v25, %v7948_v55 }
 0x330   : > { %v7094_v61 = vsel %vm670_vm1, %v2868_v34, %v2869_v35  ;;  %v2810_v18 = vrot.slane %v2808_v21, 1  ;;  %v2665_v50 = vpack.c.bf16 %v2635_v60, %v2635_v60  ;;  %v2235_v34 = vadd.f32 %v7947_v27, %v2151_v33  ;;  %v7950_v60 = vld [vmem:[#allocation48_spill] sm:$0xff] }
 0x331   : > { %v2368_v52 = vmul.f32 %v6747_v0, %v2314_v30  ;;  %3642 = vmatmul.bf16.gmra.mxu3 %v7094_v61  ;;  %3823 = vmatmul.bf16.gmra.mxu0 %v7005_v45  ;;  %v2453_v21 = vadd.s32 6, %v6758_v59 }
 0x332   : > { %v7100_v58 = vsel %vm519_vm0, %v2806_v42, %v2810_v18  ;;  %v2706_v5 = vunpack.c.l.b16 %v2665_v50  ;;  %v7951_v50 = vld [vmem:[#allocation63_spill] sm:$0xff] }
 0x333   : > { %v2402_v62 = vadd.f32 %v6756_v23, %v2368_v52  ;;  %3593 = vmatmul.bf16.gmra.mxu2 %v7100_v58  ;;  %vm2470_vm10 = vcmp.ge.s32.totalorder %v2453_v21, 0  ;;  %vm2480_vm11 = vcmp.lt.s32.totalorder %v2453_v21, 16  ;;  %v7956_v21 = vld [vmem:[#allocation16_spill] sm:$0xff] }
 0x334   : > { %vm7139_vm12 = vmand %vm2470_vm10, %vm2480_vm11 }
 0x335   : > { %v2432_v26 = vmax.f32 %v2402_v62, 0.0  ;;  %v2153_v62 = vadd.f32 %v7950_v60, %v2069_v28  ;;  %vm2515_vm13 = vmand %vm7139_vm12, %vm2494_vm5 }
 0x336   : > { %v2315_v44 = vpop.f32.mrf.mxu0  ;;  %vm2550_vm14 = vmand %vm7139_vm12, %vm2529_vm7 }
 0x337   : > { %v2636_v11 = vsel %vm7081_vm6, %v2432_v26, 0.0  ;;  %v2316_v56 = vadd.f32 %v2315_v44, %v2232_v63  ;;  %v2237_v44 = vadd.f32 %v7951_v50, %v2153_v62 }
 0x338   : > { %v2666_v6 = vpack.c.bf16 %v2636_v11, %v2636_v11 }
 0x339   : > { %v2369_v53 = vmul.f32 %v6747_v0, %v2316_v56 }
 0x33a   : > { %v2707_v19 = vunpack.c.l.b16 %v2666_v6 }
 0x33b   : > { %v2403_v1 = vadd.f32 %v6756_v23, %v2369_v53  ;;  %v7954_v53 = vld [vmem:[#allocation19_spill] sm:$0xff] }
 0x33c   : > { %v7119_v36 = vpack.c.b16 %v2707_v19, %v2706_v5  ;;  %v7955_v5 = vld [vmem:[#allocation39_spill] sm:$0xff] }
 0x33d   : > { %v2433_v35 = vmax.f32 %v2403_v1, 0.0  ;;  %v2072_v19 = vadd.f32 %v7955_v5, %v7954_v53  ;;  %v4916_v5 = vld [vmem:[%s7720_s5 + $0x108] sm:$0xff] }
 0x33e   : > { %v2318_v10 = vpop.f32.mrf.mxu0  ;;  %3549 = vmatmul.bf16.gmra.mxu1 %v7119_v36  ;;  %v2815_v52 = vshll.u32 %v7119_v36, 16  ;;  %v2871_v43 = vrot.slane %v7119_v36, 1  ;;  %v2813_v56 = vshrl.u32 %v7119_v36, 16  ;;  %3718 = vmatpush.bf16.msrb.mxu2 %v4916_v5 }
 0x33f   : > { %v2637_v30 = vsel %vm2547_vm9, %v2433_v35, 0.0  ;;  %v2319_v42 = vadd.f32 %v2318_v10, %v2235_v34  ;;  %v4930_v35 = vld [vmem:[%s7720_s5 + $0x178] sm:$0xff]  ;;  %v2156_v55 = vadd.f32 %v7956_v21, %v2072_v19  ;;  %v7960_v19 = vld [vmem:[#allocation17_spill] sm:$0xff] }
 0x340   : > { %v2667_v18 = vpack.c.bf16 %v2637_v30, %v2637_v30  ;;  %v2817_v26 = vrot.slane %v2815_v52, 1  ;;  %3761 = vmatpush.bf16.msrb.mxu3 %v4930_v35  ;;  %v4909_v30 = vld [vmem:[%s7720_s5 + $0xd0] sm:$0xff]  ;;  %v7169_v52 = vpop.f32.mrf.mxu1 }
 0x341   : > { %v2370_v46 = vmul.f32 %v6747_v0, %v2319_v42  ;;  %3828 = vmatmul.bf16.gmra.mxu0 %v7062_v57  ;;  %v7957_v42 = vld [vmem:[#allocation41_spill] sm:$0xff]  ;;  %3668 = vmatpush.bf16.msrb.mxu1 %v4909_v30 }
 0x342   : > { %v2741_v3 = vunpack.c.l.b16 %v2667_v18  ;;  %v2818_v1 = vor.u32 %v2817_v26, %v2813_v56  ;;  %v2240_v18 = vadd.f32 %v7957_v42, %v2156_v55  ;;  %v4928_v56 = vld [vmem:[%s7720_s5 + $0x168] sm:$0xff]  ;;  %v4927_v55 = vld [vmem:[%s7720_s5 + $0x160] sm:$0xff]  ;;  %v7962_v42 = vld [vmem:[#allocation53_spill] sm:$0xff] }
 0x343   : > { %v2404_v20 = vadd.f32 %v6756_v23, %v2370_v46 }
 0x344   : > { %v2749_v63 = vpack.c.b16 %v2741_v3, %v2741_v3  ;;  %v4929_v3 = vld [vmem:[%s7720_s5 + $0x170] sm:$0xff] }
 0x345   : > { %v2434_v17 = vmax.f32 %v2404_v20, 0.0  ;;  %v7958_v20 = vld [vmem:[#allocation50_spill] sm:$0xff]  ;;  %3762 = vmatpush.bf16.msrb.mxu3 %v4929_v3  ;;  %3669 = vmatpush.bf16.msrb.mxu1 %v4908_v15 }
 0x346   : > { %v2320_v32 = vpop.f32.mrf.mxu0  ;;  %v2872_v11 = vrot.slane %v2749_v63, 1  ;;  %v2820_v6 = vshll.u32 %v2749_v63, 16  ;;  %v7959_v63 = vld [vmem:[#allocation18_spill] sm:$0xff] }
 0x347   : > { %v2321_v54 = vadd.f32 %v2320_v32, %v2237_v44  ;;  %v2638_v25 = vsel %vm2515_vm13, %v2434_v17, 0.0  ;;  %v2074_v26 = vadd.f32 %v7959_v63, %v7958_v20  ;;  %v7180_v32 = vpop.f32.mrf.mxu3  ;;  %v7968_v15 = vld [vmem:[#allocation54_spill] sm:$0xff] }
 0x348   : > { %v7152_v33 = vsel %vm670_vm1, %v2871_v43, %v2872_v11  ;;  %v2822_v27 = vrot.slane %v2820_v6, 1  ;;  %v2668_v60 = vpack.c.bf16 %v2638_v25, %v2638_v25  ;;  %v3525_v35 = vpop.f32.mrf.mxu1 }
 0x349   : > { %v2371_v34 = vmul.f32 %v6747_v0, %v2321_v54  ;;  %3647 = vmatmul.bf16.gmra.mxu3 %v7152_v33  ;;  %v2158_v17 = vadd.f32 %v7960_v19, %v2074_v26 }
 0x34a   : > { %v7160_v10 = vsel %vm519_vm0, %v2818_v1, %v2822_v27  ;;  %v2708_v6 = vunpack.c.l.b16 %v2668_v60  ;;  %3763 = vmatpush.bf16.msrb.mxu3 %v4928_v56  ;;  %v7961_v27 = vld [vmem:[#allocation65_spill] sm:$0xff]  ;;  %v4907_v56 = vld [vmem:[%s7720_s5 + $0xc0] sm:$0xff] }
 0x34b   : > { %v2405_v28 = vadd.f32 %v6756_v23, %v2371_v34  ;;  %3598 = vmatmul.bf16.gmra.mxu2 %v7160_v10  ;;  %v2242_v34 = vadd.f32 %v7961_v27, %v2158_v17  ;;  %3670 = vmatpush.bf16.msrb.mxu1 %v4907_v56 }
 0x34d   : > { %v2435_v46 = vmax.f32 %v2405_v28, 0.0  ;;  %v2454_v28 = vadd.s32 7, %v6758_v59 }
 0x34e   : > { %v2323_v62 = vpop.f32.mrf.mxu0  ;;  %3764 = vmatpush.bf16.msrb.mxu3 %v4927_v55 }
 0x34f   : > { %v2639_v50 = vsel %vm7139_vm12, %v2435_v46, 0.0  ;;  %v2324_v44 = vadd.f32 %v2323_v62, %v2240_v18  ;;  %v7963_v18 = vld [vmem:[#allocation25_spill] sm:$0xff]  ;;  %vm2471_vm15 = vcmp.ge.s32.totalorder %v2454_v28, 0  ;;  %vm2481_vm2 = vcmp.lt.s32.totalorder %v2454_v28, 16 }
 0x350   : > { %v2669_v43 = vpack.c.bf16 %v2639_v50, %v2639_v50  ;;  %v2077_v46 = vadd.f32 %v7963_v18, %v7962_v42  ;;  %vm7222_vm3 = vmand %vm2471_vm15, %vm2481_vm2  ;;  %v7969_v42 = vld [vmem:[#allocation51_spill] sm:$0xff] }
 0x351   : > { %v2372_v11 = vmul.f32 %v6747_v0, %v2324_v44  ;;  %3833 = vmatmul.bf16.gmra.mxu0 %v7119_v36  ;;  %v4926_v44 = vld [vmem:[%s7720_s5 + $0x158] sm:$0xff]  ;;  %v2079_v18 = vadd.f32 %v7969_v42, %v7968_v15  ;;  %vm2518_vm4 = vmand %vm7222_vm3, %vm2494_vm5 }
 0x352   : > { %v2709_v53 = vunpack.c.l.b16 %v2669_v43  ;;  %3765 = vmatpush.bf16.msrb.mxu3 %v4926_v44  ;;  %v7970_v44 = vld [vmem:[#allocation52_spill] sm:$0xff]  ;;  %vm2553_vm6 = vmand %vm7222_vm3, %vm2529_vm7 }
 0x353   : > { %v2406_v54 = vadd.f32 %v6756_v23, %v2372_v11 }
 0x354   : > { %v7192_v1 = vpack.c.b16 %v2709_v53, %v2708_v6  ;;  %v3623_v63 = vpop.f32.mrf.mxu3  ;;  %v7964_v6 = vld [vmem:[#allocation26_spill] sm:$0xff] }
 0x355   : > { %v2436_v21 = vmax.f32 %v2406_v54, 0.0  ;;  %v2161_v53 = vadd.f32 %v7964_v6, %v2077_v46  ;;  %v7965_v54 = vld [vmem:[#allocation47_spill] sm:$0xff] }
 0x356   : > { %v2325_v25 = vpop.f32.mrf.mxu0  ;;  %3554 = vmatmul.bf16.gmra.mxu1 %v7192_v1  ;;  %v3574_v30 = vpop.f32.mrf.mxu2  ;;  %v2827_v26 = vshll.u32 %v7192_v1, 16  ;;  %v2874_v55 = vrot.slane %v7192_v1, 1  ;;  %v2825_v28 = vshrl.u32 %v7192_v1, 16 }
 0x357   : > { %v2640_v3 = vsel %vm2550_vm14, %v2436_v21, 0.0  ;;  %v2326_v60 = vadd.f32 %v2325_v25, %v2242_v34  ;;  %v3575_v62 = vadd.f32 %v3574_v30, %v3525_v35  ;;  %v2245_v27 = vadd.f32 %v7965_v54, %v2161_v53  ;;  %v4925_v35 = vld [vmem:[%s7720_s5 + $0x150] sm:$0xff]  ;;  %v4915_v53 = vld [vmem:[%s7720_s5 + $0x100] sm:$0xff] }
 0x358   : > { %v2670_v20 = vpack.c.bf16 %v2640_v3, %v2640_v3  ;;  %v2829_v17 = vrot.slane %v2827_v26, 1  ;;  %3766 = vmatpush.bf16.msrb.mxu3 %v4925_v35  ;;  %v4924_v26 = vld [vmem:[%s7720_s5 + $0x148] sm:$0xff]  ;;  %3719 = vmatpush.bf16.msrb.mxu2 %v4915_v53 }
 0x359   : > { %v2373_v50 = vmul.f32 %v6747_v0, %v2326_v60  ;;  %v7214_v43 = vadd.f32 %v3623_v63, %v3575_v62 }
 0x35a   : > { %v2742_v11 = vunpack.c.l.b16 %v2670_v20  ;;  %v2830_v62 = vor.u32 %v2829_v17, %v2825_v28  ;;  %v7256_v17 = vpop.f32.mrf.mxu1  ;;  %v7973_v28 = vld [vmem:[#allocation28_spill] sm:$0xff] }
 0x35b   : > { %v2407_v5 = vadd.f32 %v6756_v23, %v2373_v50 }
 0x35c   : > { %v2750_v19 = vpack.c.b16 %v2742_v11, %v2742_v11  ;;  %v2163_v11 = vadd.f32 %v7970_v44, %v2079_v18  ;;  %3767 = vmatpush.bf16.msrb.mxu3 %v4924_v26  ;;  %v7267_v18 = vpop.f32.mrf.mxu3 }
 0x35d   : > { %v2437_v46 = vmax.f32 %v2407_v5, 0.0  ;;  %v7971_v5 = vld [vmem:[#allocation66_spill] sm:$0xff] }
 0x35e   : > { %v2328_v21 = vpop.f32.mrf.mxu0  ;;  %v2875_v25 = vrot.slane %v2750_v19, 1  ;;  %v2832_v30 = vshll.u32 %v2750_v19, 16  ;;  %v2247_v19 = vadd.f32 %v7971_v5, %v2163_v11  ;;  %v2455_v5 = vadd.s32 8, %v6758_v59 }
 0x35f   : > { %v2329_v3 = vadd.f32 %v2328_v21, %v2245_v27  ;;  %v2641_v56 = vsel %vm2518_vm4, %v2437_v46, 0.0  ;;  %v4923_v27 = vld [vmem:[%s7720_s5 + $0x140] sm:$0xff]  ;;  %v7261_v21 = vpop.f32.mrf.mxu2 }
 0x360   : > { %v7238_v60 = vsel %vm670_vm1, %v2874_v55, %v2875_v25  ;;  %v2834_v20 = vrot.slane %v2832_v30, 1  ;;  %v2671_v35 = vpack.c.bf16 %v2641_v56, %v2641_v56  ;;  %v7972_v25 = vld [vmem:[#allocation56_spill] sm:$0xff]  ;;  %3768 = vmatpush.bf16.msrb.mxu3 %v4923_v27  ;;  %v7975_v56 = vld [vmem:[#allocation67_spill] sm:$0xff]  ;;  %vm2472_vm8 = vcmp.ge.s32.totalorder %v2455_v5, 0 }
 0x361   : > { %v2374_v63 = vmul.f32 %v6747_v0, %v2329_v3  ;;  %3652 = vmatmul.bf16.gmra.mxu3 %v7238_v60  ;;  %3838 = vmatmul.bf16.gmra.mxu0 %v7192_v1  ;;  %v2082_v30 = vadd.f32 %v7973_v28, %v7972_v25  ;;  %vm2482_vm9 = vcmp.lt.s32.totalorder %v2455_v5, 16 }
 0x362   : > { %v7247_v50 = vsel %vm519_vm0, %v2830_v62, %v2834_v20  ;;  %v2710_v62 = vunpack.c.l.b16 %v2671_v35  ;;  %vm7308_vm10 = vmand %vm2472_vm8, %vm2482_vm9 }
 0x363   : > { %v2408_v6 = vadd.f32 %v6756_v23, %v2374_v63  ;;  %3603 = vmatmul.bf16.gmra.mxu2 %v7247_v50  ;;  %v7974_v63 = vld [vmem:[#allocation55_spill] sm:$0xff]  ;;  %vm2521_vm11 = vmand %vm7308_vm10, %vm2494_vm5 }
 0x364   : > { %5074 = vmatpush.bf16.msra.mxu3 %v6851_v39  ;;  %v2166_v26 = vadd.f32 %v7974_v63, %v2082_v30  ;;  %v3530_v39 = vpop.f32.mrf.mxu1  ;;  %v7290_v30 = vld [vmem:[%s7718_s3] ss:$0 sm:$0xff]  ;;  %vm2556_vm12 = vmand %vm7308_vm10, %vm2529_vm7 }
 0x365   : > { %v2438_v54 = vmax.f32 %v2408_v6, 0.0 }
 0x366   : > { %v2330_v55 = vpop.f32.mrf.mxu0  ;;  %v2250_v6 = vadd.f32 %v7975_v56, %v2166_v26  ;;  %v7979_v56 = vld [vmem:[#allocation68_spill] sm:$0xff] }
 0x367   : > { %v2642_v15 = vsel %vm7222_vm3, %v2438_v54, 0.0  ;;  %v2331_v42 = vadd.f32 %v2330_v55, %v2247_v19  ;;  %v7977_v54 = vld [vmem:[#allocation57_spill] sm:$0xff] }
 0x368   : > { %v2672_v46 = vpack.c.bf16 %v2642_v15, %v2642_v15  ;;  %5075 = vmatpush.bf16.msra.mxu3 %v6865_v24 }
 0x369   : > { %v2375_v3 = vmul.f32 %v6747_v0, %v2331_v42 }
 0x36a   : > { %v2711_v20 = vunpack.c.l.b16 %v2672_v46 }
 0x36b   : > { %v2409_v44 = vadd.f32 %v6756_v23, %v2375_v3  ;;  %v7976_v23 = vld [vmem:[#allocation58_spill] sm:$0xff] }
 0x36c   : > { %v7273_v11 = vpack.c.b16 %v2711_v20, %v2710_v62  ;;  %v2084_v27 = vadd.f32 %v7977_v54, %v7976_v23  ;;  %v3628_v28 = vpop.f32.mrf.mxu3  ;;  %5076 = vmatpush.bf16.msra.mxu3 %v6886_v51  ;;  %v4954_v3 = vld [vmem:[%s7720_s5 + $0x238] sm:$0xff]  ;;  %v7978_v62 = vld [vmem:[#allocation31_spill] sm:$0xff] }
 0x36d   : > { %v2439_v53 = vmax.f32 %v2409_v44, 0.0  ;;  %v7303_v20 = vld [vmem:[%s7719_s4] ss:$0 sm:$0xff]  ;;  %3908 = vmatpush.bf16.msra.mxu2 %v4954_v3 }
 0x36e   : > { %v2333_v0 = vpop.f32.mrf.mxu0  ;;  %3559 = vmatmul.bf16.gmra.mxu1 %v7273_v11  ;;  %v3579_v19 = vpop.f32.mrf.mxu2  ;;  %v2839_v24 = vshll.u32 %v7273_v11, 16  ;;  %v2168_v51 = vadd.f32 %v7978_v62, %v2084_v27 }
 0x36f   : > { %v2643_v35 = vsel %vm2553_vm6, %v2439_v53, 0.0  ;;  %v2334_v55 = vadd.f32 %v2333_v0, %v2250_v6  ;;  %v3580_v25 = vadd.f32 %v3579_v19, %v3530_v39  ;;  %v2877_v0 = vrot.slane %v7273_v11, 1 }
 0x370   : > { %v2673_v34 = vpack.c.bf16 %v2643_v35, %v2643_v35  ;;  %v2841_v44 = vrot.slane %v2839_v24, 1  ;;  %5077 = vmatpush.bf16.msra.mxu3 %v6899_v9  ;;  %v2252_v6 = vadd.f32 %v7979_v56, %v2168_v51  ;;  %v2837_v19 = vshrl.u32 %v7273_v11, 16 }
 0x371   : > { %v2376_v15 = vmul.f32 %v7290_v30, %v2334_v55  ;;  %3843 = vmatmul.bf16.gmra.mxu0 %v7273_v11  ;;  %v7294_v42 = vadd.f32 %v3628_v28, %v3580_v25 }
 0x372   : > { %v2743_v46 = vunpack.c.l.b16 %v2673_v34  ;;  %v2842_v35 = vor.u32 %v2841_v44, %v2837_v19 }
 0x373   : > { %v2410_v63 = vadd.f32 %v7303_v20, %v2376_v15  ;;  %v4946_v15 = vld [vmem:[%s7720_s5 + $0x1f8] sm:$0xff] }
 0x374   : > { %v2751_v26 = vpack.c.b16 %v2743_v46, %v2743_v46  ;;  %5078 = vmatpush.bf16.msra.mxu3 %v6914_v37  ;;  %v7333_v46 = vpop.f32.mrf.mxu1  ;;  %3859 = vmatpush.bf16.msra.mxu1 %v4946_v15 }
 0x375   : > { %v2440_v54 = vmax.f32 %v2410_v63, 0.0  ;;  %v7982_v63 = vld [vmem:[#allocation62_spill] sm:$0xff] }
 0x376   : > { %v2335_v53 = vpop.f32.mrf.mxu0  ;;  %v2878_v5 = vrot.slane %v2751_v26, 1  ;;  %v2844_v23 = vshll.u32 %v2751_v26, 16  ;;  %v7335_v62 = vpop.f32.mrf.mxu2  ;;  %v7983_v26 = vld [vmem:[#allocation59_spill] sm:$0xff] }
 0x377   : > { %v2336_v27 = vadd.f32 %v2335_v53, %v2252_v6  ;;  %v2644_v28 = vsel %vm2521_vm11, %v2440_v54, 0.0  ;;  %v2089_v44 = vadd.f32 %v7983_v26, %v7982_v63  ;;  %v7343_v53 = vpop.f32.mrf.mxu3 }
 0x378   : > { %v7319_v9 = vsel %vm670_vm1, %v2877_v0, %v2878_v5  ;;  %v2846_v55 = vrot.slane %v2844_v23, 1  ;;  %5079 = vmatpush.bf16.msra.mxu3 %v6931_v4  ;;  %v2674_v3 = vpack.c.bf16 %v2644_v28, %v2644_v28  ;;  %v7984_v23 = vld [vmem:[#allocation61_spill] sm:$0xff] }
 0x379   : > { %v2377_v25 = vmul.f32 %v7290_v30, %v2336_v27  ;;  %3657 = vmatmul.bf16.gmra.mxu3 %v7319_v9 }
 0x37a   : > { %v7325_v34 = vsel %vm519_vm0, %v2842_v35, %v2846_v55  ;;  %v2890_v5 = vunpack.c.l.b16 %v2674_v3 }
 0x37b   : > { %v2411_v24 = vadd.f32 %v7303_v20, %v2377_v25  ;;  %3608 = vmatmul.bf16.gmra.mxu2 %v7325_v34 }
 0x37c   : > { %5080 = vmatpush.bf16.msra.mxu3 %v6949_v41  ;;  %v4945_v41 = vld [vmem:[%s7720_s5 + $0x1f0] sm:$0xff]  ;;  %v3535_v55 = vpop.f32.mrf.mxu1 }
 0x37d   : > { %v2441_v37 = vmax.f32 %v2411_v24, 0.0  ;;  %v2456_v24 = vadd.s32 9, %v6758_v59  ;;  %3860 = vmatpush.bf16.msra.mxu1 %v4945_v41 }
 0x37e   : > { %v2338_v51 = vpop.f32.mrf.mxu0  ;;  %3671 = vmatmul.bf16.vlgmr.msrb.gmra.mxu1 %v6832_v38  ;;  %v2173_v38 = vadd.f32 %v7984_v23, %v2089_v44 }
 0x37f   : > { %v2645_v56 = vsel %vm7308_vm10, %v2441_v37, 0.0  ;;  %v2339_v6 = vadd.f32 %v2338_v51, %v6822_v22  ;;  %v4953_v22 = vld [vmem:[%s7720_s5 + $0x230] sm:$0xff]  ;;  %vm2473_vm13 = vcmp.ge.s32.totalorder %v2456_v24, 0  ;;  %vm2483_vm14 = vcmp.lt.s32.totalorder %v2456_v24, 16  ;;  %v4951_v24 = vld [vmem:[%s7720_s5 + $0x220] sm:$0xff] }
 0x380   : > { %v2675_v4 = vpack.c.bf16 %v2645_v56, %v2645_v56  ;;  %5081 = vmatpush.bf16.msra.mxu3 %v6966_v49  ;;  %v2257_v35 = vadd.f32 %v6839_v7, %v2173_v38  ;;  %3909 = vmatpush.bf16.msra.mxu2 %v4953_v22  ;;  %v4952_v49 = vld [vmem:[%s7720_s5 + $0x228] sm:$0xff]  ;;  %vm7376_vm15 = vmand %vm2473_vm13, %vm2483_vm14 }
 0x381   : > { %v2378_v0 = vmul.f32 %v7290_v30, %v2339_v6  ;;  %v7987_v56 = vld [vmem:[#allocation64_spill] sm:$0xff]  ;;  %vm2524_vm2 = vmand %vm7376_vm15, %vm2494_vm5 }
 0x382   : > { %v2891_v19 = vunpack.c.l.b16 %v2675_v4  ;;  %v2094_v6 = vadd.f32 %v7169_v52, %v7987_v56  ;;  %vm2559_vm5 = vmand %vm7376_vm15, %vm2529_vm7 }
 0x383   : > { %v2412_v54 = vadd.f32 %v7303_v20, %v2378_v0 }
 0x384   : > { %v7349_v27 = vpack.c.b16 %v2891_v19, %v2890_v5  ;;  %v3633_v51 = vpop.f32.mrf.mxu3  ;;  %3910 = vmatpush.bf16.msra.mxu2 %v4952_v49  ;;  %v7395_v38 = vpop.f32.mrf.mxu1 }
 0x385   : > { %v2442_v25 = vmax.f32 %v2412_v54, 0.0 }
 0x386   : > { %v2340_v28 = vpop.f32.mrf.mxu0  ;;  %v3584_v15 = vpop.f32.mrf.mxu2  ;;  %3848 = vmatmul.bf16.gmra.mxu0 %v7349_v27 }
 0x387   : > { %v7365_v39 = vsel %vm2556_vm12, %v2442_v25, 0.0  ;;  %v2341_v37 = vadd.f32 %v2340_v28, %v2257_v35  ;;  %v3585_v3 = vadd.f32 %v3584_v15, %v3535_v55 }
 0x388   : > { %3911 = vmatpush.bf16.msra.mxu2 %v4951_v24 }
 0x389   : > { %v2379_v63 = vmul.f32 %v7290_v30, %v2341_v37  ;;  %3769 = vmatmul.bf16.vlgmr.msrb.gmra.mxu3 %v6879_v48  ;;  %v7369_v7 = vadd.f32 %v3633_v51, %v3585_v3  ;;  %v4944_v48 = vld [vmem:[%s7720_s5 + $0x1e8] sm:$0xff] }
 0x38a   : > { %3861 = vmatpush.bf16.msra.mxu1 %v4944_v48 }
 0x38b   : > { %v2413_v59 = vadd.f32 %v7303_v20, %v2379_v63  ;;  %3720 = vmatmul.bf16.vlgmr.msrb.gmra.mxu2 %v6889_v31  ;;  %v4943_v63 = vld [vmem:[%s7720_s5 + $0x1e0] sm:$0xff] }
 0x38c   : > { %v7401_v35 = vpop.f32.mrf.mxu3  ;;  %v3540_v37 = vpop.f32.mrf.mxu1  ;;  %3912 = vmatpush.bf16.msra.mxu2 %v4950_v8 }
 0x38d   : > { %v2443_v31 = vmax.f32 %v2413_v59, 0.0 }
 0x38e   : > { %v2343_v44 = vpop.f32.mrf.mxu0  ;;  %3676 = vmatmul.bf16.gmra.mxu1 %v6921_v29  ;;  %v2178_v29 = vadd.f32 %v7174_v40, %v2094_v6 }
 0x38f   : > { %v2344_v4 = vadd.f32 %v2343_v44, %v6868_v13  ;;  %v2647_v5 = vsel %vm2524_vm2, %v2443_v31, 0.0  ;;  %v7397_v13 = vpop.f32.mrf.mxu2  ;;  %3862 = vmatpush.bf16.msra.mxu1 %v4943_v63  ;;  %v4942_v44 = vld [vmem:[%s7720_s5 + $0x1d8] sm:$0xff] }
 0x390   : > { %v2262_v23 = vadd.f32 %v7180_v32, %v2178_v29  ;;  %v2677_v54 = vpack.c.bf16 %v2647_v5, %v2647_v5  ;;  %v4941_v29 = vld [vmem:[%s7720_s5 + $0x1d0] sm:$0xff] }
 0x391   : > { %v2380_v0 = vmul.f32 %v7290_v30, %v2344_v4 }
 0x392   : > { %v2916_v25 = vunpack.c.l.b16 %v2677_v54 }
 0x393   : > { %v2414_v19 = vadd.f32 %v7303_v20, %v2380_v0  ;;  %3863 = vmatpush.bf16.msra.mxu1 %v4942_v44 }
 0x395   : > { %v2444_v52 = vmax.f32 %v2414_v19, 0.0 }
 0x396   : > { %v2345_v2 = vpop.f32.mrf.mxu0 }
 0x397   : > { %v2648_v22 = vsel %vm7376_vm15, %v2444_v52, 0.0  ;;  %v2346_v41 = vadd.f32 %v2345_v2, %v2262_v23  ;;  %3864 = vmatpush.bf16.msra.mxu1 %v4941_v29  ;;  %v2900_v29 = vshll.u32 %v7349_v27, 16 }
 0x398   : > { %v2678_v55 = vpack.c.bf16 %v2648_v22, %v2648_v22 }
 0x399   : > { %v2381_v40 = vmul.f32 %v7290_v30, %v2346_v41  ;;  %3774 = vmatmul.bf16.gmra.mxu3 %v6978_v12  ;;  %v4940_v41 = vld [vmem:[%s7720_s5 + $0x1c8] sm:$0xff] }
 0x39a   : > { %v2917_v32 = vunpack.c.l.b16 %v2678_v55 }
 0x39b   : > { %v2415_v28 = vadd.f32 %v7303_v20, %v2381_v40  ;;  %3725 = vmatmul.bf16.gmra.mxu2 %v6983_v14  ;;  %3865 = vmatpush.bf16.msra.mxu1 %v4940_v41  ;;  %v2898_v41 = vshrl.u32 %v7349_v27, 16 }
 0x39c   : > { %v7410_v15 = vpack.c.b16 %v2917_v32, %v2916_v25  ;;  %v3638_v59 = vpop.f32.mrf.mxu3 }
 0x39d   : > { %v2445_v30 = vmax.f32 %v2415_v28, 0.0 }
 0x39e   : > { %v3589_v3 = vpop.f32.mrf.mxu2  ;;  %3681 = vmatmul.bf16.gmra.mxu1 %v7005_v45  ;;  %v7429_v45 = vpop.f32.mrf.mxu1 }
 0x39f   : > { %v7417_v20 = vsel %vm2559_vm5, %v2445_v30, 0.0  ;;  %v3590_v51 = vadd.f32 %v3589_v3, %v3540_v37  ;;  %v4947_v37 = vld [vmem:[%s7720_s5 + $0x200] sm:$0xff] }
 0x3a1   : > { %v7422_v49 = vadd.f32 %v3638_v59, %v3590_v51  ;;  %v2676_v51 = vpack.c.bf16 %v7365_v39, %v7365_v39 }
 0x3a4   : > { %v7437_v48 = vpop.f32.mrf.mxu3 }
 0x3a6   : > { %v7431_v26 = vpop.f32.mrf.mxu2  ;;  %v3545_v56 = vpop.f32.mrf.mxu1 }
 0x3a9   : > { %3779 = vmatmul.bf16.gmra.mxu3 %v7037_v47 }
 0x3ab   : > { %3730 = vmatmul.bf16.gmra.mxu2 %v7042_v16 }
 0x3ae   : > { %3686 = vmatmul.bf16.gmra.mxu1 %v7062_v57  ;;  %v4949_v57 = vld [vmem:[%s7720_s5 + $0x210] sm:$0xff]  ;;  %v7450_v5 = vpop.f32.mrf.mxu1 }
 0x3af   : > { %3913 = vmatpush.bf16.msra.mxu2 %v4949_v57 }
 0x3b4   : > { %v3643_v4 = vpop.f32.mrf.mxu3 }
 0x3b6   : > { %v3594_v6 = vpop.f32.mrf.mxu2 }
 0x3b7   : > { %v3595_v31 = vadd.f32 %v3594_v6, %v3545_v56  ;;  %v2895_v56 = vunpack.c.l.b16 %v2676_v51 }
 0x3b9   : > { %3784 = vmatmul.bf16.gmra.mxu3 %v7094_v61  ;;  %v7440_v0 = vadd.f32 %v3643_v4, %v3595_v31 }
 0x3bb   : > { %3735 = vmatmul.bf16.gmra.mxu2 %v7100_v58  ;;  %v3550_v52 = vpop.f32.mrf.mxu1 }
 0x3bc   : > { %v7452_v19 = vpop.f32.mrf.mxu3 }
 0x3be   : > { %3691 = vmatmul.bf16.gmra.mxu1 %v7119_v36  ;;  %v7454_v23 = vpop.f32.mrf.mxu2  ;;  %v4948_v36 = vld [vmem:[%s7720_s5 + $0x208] sm:$0xff] }
 0x3bf   : > { %3914 = vmatpush.bf16.msra.mxu2 %v4948_v36 }
 0x3c3   : > { %v3552_v55 = vpop.f32.mrf.mxu1  ;;  %3915 = vmatpush.bf16.msra.mxu2 %v4947_v37 }
 0x3c9   : > { %3789 = vmatmul.bf16.gmra.mxu3 %v7152_v33 }
 0x3cb   : > { %3740 = vmatmul.bf16.gmra.mxu2 %v7160_v10 }
 0x3cc   : > { %v3648_v54 = vpop.f32.mrf.mxu3 }
 0x3ce   : > { %v3599_v2 = vpop.f32.mrf.mxu2  ;;  %3696 = vmatmul.bf16.gmra.mxu1 %v7192_v1  ;;  %v4939_v1 = vld [vmem:[%s7720_s5 + $0x1c0] sm:$0xff] }
 0x3cf   : > { %v3600_v22 = vadd.f32 %v3599_v2, %v3550_v52  ;;  %3866 = vmatpush.bf16.msra.mxu1 %v4939_v1  ;;  %v2902_v2 = vrot.slane %v2900_v29, 1 }
 0x3d1   : > { %v7465_v40 = vadd.f32 %v3648_v54, %v3600_v22  ;;  %v2910_v22 = vrot.slane %v7349_v27, 1 }
 0x3d3   : > { %v3555_v24 = vpop.f32.mrf.mxu1 }
 0x3d4   : > { %v3650_v28 = vpop.f32.mrf.mxu3 }
 0x3d6   : > { %v3601_v25 = vpop.f32.mrf.mxu2 }
 0x3d7   : > { %v3602_v32 = vadd.f32 %v3601_v25, %v3552_v55 }
 0x3d9   : > { %3794 = vmatmul.bf16.gmra.mxu3 %v7238_v60  ;;  %v7468_v30 = vadd.f32 %v3650_v28, %v3602_v32  ;;  %v2903_v32 = vor.u32 %v2902_v2, %v2898_v41 }
 0x3db   : > { %3745 = vmatmul.bf16.gmra.mxu2 %v7247_v50  ;;  %v3557_v3 = vpop.f32.mrf.mxu1 }
 0x3de   : > { %3701 = vmatmul.bf16.gmra.mxu1 %v7273_v11  ;;  %v2896_v11 = vpack.c.b16 %v2895_v56, %v2895_v56 }
 0x3e0   : > { %v2905_v52 = vshll.u32 %v2896_v11, 16  ;;  %v2911_v54 = vrot.slane %v2896_v11, 1 }
 0x3e2   : > { %v2907_v55 = vrot.slane %v2905_v52, 1  ;;  %v7491_v25 = vsel %vm670_vm1, %v2910_v22, %v2911_v54 }
 0x3e4   : > { %v3653_v63 = vpop.f32.mrf.mxu3  ;;  %v7495_v28 = vsel %vm519_vm0, %v2903_v32, %v2907_v55 }
 0x3e6   : > { %v3604_v59 = vpop.f32.mrf.mxu2 }
 0x3e7   : > { %v3605_v8 = vadd.f32 %v3604_v59, %v3555_v24 }
 0x3e9   : > { %3799 = vmatmul.bf16.gmra.mxu3 %v7319_v9  ;;  %v7481_v44 = vadd.f32 %v3653_v63, %v3605_v8 }
 0x3eb   : > { %v3560_v6 = vpop.f32.mrf.mxu1  ;;  %3750 = vmatmul.bf16.gmra.mxu2 %v7325_v34 }
 0x3ec   : > { %v3655_v57 = vpop.f32.mrf.mxu3 }
 0x3ee   : > { %v3606_v31 = vpop.f32.mrf.mxu2  ;;  %3706 = vmatmul.bf16.gmra.mxu1 %v7349_v27 }
 0x3ef   : > { %v3607_v4 = vadd.f32 %v3606_v31, %v3557_v3 }
 0x3f1   : > { %v7486_v39 = vadd.f32 %v3655_v57, %v3607_v4 }
 0x3f3   : > { %v3562_v36 = vpop.f32.mrf.mxu1 }
 0x3f9   : > { %3804 = vmatmul.bf16.gmra.mxu3 %v7491_v25 }
 0x3fb   : > { %v3672_v24 = vpop.f32.mrf.mxu1  ;;  %3755 = vmatmul.bf16.gmra.mxu2 %v7495_v28 }
 0x3fc   : > { %v3673_v1 = vadd.f32 %v3672_v24, %v7214_v43  ;;  %v3658_v37 = vpop.f32.mrf.mxu3 }
 0x3fe   : > { %v3609_v3 = vpop.f32.mrf.mxu2  ;;  %3867 = vmatmul.bf16.vlgmr.msra.gmra.mxu1 %v6983_v14  ;;  %v3577_v14 = vadd.f32 %v7261_v21, %v7256_v17 }
 0x3ff   : > { %v3610_v27 = vadd.f32 %v3609_v3, %v3560_v6 }
 0x400   : > { %v3626_v57 = vadd.f32 %v7267_v18, %v3577_v14 }
 0x401   : > { %v7500_v51 = vadd.f32 %v3658_v37, %v3610_v27 }
 0x403   : > { %v3674_v63 = vpop.f32.mrf.mxu1 }
 0x404   : > { %v3660_v56 = vpop.f32.mrf.mxu3  ;;  %v3675_v52 = vadd.f32 %v3674_v63, %v3626_v57 }
 0x406   : > { %v3611_v59 = vpop.f32.mrf.mxu2 }
 0x407   : > { %v3612_v8 = vadd.f32 %v3611_v59, %v3562_v36 }
 0x409   : > { %3853 = vmatmul.bf16.vlgmr.msra.gmra.mxu3 %v7410_v15  ;;  %v7503_v31 = vadd.f32 %v3660_v56, %v3612_v8 }
 0x40b   : > { %v3677_v11 = vpop.f32.mrf.mxu1  ;;  %3916 = vmatmul.bf16.vlgmr.msra.gmra.mxu2 %v6978_v12 }
 0x40c   : > { %v3678_v43 = vadd.f32 %v3677_v11, %v7294_v42 }
 0x40e   : > { %v3721_v4 = vpop.f32.mrf.mxu2  ;;  %3872 = vmatmul.bf16.gmra.mxu1 %v7042_v16  ;;  %v3582_v16 = vadd.f32 %v7335_v62, %v7333_v46 }
 0x40f   : > { %v7510_v6 = vadd.f32 %v3721_v4, %v3673_v1 }
 0x410   : > { %v3631_v21 = vadd.f32 %v7343_v53, %v3582_v16 }
 0x413   : > { %v3679_v29 = vpop.f32.mrf.mxu1 }
 0x414   : > { %v3680_v22 = vadd.f32 %v3679_v29, %v3631_v21 }
 0x416   : > { %v3723_v36 = vpop.f32.mrf.mxu2 }
 0x417   : > { %v7513_v54 = vadd.f32 %v3723_v36, %v3675_v52  ;;  %v2926_v52 = vshll.u32 %v7410_v15, 16 }
 0x41b   : > { %v3682_v2 = vpop.f32.mrf.mxu1  ;;  %3921 = vmatmul.bf16.gmra.mxu2 %v7037_v47 }
 0x41c   : > { %v3683_v12 = vadd.f32 %v3682_v2, %v7369_v7 }
 0x41e   : > { %v3726_v42 = vpop.f32.mrf.mxu2  ;;  %3877 = vmatmul.bf16.gmra.mxu1 %v7100_v58  ;;  %v3587_v58 = vadd.f32 %v7397_v13, %v7395_v38 }
 0x41f   : > { %v7520_v17 = vadd.f32 %v3726_v42, %v3678_v43  ;;  %v3770_v43 = vpop.f32.mrf.mxu3 }
 0x420   : > { %v3636_v62 = vadd.f32 %v7401_v35, %v3587_v58 }
 0x423   : > { %v3684_v18 = vpop.f32.mrf.mxu1 }
 0x424   : > { %v3685_v24 = vadd.f32 %v3684_v18, %v3636_v62 }
 0x426   : > { %v3728_v41 = vpop.f32.mrf.mxu2 }
 0x427   : > { %v7523_v55 = vadd.f32 %v3728_v41, %v3680_v22 }
 0x42b   : > { %v3687_v32 = vpop.f32.mrf.mxu1  ;;  %3926 = vmatmul.bf16.gmra.mxu2 %v7094_v61 }
 0x42c   : > { %v3688_v47 = vadd.f32 %v3687_v32, %v7422_v49  ;;  %v3819_v32 = vpop.f32.mrf.mxu0 }
 0x42e   : > { %v3731_v7 = vpop.f32.mrf.mxu2  ;;  %3882 = vmatmul.bf16.gmra.mxu1 %v7160_v10  ;;  %v3592_v10 = vadd.f32 %v7431_v26, %v7429_v45 }
 0x42f   : > { %v7530_v46 = vadd.f32 %v3731_v7, %v3683_v12 }
 0x430   : > { %v3641_v13 = vadd.f32 %v7437_v48, %v3592_v10 }
 0x433   : > { %v3689_v53 = vpop.f32.mrf.mxu1 }
 0x434   : > { %v3690_v27 = vadd.f32 %v3689_v53, %v3641_v13 }
 0x436   : > { %v3733_v1 = vpop.f32.mrf.mxu2 }
 0x437   : > { %v7533_v37 = vadd.f32 %v3733_v1, %v3685_v24 }
 0x43b   : > { %v3692_v3 = vpop.f32.mrf.mxu1  ;;  %3931 = vmatmul.bf16.gmra.mxu2 %v7152_v33 }
 0x43c   : > { %v3693_v61 = vadd.f32 %v3692_v3, %v7440_v0  ;;  %v3821_v3 = vpop.f32.mrf.mxu0 }
 0x43e   : > { %v3736_v49 = vpop.f32.mrf.mxu2  ;;  %3887 = vmatmul.bf16.gmra.mxu1 %v7247_v50  ;;  %v3597_v50 = vadd.f32 %v7454_v23, %v7450_v5 }
 0x43f   : > { %v7540_v38 = vadd.f32 %v3736_v49, %v3688_v47 }
 0x440   : > { %v3646_v26 = vadd.f32 %v7452_v19, %v3597_v50 }
 0x443   : > { %v3694_v35 = vpop.f32.mrf.mxu1 }
 0x444   : > { %v3695_v11 = vadd.f32 %v3694_v35, %v3646_v26  ;;  %v3824_v35 = vpop.f32.mrf.mxu0 }
 0x446   : > { %v3738_v63 = vpop.f32.mrf.mxu2 }
 0x447   : > { %v7543_v59 = vadd.f32 %v3738_v63, %v3690_v27 }
 0x44b   : > { %v3697_v8 = vpop.f32.mrf.mxu1  ;;  %3936 = vmatmul.bf16.gmra.mxu2 %v7238_v60  ;;  %v2679_v60 = vpack.c.bf16 %v7417_v20, %v7417_v20 }
 0x44c   : > { %v3698_v33 = vadd.f32 %v3697_v8, %v7465_v40 }
 0x44d   : > { %v2921_v5 = vunpack.c.l.b16 %v2679_v60  ;;  %v7595_v60 = vld [vmem:[%s7722_s7] ss:$0 sm:$0xff] }
 0x44e   : > { %v3741_v0 = vpop.f32.mrf.mxu2  ;;  %3892 = vmatmul.bf16.gmra.mxu1 %v7325_v34 }
 0x44f   : > { %v7550_v45 = vadd.f32 %v3741_v0, %v3693_v61  ;;  %v2922_v57 = vpack.c.b16 %v2921_v5, %v2921_v5 }
 0x451   : > { %v2931_v2 = vshll.u32 %v2922_v57, 16  ;;  %v2937_v53 = vrot.slane %v2922_v57, 1  ;;  %v3997_v57 = vld [vmem:[%s5445_s16] sm:$0xff] }
 0x453   : > { %v3699_v48 = vpop.f32.mrf.mxu1  ;;  %v2933_v42 = vrot.slane %v2931_v2, 1 }
 0x454   : > { %v3700_v56 = vadd.f32 %v3699_v48, %v7468_v30  ;;  %v3772_v30 = vpop.f32.mrf.mxu3 }
 0x455   : > { %v3773_v26 = vadd.f32 %v3772_v30, %v7513_v54 }
 0x456   : > { %v3743_v4 = vpop.f32.mrf.mxu2 }
 0x457   : > { %v7554_v14 = vadd.f32 %v3743_v4, %v3695_v11  ;;  %v3826_v11 = vpop.f32.mrf.mxu0 }
 0x45b   : > { %v3702_v40 = vpop.f32.mrf.mxu1  ;;  %3941 = vmatmul.bf16.gmra.mxu2 %v7319_v9  ;;  %v2928_v9 = vrot.slane %v2926_v52, 1 }
 0x45c   : > { %v3703_v34 = vadd.f32 %v3702_v40, %v7481_v44  ;;  %v2924_v44 = vshrl.u32 %v7410_v15, 16  ;;  %v3775_v16 = vpop.f32.mrf.mxu3 }
 0x45d   : > { %v3776_v5 = vadd.f32 %v3775_v16, %v7520_v17 }
 0x45e   : > { %v3746_v23 = vpop.f32.mrf.mxu2  ;;  %3897 = vmatmul.bf16.gmra.mxu1 %v7495_v28  ;;  %v2929_v28 = vor.u32 %v2928_v9, %v2924_v44 }
 0x45f   : > { %v7561_v19 = vadd.f32 %v3746_v23, %v3698_v33  ;;  %v3829_v52 = vpop.f32.mrf.mxu0  ;;  %v3825_v2 = vadd.f32 %v3824_v35, %v3776_v5  ;;  %v4000_v35 = vld [vmem:[%s5445_s16 + $0x18] sm:$0xff] }
 0x460   : > { %v2934_v22 = vsel %vm519_vm0, %v2929_v28, %v2933_v42 }
 0x463   : > { %v3704_v29 = vpop.f32.mrf.mxu1 }
 0x464   : > { %v3705_v36 = vadd.f32 %v3704_v29, %v7486_v39  ;;  %v3777_v7 = vpop.f32.mrf.mxu3 }
 0x465   : > { %v3778_v17 = vadd.f32 %v3777_v7, %v7523_v55 }
 0x466   : > { %v3748_v20 = vpop.f32.mrf.mxu2 }
 0x467   : > { %v7565_v12 = vadd.f32 %v3748_v20, %v3700_v56  ;;  %v7587_v56 = vld [vmem:[%s7721_s6] ss:$0 sm:$0xff] }
 0x46b   : > { %v3707_v21 = vpop.f32.mrf.mxu1  ;;  %3946 = vmatmul.bf16.gmra.mxu2 %v7491_v25  ;;  %v2936_v25 = vrot.slane %v7410_v15, 1 }
 0x46c   : > { %v3708_v18 = vadd.f32 %v3707_v21, %v7500_v51  ;;  %v3780_v61 = vpop.f32.mrf.mxu3 }
 0x46d   : > { %v2938_v1 = vsel %vm670_vm1, %v2936_v25, %v2937_v53  ;;  %v3831_v53 = vpop.f32.mrf.mxu0  ;;  %v3781_v55 = vadd.f32 %v3780_v61, %v7530_v46 }
 0x46e   : > { %v3751_v41 = vpop.f32.mrf.mxu2  ;;  %3902 = vmatmul.bf16.gmra.mxu1 %v2934_v22 }
 0x46f   : > { %v7571_v39 = vadd.f32 %v3751_v41, %v3703_v34 }
 0x473   : > { %v3709_v47 = vpop.f32.mrf.mxu1 }
 0x474   : > { %v3710_v58 = vadd.f32 %v3709_v47, %v7503_v31  ;;  %v3771_v31 = vadd.f32 %v3770_v43, %v7510_v6  ;;  %v3782_v8 = vpop.f32.mrf.mxu3  ;;  %v3822_v6 = vadd.f32 %v3821_v3, %v3773_v26  ;;  %v3827_v47 = vadd.f32 %v3826_v11, %v3778_v17 }
 0x475   : > { %v3834_v26 = vpop.f32.mrf.mxu0  ;;  %v3783_v11 = vadd.f32 %v3782_v8, %v7533_v37 }
 0x476   : > { %v3753_v62 = vpop.f32.mrf.mxu2  ;;  %v3820_v33 = vadd.f32 %v3819_v32, %v3771_v31 }
 0x477   : > { %v7574_v24 = vadd.f32 %v3753_v62, %v3705_v36  ;;  %v3998_v36 = vld [vmem:[%s5445_s16 + $0x8] sm:$0xff] }
 0x47b   : > { %v3868_v51 = vpop.f32.mrf.mxu1  ;;  %3951 = vmatmul.bf16.gmra.mxu2 %v2938_v1 }
 0x47c   : > { %v3869_v15 = vadd.f32 %v3868_v51, %v3820_v33  ;;  %v7589_v4 = vpop.f32.mrf.mxu3 }
 0x47d   : > { %v3836_v8 = vpop.f32.mrf.mxu0 }
 0x47e   : > { %v3756_v49 = vpop.f32.mrf.mxu2 }
 0x47f   : > { %v7578_v10 = vadd.f32 %v3756_v49, %v3708_v18  ;;  %v3999_v49 = vld [vmem:[%s5445_s16 + $0x10] sm:$0xff] }
 0x483   : > { %v3870_v13 = vpop.f32.mrf.mxu1 }
 0x484   : > { %v3871_v54 = vadd.f32 %v3870_v13, %v3822_v6  ;;  %v3787_v42 = vpop.f32.mrf.mxu3 }
 0x486   : > { %v3758_v27 = vpop.f32.mrf.mxu2 }
 0x487   : > { %v7581_v63 = vadd.f32 %v3758_v27, %v3710_v58  ;;  %v3830_v27 = vadd.f32 %v3829_v52, %v3781_v55  ;;  %v4001_v52 = vld [vmem:[%s5445_s16 + $0x20] sm:$0xff] }
 0x48b   : > { %v3873_v0 = vpop.f32.mrf.mxu1 }
 0x48c   : > { %v3874_v21 = vadd.f32 %v3873_v0, %v3825_v2  ;;  %v3790_v1 = vpop.f32.mrf.mxu3 }
 0x48e   : > { %v3917_v50 = vpop.f32.mrf.mxu2 }
 0x48f   : > { %v3918_v48 = vadd.f32 %v3917_v50, %v3869_v15 }
 0x491   : > { %v3961_v43 = vmul.f32 %v7587_v56, %v3918_v48 }
 0x493   : > { %v3875_v40 = vpop.f32.mrf.mxu1  ;;  %v3981_v23 = vadd.f32 %v7595_v60, %v3961_v43 }
 0x494   : > { %v3876_v25 = vadd.f32 %v3875_v40, %v3827_v47  ;;  %v3792_v43 = vpop.f32.mrf.mxu3  ;;  %v3839_v47 = vpop.f32.mrf.mxu0 }
 0x495   : > { %v4013_v20 = vadd.f32 %v3997_v57, %v3981_v23  ;;  %v3786_v57 = vadd.f32 %v7589_v4, %v7540_v38  ;;  %v3788_v38 = vadd.f32 %v3787_v42, %v7543_v59  ;;  %v4003_v42 = vld [vmem:[%s5445_s16 + $0x30] sm:$0xff] }
 0x496   : > { %v3919_v34 = vpop.f32.mrf.mxu2 }
 0x497   : > { %v3920_v30 = vadd.f32 %v3919_v34, %v3871_v54  ;;  %v4029_v16 = vmax.f32 %v4013_v20, 0.0  ;;  %v3832_v54 = vadd.f32 %v3831_v53, %v3783_v11  ;;  %v4002_v20 = vld [vmem:[%s5445_s16 + $0x28] sm:$0xff] }
 0x499   : > { %v3962_v29 = vmul.f32 %v7587_v56, %v3920_v30 }
 0x49b   : > { %v3982_v9 = vadd.f32 %v7595_v60, %v3962_v29  ;;  %v3878_v44 = vpop.f32.mrf.mxu1 }
 0x49c   : > { %v3879_v15 = vadd.f32 %v3878_v44, %v3830_v27  ;;  %v3795_v2 = vpop.f32.mrf.mxu3 }
 0x49d   : > { %v4014_v28 = vadd.f32 %v3998_v36, %v3982_v9  ;;  %v3835_v9 = vadd.f32 %v3834_v26, %v3786_v57 }
 0x49e   : > { %v3922_v18 = vpop.f32.mrf.mxu2 }
 0x49f   : > { %v4030_v22 = vmax.f32 %v4014_v28, 0.0  ;;  %v3923_v41 = vadd.f32 %v3922_v18, %v3874_v21 }
 0x4a1   : > { %v5003_v32 = vpack.c.bf16 %v4030_v22, %v4029_v16  ;;  %v3963_v58 = vmul.f32 %v7587_v56, %v3923_v41 }
 0x4a3   : > { %5004 = vst [vmem:[%s7605_s26] sm:$0xff] %v5003_v32   ;;  %v3880_v62 = vpop.f32.mrf.mxu1  ;;  %v3983_v7 = vadd.f32 %v7595_v60, %v3963_v58  ;;  %v3837_v58 = vadd.f32 %v3836_v8, %v3788_v38  ;;  %v4006_v8 = vld [vmem:[%s5445_s16 + $0x48] sm:$0xff] }
 0x4a4   : > { %v3881_v23 = vadd.f32 %v3880_v62, %v3832_v54  ;;  %v3797_v53 = vpop.f32.mrf.mxu3 }
 0x4a5   : > { %v4015_v31 = vadd.f32 %v3999_v49, %v3983_v7  ;;  %v3791_v7 = vadd.f32 %v3790_v1, %v7550_v45 }
 0x4a6   : > { %v3924_v51 = vpop.f32.mrf.mxu2 }
 0x4a7   : > { %v3925_v3 = vadd.f32 %v3924_v51, %v3876_v25  ;;  %v4031_v46 = vmax.f32 %v4015_v31, 0.0 }
 0x4a9   : > { %v3964_v13 = vmul.f32 %v7587_v56, %v3925_v3 }
 0x4ab   : > { %v3984_v33 = vadd.f32 %v7595_v60, %v3964_v13  ;;  %v3883_v0 = vpop.f32.mrf.mxu1  ;;  %v4004_v13 = vld [vmem:[%s5445_s16 + $0x38] sm:$0xff] }
 0x4ac   : > { %v3884_v18 = vadd.f32 %v3883_v0, %v3835_v9 }
 0x4ad   : > { %v4016_v50 = vadd.f32 %v4000_v35, %v3984_v33  ;;  %v3840_v35 = vadd.f32 %v3839_v47, %v3791_v7  ;;  %v3841_v33 = vpop.f32.mrf.mxu0 }
 0x4ae   : > { %v3927_v48 = vpop.f32.mrf.mxu2 }
 0x4af   : > { %v4032_v61 = vmax.f32 %v4016_v50, 0.0  ;;  %v3928_v6 = vadd.f32 %v3927_v48, %v3879_v15  ;;  %v3800_v50 = vpop.f32.mrf.mxu3  ;;  %v3793_v48 = vadd.f32 %v3792_v43, %v7554_v14  ;;  %v4005_v43 = vld [vmem:[%s5445_s16 + $0x40] sm:$0xff] }
 0x4b1   : > { %v5008_v40 = vpack.c.bf16 %v4032_v61, %v4031_v46  ;;  %v3965_v34 = vmul.f32 %v7587_v56, %v3928_v6  ;;  %v3842_v6 = vadd.f32 %v3841_v33, %v3793_v48 }
 0x4b3   : > { %5051 = vst [vmem:[%s7605_s26 + $0x8] sm:$0xff] %v5008_v40   ;;  %v3885_v5 = vpop.f32.mrf.mxu1  ;;  %v3985_v29 = vadd.f32 %v7595_v60, %v3965_v34 }
 0x4b4   : > { %v3886_v25 = vadd.f32 %v3885_v5, %v3837_v58  ;;  %v3801_v58 = vadd.f32 %v3800_v50, %v7571_v39 }
 0x4b5   : > { %v4017_v44 = vadd.f32 %v4001_v52, %v3985_v29  ;;  %v3844_v34 = vpop.f32.mrf.mxu0 }
 0x4b6   : > { %v3929_v30 = vpop.f32.mrf.mxu2 }
 0x4b7   : > { %v3930_v37 = vadd.f32 %v3929_v30, %v3881_v23  ;;  %v4033_v4 = vmax.f32 %v4017_v44, 0.0  ;;  %v3796_v23 = vadd.f32 %v3795_v2, %v7561_v19  ;;  %v3802_v14 = vpop.f32.mrf.mxu3 }
 0x4b8   : > { %v3803_v39 = vadd.f32 %v3802_v14, %v7574_v24 }
 0x4b9   : > { %v3966_v36 = vmul.f32 %v7587_v56, %v3930_v37  ;;  %v3845_v52 = vadd.f32 %v3844_v34, %v3796_v23  ;;  %v4010_v34 = vld [vmem:[%s5445_s16 + $0x68] sm:$0xff] }
 0x4bb   : > { %v3986_v21 = vadd.f32 %v7595_v60, %v3966_v36  ;;  %v3888_v28 = vpop.f32.mrf.mxu1 }
 0x4bc   : > { %v3889_v0 = vadd.f32 %v3888_v28, %v3840_v35  ;;  %v3798_v28 = vadd.f32 %v3797_v53, %v7565_v12 }
 0x4bd   : > { %v4018_v17 = vadd.f32 %v4002_v20, %v3986_v21 }
 0x4be   : > { %v3932_v16 = vpop.f32.mrf.mxu2 }
 0x4bf   : > { %v4034_v22 = vmax.f32 %v4018_v17, 0.0  ;;  %v3933_v41 = vadd.f32 %v3932_v16, %v3884_v18  ;;  %v3846_v17 = vpop.f32.mrf.mxu0  ;;  %v3805_v38 = vpop.f32.mrf.mxu3 }
 0x4c0   : > { %v3806_v24 = vadd.f32 %v3805_v38, %v7578_v10 }
 0x4c1   : > { %v5013_v32 = vpack.c.bf16 %v4034_v22, %v4033_v4  ;;  %v3967_v62 = vmul.f32 %v7587_v56, %v3933_v41  ;;  %v3847_v4 = vadd.f32 %v3846_v17, %v3798_v28  ;;  %v4012_v17 = vld [vmem:[%s5445_s16 + $0x78] sm:$0xff] }
 0x4c3   : > { %5052 = vst [vmem:[%s7605_s26 + $0x10] sm:$0xff] %v5013_v32   ;;  %v3890_v51 = vpop.f32.mrf.mxu1  ;;  %v3987_v3 = vadd.f32 %v7595_v60, %v3967_v62 }
 0x4c4   : > { %v3891_v54 = vadd.f32 %v3890_v51, %v3842_v6 }
 0x4c5   : > { %v4019_v27 = vadd.f32 %v4003_v42, %v3987_v3 }
 0x4c6   : > { %v3934_v55 = vpop.f32.mrf.mxu2 }
 0x4c7   : > { %v3935_v59 = vadd.f32 %v3934_v55, %v3886_v25  ;;  %v4035_v45 = vmax.f32 %v4019_v27, 0.0  ;;  %v3849_v53 = vpop.f32.mrf.mxu0  ;;  %v4007_v25 = vld [vmem:[%s5445_s16 + $0x50] sm:$0xff]  ;;  %v4008_v55 = vld [vmem:[%s5445_s16 + $0x58] sm:$0xff]  ;;  %v3807_v42 = vpop.f32.mrf.mxu3 }
 0x4c8   : > { %v3850_v7 = vadd.f32 %v3849_v53, %v3801_v58 }
 0x4c9   : > { %v3968_v49 = vmul.f32 %v7587_v56, %v3935_v59 }
 0x4cb   : > { %v3988_v31 = vadd.f32 %v7595_v60, %v3968_v49  ;;  %v3893_v46 = vpop.f32.mrf.mxu1 }
 0x4cc   : > { %v3894_v9 = vadd.f32 %v3893_v46, %v3845_v52 }
 0x4cd   : > { %v4020_v15 = vadd.f32 %v4004_v13, %v3988_v31 }
 0x4ce   : > { %v3937_v26 = vpop.f32.mrf.mxu2 }
 0x4cf   : > { %v4036_v1 = vmax.f32 %v4020_v15, 0.0  ;;  %v3938_v11 = vadd.f32 %v3937_v26, %v3889_v0  ;;  %v3851_v50 = vpop.f32.mrf.mxu0 }
 0x4d0   : > { %v3852_v26 = vadd.f32 %v3851_v50, %v3803_v39 }
 0x4d1   : > { %v5018_v61 = vpack.c.bf16 %v4036_v1, %v4035_v45  ;;  %v3969_v40 = vmul.f32 %v7587_v56, %v3938_v11  ;;  %v3854_v1 = vpop.f32.mrf.mxu3 }
 0x4d3   : > { %5053 = vst [vmem:[%s7605_s26 + $0x18] sm:$0xff] %v5018_v61   ;;  %v3989_v30 = vadd.f32 %v7595_v60, %v3969_v40  ;;  %v3895_v37 = vpop.f32.mrf.mxu1  ;;  %v4009_v40 = vld [vmem:[%s5445_s16 + $0x60] sm:$0xff] }
 0x4d4   : > { %v3896_v32 = vadd.f32 %v3895_v37, %v3847_v4 }
 0x4d5   : > { %v4021_v36 = vadd.f32 %v4005_v43, %v3989_v30 }
 0x4d6   : > { %v3939_v5 = vpop.f32.mrf.mxu2 }
 0x4d7   : > { %v3940_v57 = vadd.f32 %v3939_v5, %v3891_v54  ;;  %v4037_v19 = vmax.f32 %v4021_v36, 0.0  ;;  %v3855_v5 = vadd.f32 %v3854_v1, %v3806_v24  ;;  %v3808_v36 = vadd.f32 %v3807_v42, %v7581_v63  ;;  %v4011_v63 = vld [vmem:[%s5445_s16 + $0x70] sm:$0xff]  ;;  %s5218_s16 = scalar_lea.hbm %s5217_s29, 64 }
 0x4d8   : > { %p5219_p5 = scmp.ne.s32.totalorder %s5217_s29, %s5218_s16  ;;  %p5224_p10 = scmp.lt.s32.totalorder %s5222_s25, %s5218_s16 }
 0x4d9   : > { %v3970_v29 = vmul.f32 %v7587_v56, %v3940_v57  ;;  %v3856_v52 = vpop.f32.mrf.mxu3 }
 0x4da   : > { %p5220_p6 = pnand %p5219_p5, %p5416_p9  ;;  %p5225_p11 = por %p5224_p10, %p5223_p8 }
 0x4db   : > { %v3990_v20 = vadd.f32 %v7595_v60, %v3970_v29  ;;  %v3898_v41 = vpop.f32.mrf.mxu1 }
 0x4dc   : > { %v3899_v49 = vadd.f32 %v3898_v41, %v3850_v7  ;;  %p5221_p7 = pneg %p5220_p6 }
 0x4dd   : > { %v4022_v44 = vadd.f32 %v4006_v8, %v3990_v20 }
 0x4de   : > { %v3942_v21 = vpop.f32.mrf.mxu2  ;;  %p5226_p13 = pnand %p5225_p11, %p5221_p7 }
 0x4df   : > { %v4038_v2 = vmax.f32 %v4022_v44, 0.0  ;;  %v3943_v18 = vadd.f32 %v3942_v21, %v3894_v9  ;;  %v3857_v9 = vadd.f32 %v3856_v52, %v3808_v36 }
 0x4e1   : > { %v5023_v16 = vpack.c.bf16 %v4038_v2, %v4037_v19  ;;  %v3971_v22 = vmul.f32 %v7587_v56, %v3943_v18 }
 0x4e3   : > { %5054 = vst [vmem:[%s7605_s26 + $0x20] sm:$0xff] %v5023_v16   ;;  %v3991_v62 = vadd.f32 %v7595_v60, %v3971_v22  ;;  %v3900_v35 = vpop.f32.mrf.mxu1 }
 0x4e4   : > { %v3901_v45 = vadd.f32 %v3900_v35, %v3852_v26 }
 0x4e5   : > { %v4023_v3 = vadd.f32 %v4007_v25, %v3991_v62 }
 0x4e6   : > { %v3944_v47 = vpop.f32.mrf.mxu2 }
 0x4e7   : > { %v3945_v12 = vadd.f32 %v3944_v47, %v3896_v32  ;;  %v4039_v31 = vmax.f32 %v4023_v3, 0.0 }
 0x4e9   : > { %v3972_v51 = vmul.f32 %v7587_v56, %v3945_v12 }
 0x4eb   : > { %v3992_v59 = vadd.f32 %v7595_v60, %v3972_v51  ;;  %v3903_v6 = vpop.f32.mrf.mxu1 }
 0x4ec   : > { %v3904_v57 = vadd.f32 %v3903_v6, %v3855_v5 }
 0x4ed   : > { %v4024_v13 = vadd.f32 %v4008_v55, %v3992_v59 }
 0x4ee   : > { %v3947_v27 = vpop.f32.mrf.mxu2 }
 0x4ef   : > { %v4040_v33 = vmax.f32 %v4024_v13, 0.0  ;;  %v3948_v0 = vadd.f32 %v3947_v27, %v3899_v49 }
 0x4f1   : > { %v5028_v15 = vpack.c.bf16 %v4040_v33, %v4039_v31  ;;  %v3973_v48 = vmul.f32 %v7587_v56, %v3948_v0 }
 0x4f3   : > { %5055 = vst [vmem:[%s7605_s26 + $0x28] sm:$0xff] %v5028_v15   ;;  %v3993_v46 = vadd.f32 %v7595_v60, %v3973_v48  ;;  %v3905_v20 = vpop.f32.mrf.mxu1 }
 0x4f4   : > { %v3906_v21 = vadd.f32 %v3905_v20, %v3857_v9 }
 0x4f5   : > { %v4025_v23 = vadd.f32 %v4009_v40, %v3993_v46 }
 0x4f6   : > { %v3949_v11 = vpop.f32.mrf.mxu2 }
 0x4f7   : > { %v3950_v61 = vadd.f32 %v3949_v11, %v3901_v45  ;;  %v4041_v29 = vmax.f32 %v4025_v23, 0.0 }
 0x4f9   : > { %v3974_v54 = vmul.f32 %v7587_v56, %v3950_v61 }
 0x4fb   : > { %v3994_v30 = vadd.f32 %v7595_v60, %v3974_v54 }
 0x4fd   : > { %v4026_v14 = vadd.f32 %v4010_v34, %v3994_v30 }
 0x4fe   : > { %v3952_v43 = vpop.f32.mrf.mxu2 }
 0x4ff   : > { %v4042_v37 = vmax.f32 %v4026_v14, 0.0  ;;  %v3953_v8 = vadd.f32 %v3952_v43, %v3904_v57 }
 0x501   : > { %v5033_v10 = vpack.c.bf16 %v4042_v37, %v4041_v29  ;;  %v3975_v44 = vmul.f32 %v7587_v56, %v3953_v8 }
 0x503   : > { %5056 = vst [vmem:[%s7605_s26 + $0x30] sm:$0xff] %v5033_v10   ;;  %v3995_v19 = vadd.f32 %v7595_v60, %v3975_v44 }
 0x505   : > { %v4027_v16 = vadd.f32 %v4011_v63, %v3995_v19 }
 0x506   : > { %v3954_v28 = vpop.f32.mrf.mxu2 }
 0x507   : > { %v3955_v2 = vadd.f32 %v3954_v28, %v3906_v21  ;;  %v4043_v22 = vmax.f32 %v4027_v16, 0.0 }
 0x509   : > { %v3976_v18 = vmul.f32 %v7587_v56, %v3955_v2 }
 0x50b   : > { %v3996_v38 = vadd.f32 %v7595_v60, %v3976_v18 }
 0x50d   : > { %v4028_v4 = vadd.f32 %v4012_v17, %v3996_v38 }
 0x50f   : > { %v4044_v41 = vmax.f32 %v4028_v4, 0.0 }
 0x511   : > { %v5038_v32 = vpack.c.bf16 %v4044_v41, %v4043_v22 }
 0x513   : > { %5057 = vst [vmem:[%s7605_s26 + $0x38] sm:$0xff] %v5038_v32  }
 0x514   : > { %5229 = shalt.err (!%p5226_p13)
}
 0x515   : > { %s5304_s8 = smov 64   ;;  %s5305_s26 = smov 4  }
 0x516   : > { %5085 = dma.vmem_to_hbm [thread:$0]  (%p5416_p9), %s4094_s17, 1024, %s4096_s27, %s4078_s15, %s5304_s8, %s5304_s8, %s5305_s26  }
 0x517 PF: > { %s7990_s14 = sld [smem:[#allocation8_spill]]  ;;  %p5096_p0 = scmp.ge.s32.totalorder %s5300_s12, 2 }
 0x519   : > { %p5092_p1 = pnand %p5096_p0, %p5422_p12 }
 0x51b   : > { %p5093_p2 = pneg %p5092_p1 }
 0x51d   : > { %s4110_s30 = sand.u32 1, %s7990_s14  }
 0x51e   : > { %s4111_s9 = scalar_lea.sflag [#allocation4], %s4110_s30 }
 0x51f   : > { %5267 = dma.done.wait (%p5093_p2), %s4111_s9, 1024  }
 0x520   : > { %5269 = vsyncadd (%p5093_p2), %s4111_s9, 4294966272  ;;  %s24_s12 = sadd.s32 1, %s5300_s12   ;;  %s7992_s22 = sld [smem:[#allocation9_spill]] }
 0x521   : > { %p21_p4 = scmp.ge.s32.totalorder %s24_s12, 6   ;;  %s7993_s29 = sld [smem:[#allocation14_spill]] }
 0x522   : > { %s7994_s23 = sld [smem:[#allocation10_spill]]  ;;  %s7996_s27 = smov %s5276_s28 }
 0x523   : > { %s7995_s17 = sld [smem:[#allocation11_spill]]  ;;  %s7998_s30 = smov %s5292_s10 }
 0x524   : > { %s7999_s9 = smov %s5296_s11 }
 0x525   :  { %23 = sbr.rel (!%p21_p4) target bundleno = 9 (0x9), region = 101 }
 0x526   : > { %s7997_s28 = smov %s7992_s22 }
 0x528   : > { %s8000_s10 = smov %s7994_s23 }
 0x529   : > { %s8001_s11 = smov %s7995_s17 }
 0x52a   :  { %4117 = vsyncpa [#allocation3], 1 }
 0x52b   :  { %4119 = vsyncpa [#allocation3 + $0x1], 1 }
 0x52c   :  { %4120 = vsyncpa [#allocation4], 1 }
 0x52d   :  { %4122 = vsyncpa [#allocation4 + $0x1], 1 }

</bundles_post_ra>
